<compile_context>
chip_gen: v5e
topology: v5e:2x2
jax: 0.10.0
libtpu: 0.0.40
codegen_flags: <defaults>
</compile_context>

<pallas_src>
import functools

import numpy as np
import jax
import jax.numpy as jnp
from jax.experimental import pallas as pl
from jax.experimental.pallas import tpu as pltpu

# ----------------------------- model config ---------------------------------
IN_CHANNELS = 4          # x (3 ch) concat mask (1 ch)
OUT_CHANNELS = 3
WIDTH = 8
ENC_BLK_NUMS = [1, 1]
MIDDLE_BLK_NUM = 1
DEC_BLK_NUMS = [1, 1]
LN_EPS = 1e-6
IMG_H = 16
IMG_W = 16
LANES = 128
IN_CPAD = 8              # input channels padded 4 -> 8 (W*C == 128 everywhere)
OUT_CPAD = 8             # output channels padded 3 -> 8 (lane-dense store)
MATMUL_DTYPE = jnp.bfloat16


# --------------------------- synthetic parameters ----------------------------
def _conv_w(key, kh, kw, cin, cout, scale=0.05):
    return jax.random.normal(key, (kh, kw, cin, cout), jnp.float32) * scale


def make_params(key):
    keys = iter(jax.random.split(key, 256))
    p = {}
    p['intro_w'] = _conv_w(next(keys), 3, 3, IN_CHANNELS, WIDTH)
    p['intro_b'] = jax.random.normal(next(keys), (WIDTH,), jnp.float32) * 0.05
    p['expand_w'] = jax.random.normal(next(keys), (IN_CHANNELS, OUT_CHANNELS), jnp.float32) * 0.05
    p['expand_b'] = jax.random.normal(next(keys), (OUT_CHANNELS,), jnp.float32) * 0.05

    def conv_block_params(c):
        return dict(
            w=_conv_w(next(keys), 3, 3, c, c),
            b=jax.random.normal(next(keys), (c,), jnp.float32) * 0.05,
            gamma=jnp.ones((c,), jnp.float32),
            beta=jnp.zeros((c,), jnp.float32),
        )

    chan = WIDTH
    for i, num in enumerate(ENC_BLK_NUMS):
        for j in range(num):
            p[f'enc_{i}_{j}'] = conv_block_params(chan)
        p[f'down_{i}'] = dict(
            w=_conv_w(next(keys), 2, 2, chan, 2 * chan),                       # 2x2 stride-2
            b=jax.random.normal(next(keys), (2 * chan,), jnp.float32) * 0.05,
        )
        chan *= 2
    for i in range(MIDDLE_BLK_NUM):
        p[f'mid_{i}'] = conv_block_params(chan)
    for i, num in enumerate(DEC_BLK_NUMS):
        # 1x1 up-conv (bias=False), stored as (Cin, 2*Cin) matrix
        p[f'up_{i}'] = dict(w=jax.random.normal(next(keys), (chan, 2 * chan), jnp.float32) * 0.05)
        chan //= 2
        for j in range(num):
            p[f'dec_{i}_{j}'] = conv_block_params(chan)
    p['ending_w'] = _conv_w(next(keys), 3, 3, WIDTH, OUT_CHANNELS)
    p['ending_b'] = jax.random.normal(next(keys), (OUT_CHANNELS,), jnp.float32) * 0.05
    return p


# ------------------ host-side packing into structured matrices ---------------
def _level_dims(l):
    return IMG_H >> l, IMG_W >> l, WIDTH << l


def _pack_conv3x3_fused(w, wsp, cin_pad, cout_pad):
    """w: (3,3,cin,cout) -> (3*wsp*cin_pad, wsp*cout_pad) fused banded matrix.

    The operand is the lane-concat [h(y-1) | h(y) | h(y+1)] (K = 3*wsp*cin_pad)."""
    _, _, cin, cout = w.shape
    m = np.zeros((3, wsp, cin_pad, wsp, cout_pad), np.float32)
    for x in range(wsp):
        for dx in range(3):
            xi = x + dx - 1
            if 0 <= xi < wsp:
                m[:, xi, :cin, x, :cout] = w[:, dx, :, :]
    return m.reshape(3 * wsp * cin_pad, wsp * cout_pad)


def _pack_down_fused(w, wsp):
    """w: (2,2,Cin,2Cin) -> (2*wsp*Cin, (wsp//2)*2Cin).

    Operand rows are [row 2ho | row 2ho+1] lane-concat (K = 2*wsp*Cin = 256)."""
    _, _, cin, cout = w.shape
    m = np.zeros((2, wsp, cin, wsp // 2, cout), np.float32)
    for wo in range(wsp // 2):
        for j in range(2):
            m[:, 2 * wo + j, :, wo, :] = w[:, j, :, :]
    return m.reshape(2 * wsp * cin, (wsp // 2) * cout)


def _pack_up_fused(wu, wsp):
    """wu: (Cc, 4*Cf) 1x1 up-conv -> (wsp*Cc, 2*2*wsp*Cf) fused with PixelShuffle(2).

    Output lanes [0:128] are the fine row 2h content, [128:256] the fine row 2h+1."""
    cc, c4 = wu.shape
    cf = c4 // 4
    cols = np.arange(cf)
    m = np.zeros((2, wsp, cc, 2 * wsp, cf), np.float32)
    for w in range(wsp):
        for i in range(2):
            for j in range(2):
                # fine[2h+i, 2w+j, c] uses up-conv output channel 4c + 2i + j
                m[i, w, :, 2 * w + j, :] = wu[:, 4 * cols + 2 * i + j]
    m = m.reshape(2, wsp * cc, 2 * wsp * cf)
    return np.concatenate([m[0], m[1]], axis=1)


def _even_row_select(m):
    """(m//2, m) selector: out row r = in row 2r (global parity == per-image parity)."""
    s = np.zeros((m // 2, m), np.float32)
    s[np.arange(m // 2), 2 * np.arange(m // 2)] = 1.0
    return s


def _row_interleave_cat(mc):
    """(2mc, 2mc) = [P0 | P1]: fine row 2c <- f0[c], fine row 2c+1 <- f1[c]."""
    p = np.zeros((2 * mc, 2 * mc), np.float32)
    p[2 * np.arange(mc), np.arange(mc)] = 1.0
    p[2 * np.arange(mc) + 1, mc + np.arange(mc)] = 1.0
    return p


def pack_params(params, batch_per_block):
    """Pack logical conv weights into the consolidated lane-dense matrices.

    Returns (static_metadata, weight_dict)."""
    B = batch_per_block
    for l in range(len(ENC_BLK_NUMS) + 1):
        _, wsp, c = _level_dims(l)
        assert wsp * c == LANES, (wsp, c)

    conv_ws, conv_idx = [], {}
    vec_rows, vec_idx = [], {}

    def add_conv(name, w, wsp, cin_pad, cout_pad):
        conv_idx[name] = len(conv_ws)
        conv_ws.append(_pack_conv3x3_fused(np.asarray(w, np.float32), wsp, cin_pad, cout_pad))

    def add_vec(name, row):
        vec_idx[name] = len(vec_rows)
        vec_rows.append(np.asarray(row, np.float32).reshape(LANES))

    def tiled(v, reps, pad_to=None):
        v = np.asarray(v, np.float32)
        if pad_to is not None and v.shape[0] < pad_to:
            v = np.concatenate([v, np.zeros(pad_to - v.shape[0], np.float32)])
        return np.tile(v, reps)

    plan = []
    down_as, sels, up_bs, pcats = [], [], [], []

    h0, w0, c0 = _level_dims(0)
    add_conv('intro', params['intro_w'], w0, IN_CPAD, c0)
    add_vec('intro:b', tiled(params['intro_b'], w0))
    plan.append(dict(op='conv', name='intro', himg=h0, ln=None))

    def add_block(name, blk, lvl):
        hsp, wsp, c = _level_dims(lvl)
        add_conv(name, blk['w'], wsp, c, c)
        add_vec(f'{name}:b', tiled(blk['b'], wsp))
        add_vec(f'{name}:g', tiled(blk['gamma'], wsp))
        add_vec(f'{name}:be', tiled(blk['beta'], wsp))
        plan.append(dict(op='conv', name=name, himg=hsp, ln=lvl))

    lvl = 0
    for i, num in enumerate(ENC_BLK_NUMS):
        for j in range(num):
            add_block(f'enc_{i}_{j}', params[f'enc_{i}_{j}'], lvl)
        plan.append(dict(op='skip'))
        hsp, wsp, _ = _level_dims(lvl)
        d = params[f'down_{i}']
        down_as.append(_pack_down_fused(np.asarray(d['w'], np.float32), wsp))
        add_vec(f'down_{i}:b', tiled(d['b'], wsp // 2))
        sels.append(_even_row_select(B * hsp))
        plan.append(dict(op='down', idx=i))
        lvl += 1

    for i in range(MIDDLE_BLK_NUM):
        add_block(f'mid_{i}', params[f'mid_{i}'], lvl)

    for i, num in enumerate(DEC_BLK_NUMS):
        hsp, wsp, _ = _level_dims(lvl)
        up_bs.append(_pack_up_fused(np.asarray(params[f'up_{i}']['w'], np.float32), wsp))
        pcats.append(_row_interleave_cat(B * hsp))
        plan.append(dict(op='up', idx=i))
        lvl -= 1
        for j in range(num):
            add_block(f'dec_{i}_{j}', params[f'dec_{i}_{j}'], lvl)

    add_conv('ending', params['ending_w'], w0, WIDTH, OUT_CPAD)
    add_vec('ending:b', tiled(params['ending_b'], w0, pad_to=OUT_CPAD))

    wexp = np.zeros((IN_CPAD, OUT_CPAD), np.float32)
    wexp[:IN_CHANNELS, :OUT_CHANNELS] = np.asarray(params['expand_w'], np.float32)
    add_vec('expand:b', tiled(params['expand_b'], w0, pad_to=OUT_CPAD))

    mavgs = []
    for l in range(len(ENC_BLK_NUMS) + 1):
        _, wsp, c = _level_dims(l)
        # entries 1/8, 1/16, 1/32 are exact in bf16
        mavgs.append(np.kron(np.eye(wsp, dtype=np.float32),
                             np.full((c, c), 1.0 / c, np.float32)))

    weights = {
        'conv_w': jnp.asarray(np.stack(conv_ws), MATMUL_DTYPE),    # (7, 384, 128)
        'vec': jnp.asarray(np.stack(vec_rows), jnp.float32),       # (20, 128)
        'mavg': jnp.asarray(np.stack(mavgs), MATMUL_DTYPE),        # (3, 128, 128)
        'down_a': jnp.asarray(np.stack(down_as), MATMUL_DTYPE),    # (2, 256, 128)
        'up_b': jnp.asarray(np.stack(up_bs), MATMUL_DTYPE),        # (2, 128, 256)
        'exp_w': jnp.asarray(np.kron(np.eye(w0, dtype=np.float32), wexp), MATMUL_DTYPE),
    }
    for i, s in enumerate(sels):
        weights[f'sel_{i}'] = jnp.asarray(s, MATMUL_DTYPE)
    for i, p in enumerate(pcats):
        weights[f'pcat_{i}'] = jnp.asarray(p, MATMUL_DTYPE)

    static = dict(plan=plan, conv_idx=conv_idx, vec_idx=vec_idx,
                  weight_order=list(weights.keys()))
    return static, weights


# ------------------------------- the kernel ----------------------------------
def make_unet_kernel(static):
    plan = static['plan']
    conv_idx = static['conv_idx']
    vec_idx = static['vec_idx']
    order = static['weight_order']
    wpos = {k: i for i, k in enumerate(order)}
    n_w = len(order)

    def kernel(inp_ref, *rest):
        wref = rest[:n_w]
        o_ref = rest[n_w]

        def W(name):
            return wref[wpos[name]]

        def vrow(name):                       # (128,) f32 broadcast row
            return W('vec')[vec_idx[name]]

        def conv3x3(h, name, himg, ln_lvl):
            """3x3/pad=1 conv (+ channel LayerNorm + ReLU) on the (M,128) slab."""
            m = h.shape[0]
            row = jax.lax.broadcasted_iota(jnp.int32, h.shape, 0)
            zero = jnp.zeros_like(h)
            # roll on the XLU; zero the per-image boundary rows (zero padding)
            h_up = jnp.where(row % himg == 0, zero, pltpu.roll(h, shift=1, axis=0))
            h_dn = jnp.where(row % himg == himg - 1, zero,
                             pltpu.roll(h, shift=m - 1, axis=0))
            hb = jnp.concatenate([h_up, h, h_dn], axis=-1).astype(MATMUL_DTYPE)  # (M,384)
            y = jnp.dot(hb, W('conv_w')[conv_idx[name]],
                        preferred_element_type=jnp.float32) + vrow(f'{name}:b')
            if ln_lvl is None:
                return y
            mavg = W('mavg')[ln_lvl]
            # two independent MXU pushes; var = E[y^2] - mu^2 (clamped)
            mu = jnp.dot(y.astype(MATMUL_DTYPE), mavg, preferred_element_type=jnp.float32)
            msq = jnp.dot((y * y).astype(MATMUL_DTYPE), mavg,
                          preferred_element_type=jnp.float32)
            var = jnp.maximum(msq - mu * mu, 0.0)
            yn = (y - mu) * jax.lax.rsqrt(var + LN_EPS)
            return jnp.maximum(yn * vrow(f'{name}:g') + vrow(f'{name}:be'), 0.0)

        def down(h, idx):
            """2x2 stride-2 conv: (M,128) -> (M/2,128)."""
            m = h.shape[0]
            # wrapped rows land only in odd (never-selected) positions -> no mask
            h_dn = pltpu.roll(h, shift=m - 1, axis=0)
            cat = jnp.concatenate([h, h_dn], axis=-1).astype(MATMUL_DTYPE)       # (M,256)
            e = jnp.dot(W(f'sel_{idx}')[...], cat,
                        preferred_element_type=jnp.float32).astype(MATMUL_DTYPE)  # (M/2,256)
            return (jnp.dot(e, W('down_a')[idx], preferred_element_type=jnp.float32)
                    + vrow(f'down_{idx}:b'))

        def up(h, idx, skip):
            """1x1 conv (C->2C) + PixelShuffle(2) + skip add: (Mc,128) -> (2Mc,128)."""
            g = jnp.dot(h.astype(MATMUL_DTYPE), W('up_b')[idx],
                        preferred_element_type=jnp.float32)                       # (Mc,256)
            fcat = jnp.concatenate([g[:, :LANES], g[:, LANES:]],
                                   axis=0).astype(MATMUL_DTYPE)                   # (2Mc,128)
            fine = jnp.dot(W(f'pcat_{idx}')[...], fcat,
                           preferred_element_type=jnp.float32)
            return fine + skip

        inp = inp_ref[...]                    # (B*H, 128) f32; channels 4..7 are zero pad
        h = inp
        skips = []
        for step in plan:
            if step['op'] == 'conv':
                h = conv3x3(h, step['name'], step['himg'], step['ln'])
            elif step['op'] == 'skip':
                skips.append(h)
            elif step['op'] == 'down':
                h = down(h, step['idx'])
            elif step['op'] == 'up':
                h = up(h, step['idx'], skips.pop())

        end = conv3x3(h, 'ending', IMG_H, None)
        exp = jnp.dot(inp.astype(MATMUL_DTYPE), W('exp_w')[...],
                      preferred_element_type=jnp.float32) + vrow('expand:b')
        o_ref[...] = jax.nn.sigmoid(end + exp)   # full 128-lane (lane-dense) store

    return kernel


# ------------------------------- forward pass --------------------------------
def unet_forward_packed(static, weights, x, mask, grid_blocks=1):
    n = x.shape[0]
    assert n % grid_blocks == 0
    bpb = n // grid_blocks                     # images folded into each grid block

    inp = jnp.concatenate([x, mask], axis=-1)                                  # (N,H,W,4)
    inp = jnp.pad(inp, ((0, 0), (0, 0), (0, 0), (0, IN_CPAD - IN_CHANNELS)))   # -> 8 chans
    inp = inp.reshape(n * IMG_H, IMG_W * IN_CPAD)                              # (N*H,128)

    ws = [weights[k] for k in static['weight_order']]

    in_specs = [pl.BlockSpec((bpb * IMG_H, IMG_W * IN_CPAD), lambda i: (i, 0))]
    for a in ws:
        zeros = (0,) * a.ndim
        in_specs.append(pl.BlockSpec(a.shape, lambda i, _z=zeros: _z))

    out = pl.pallas_call(
        make_unet_kernel(static),
        out_shape=jax.ShapeDtypeStruct((n * IMG_H, IMG_W * OUT_CPAD), jnp.float32),
        grid=(grid_blocks,),
        in_specs=in_specs,
        out_specs=pl.BlockSpec((bpb * IMG_H, IMG_W * OUT_CPAD), lambda i: (i, 0)),
        compiler_params=pltpu.CompilerParams(dimension_semantics=("parallel",)),
    )(inp, *ws)
    return out.reshape(n, IMG_H, IMG_W, OUT_CPAD)[..., :OUT_CHANNELS]


# --------------------------- pure-JAX reference (f32) ------------------------
def unet_reference(params, x, mask):
    def conv2d(h, w, b=None, stride=1, padding='SAME'):
        y = jax.lax.conv_general_dilated(
            h, w, window_strides=(stride, stride), padding=padding,
            dimension_numbers=('NHWC', 'HWIO', 'NHWC'))
        return y if b is None else y + b

    def block(h, blk):
        h = conv2d(h, blk['w'], blk['b'])
        mu = jnp.mean(h, axis=-1, keepdims=True)
        var = jnp.mean(jnp.square(h - mu), axis=-1, keepdims=True)
        h = (h - mu) * jax.lax.rsqrt(var + LN_EPS)
        return jnp.maximum(h * blk['gamma'] + blk['beta'], 0.0)

    inp = jnp.concatenate([x, mask], axis=-1)
    h = conv2d(inp, params['intro_w'], params['intro_b'])
    encs = []
    for i, num in enumerate(ENC_BLK_NUMS):
        for j in range(num):
            h = block(h, params[f'enc_{i}_{j}'])
        encs.append(h)
        d = params[f'down_{i}']
        h = conv2d(h, d['w'], d['b'], stride=2, padding='VALID')
    for i in range(MIDDLE_BLK_NUM):
        h = block(h, params[f'mid_{i}'])
    for i, (num, enc) in enumerate(zip(DEC_BLK_NUMS, encs[::-1])):
        h = conv2d(h, params[f'up_{i}']['w'][None, None])
        n_, hh, ww, c4 = h.shape
        c = c4 // 4
        h = h.reshape(n_, hh, ww, c, 2, 2).transpose(0, 1, 4, 2, 5, 3).reshape(n_, 2 * hh, 2 * ww, c)
        h = h + enc
        for j in range(num):
            h = block(h, params[f'dec_{i}_{j}'])
    out = conv2d(h, params['ending_w'], params['ending_b'])
    skip = conv2d(inp, params['expand_w'][None, None], params['expand_b'])
    return jax.nn.sigmoid(out + skip)


# --------------------------------- main ---------------------------------------
if __name__ == "__main__":
    key = jax.random.PRNGKey(0)
    k_params, k_x, k_m = jax.random.split(key, 3)

    N = 2
    x = jax.random.normal(k_x, (N, IMG_H, IMG_W, 3), jnp.float32)
    mask = (jax.random.uniform(k_m, (N, IMG_H, IMG_W, 1)) > 0.5).astype(jnp.float32)

    params = make_params(k_params)

    # grid blocks: 1 folds the entire batch into one block (best on v5e/v6e);
    # on v7x use 2 (one block per TensorCore).  Keep batch-per-block >= 2 so the
    # coarsest level still has >= 8 activation rows.
    GRID_BLOCKS = 1
    static, weights = pack_params(params, batch_per_block=N // GRID_BLOCKS)

    fwd = jax.jit(functools.partial(unet_forward_packed, static, grid_blocks=GRID_BLOCKS))
    y = jax.block_until_ready(fwd(weights, x, mask))

    assert y.shape == (N, IMG_H, IMG_W, OUT_CHANNELS), y.shape
    assert bool(jnp.all(jnp.isfinite(y)))
    assert bool(jnp.all((y >= 0.0) & (y <= 1.0)))          # sigmoid output range

    # cross-check against a plain-XLA f32 reference (loose tol covers bf16 weights/LN)
    y_ref = unet_reference(params, x, mask)
    err = float(jnp.max(jnp.abs(y - y_ref)))
    assert err < 5e-2, err

    print("KERNEL_OK")
</pallas_src>

<mosaic_0001>
module attributes {stable_mosaic.version = 11 : i64} {
  func.func @kernel(%arg0: i32, %arg1: memref<32x128xf32, #tpu.memory_space<vmem>>, %arg2: memref<7x384x128xbf16, #tpu.memory_space<vmem>>, %arg3: memref<20x128xf32, #tpu.memory_space<vmem>>, %arg4: memref<3x128x128xbf16, #tpu.memory_space<vmem>>, %arg5: memref<2x256x128xbf16, #tpu.memory_space<vmem>>, %arg6: memref<2x128x256xbf16, #tpu.memory_space<vmem>>, %arg7: memref<128x128xbf16, #tpu.memory_space<vmem>>, %arg8: memref<16x32xbf16, #tpu.memory_space<vmem>>, %arg9: memref<8x16xbf16, #tpu.memory_space<vmem>>, %arg10: memref<16x16xbf16, #tpu.memory_space<vmem>>, %arg11: memref<32x32xbf16, #tpu.memory_space<vmem>>, %arg12: memref<32x128xf32, #tpu.memory_space<vmem>>) attributes {dimension_semantics = [#tpu.dimension_semantics<parallel>], iteration_bounds = array<i64: 1>, scalar_prefetch = 0 : i64, scratch_operands = 0 : i64, tpu.core_type = #tpu.core_type<tc>, window_params = [{transform_indices = @transform_0, window_bounds = array<i64: 32, 128>}, {pipeline_mode = #tpu.pipeline_mode<synchronous>, transform_indices = @transform_1, window_bounds = array<i64: 7, 384, 128>}, {pipeline_mode = #tpu.pipeline_mode<synchronous>, transform_indices = @transform_2, window_bounds = array<i64: 20, 128>}, {pipeline_mode = #tpu.pipeline_mode<synchronous>, transform_indices = @transform_3, window_bounds = array<i64: 3, 128, 128>}, {pipeline_mode = #tpu.pipeline_mode<synchronous>, transform_indices = @transform_4, window_bounds = array<i64: 2, 256, 128>}, {pipeline_mode = #tpu.pipeline_mode<synchronous>, transform_indices = @transform_5, window_bounds = array<i64: 2, 128, 256>}, {pipeline_mode = #tpu.pipeline_mode<synchronous>, transform_indices = @transform_6, window_bounds = array<i64: 128, 128>}, {pipeline_mode = #tpu.pipeline_mode<synchronous>, transform_indices = @transform_7, window_bounds = array<i64: 16, 32>}, {pipeline_mode = #tpu.pipeline_mode<synchronous>, transform_indices = @transform_8, window_bounds = array<i64: 8, 16>}, {pipeline_mode = #tpu.pipeline_mode<synchronous>, transform_indices = @transform_9, window_bounds = array<i64: 16, 16>}, {pipeline_mode = #tpu.pipeline_mode<synchronous>, transform_indices = @transform_10, window_bounds = array<i64: 32, 32>}, {transform_indices = @transform_11, window_bounds = array<i64: 32, 128>}]} {
    %c0 = arith.constant 0 : index
    %c0_0 = arith.constant 0 : index
    %0 = vector.load %arg1[%c0, %c0_0] : memref<32x128xf32, #tpu.memory_space<vmem>>, vector<32x128xf32>
    %1 = tpu.iota {dimensions = array<i32: 0>} : vector<32x128xi32>
    %cst = arith.constant 0.000000e+00 : f32
    %2 = vector.broadcast %cst : f32 to vector<32x128xf32>
    %c16_i32 = arith.constant 16 : i32
    %c0_i32 = arith.constant 0 : i32
    %3 = arith.cmpi eq, %c16_i32, %c0_i32 : i32
    %c1_i32 = arith.constant 1 : i32
    %4 = arith.select %3, %c1_i32, %c16_i32 : i32
    %5 = vector.broadcast %4 : i32 to vector<32x128xi32>
    %6 = arith.remsi %1, %5 : vector<32x128xi32>
    %c0_i32_1 = arith.constant 0 : i32
    %7 = vector.broadcast %c0_i32_1 : i32 to vector<32x128xi32>
    %8 = arith.cmpi ne, %6, %7 : vector<32x128xi32>
    %c0_i32_2 = arith.constant 0 : i32
    %9 = vector.broadcast %c0_i32_2 : i32 to vector<32x128xi32>
    %10 = arith.cmpi slt, %6, %9 : vector<32x128xi32>
    %c0_i32_3 = arith.constant 0 : i32
    %11 = arith.cmpi slt, %4, %c0_i32_3 : i32
    %12 = vector.broadcast %11 : i1 to vector<32x128xi1>
    %13 = vector.broadcast %12 : vector<32x128xi1> to vector<32x128xi1>
    %14 = arith.xori %10, %13 : vector<32x128xi1>
    %15 = arith.andi %14, %8 : vector<32x128xi1>
    %16 = vector.broadcast %4 : i32 to vector<32x128xi32>
    %17 = arith.addi %6, %16 : vector<32x128xi32>
    %18 = arith.select %15, %17, %6 : vector<32x128xi1>, vector<32x128xi32>
    %c0_i32_4 = arith.constant 0 : i32
    %19 = vector.broadcast %c0_i32_4 : i32 to vector<32x128xi32>
    %20 = arith.cmpi eq, %18, %19 : vector<32x128xi32>
    %c1_i32_5 = arith.constant 1 : i32
    %21 = tpu.dynamic_rotate %0 by %c1_i32_5 dim 0 : vector<32x128xf32>, i32 -> vector<32x128xf32>
    %22 = arith.select %20, %2, %21 : vector<32x128xi1>, vector<32x128xf32>
    %c16_i32_6 = arith.constant 16 : i32
    %c0_i32_7 = arith.constant 0 : i32
    %23 = arith.cmpi eq, %c16_i32_6, %c0_i32_7 : i32
    %c1_i32_8 = arith.constant 1 : i32
    %24 = arith.select %23, %c1_i32_8, %c16_i32_6 : i32
    %25 = vector.broadcast %24 : i32 to vector<32x128xi32>
    %26 = arith.remsi %1, %25 : vector<32x128xi32>
    %c0_i32_9 = arith.constant 0 : i32
    %27 = vector.broadcast %c0_i32_9 : i32 to vector<32x128xi32>
    %28 = arith.cmpi ne, %26, %27 : vector<32x128xi32>
    %c0_i32_10 = arith.constant 0 : i32
    %29 = vector.broadcast %c0_i32_10 : i32 to vector<32x128xi32>
    %30 = arith.cmpi slt, %26, %29 : vector<32x128xi32>
    %c0_i32_11 = arith.constant 0 : i32
    %31 = arith.cmpi slt, %24, %c0_i32_11 : i32
    %32 = vector.broadcast %31 : i1 to vector<32x128xi1>
    %33 = vector.broadcast %32 : vector<32x128xi1> to vector<32x128xi1>
    %34 = arith.xori %30, %33 : vector<32x128xi1>
    %35 = arith.andi %34, %28 : vector<32x128xi1>
    %36 = vector.broadcast %24 : i32 to vector<32x128xi32>
    %37 = arith.addi %26, %36 : vector<32x128xi32>
    %38 = arith.select %35, %37, %26 : vector<32x128xi1>, vector<32x128xi32>
    %c15_i32 = arith.constant 15 : i32
    %39 = vector.broadcast %c15_i32 : i32 to vector<32x128xi32>
    %40 = arith.cmpi eq, %38, %39 : vector<32x128xi32>
    %c31_i32 = arith.constant 31 : i32
    %41 = tpu.dynamic_rotate %0 by %c31_i32 dim 0 : vector<32x128xf32>, i32 -> vector<32x128xf32>
    %42 = arith.select %40, %2, %41 : vector<32x128xi1>, vector<32x128xf32>
    %43 = tpu.concatenate %22, %0, %42 in 1 : vector<32x128xf32>, vector<32x128xf32>, vector<32x128xf32> -> vector<32x384xf32>
    %44 = arith.truncf %43 : vector<32x384xf32> to vector<32x384xbf16>
    %c0_12 = arith.constant 0 : index
    %c0_13 = arith.constant 0 : index
    %c0_14 = arith.constant 0 : index
    %45 = vector.load %arg2[%c0_12, %c0_13, %c0_14] : memref<7x384x128xbf16, #tpu.memory_space<vmem>>, vector<1x384x128xbf16>
    %46 = vector.shape_cast %45 : vector<1x384x128xbf16> to vector<384x128xbf16>
    %cst_15 = arith.constant dense<0.000000e+00> : vector<32x128xf32>
    %47 = tpu.matmul %44, %46, %cst_15 {dimension_numbers = #tpu.dot_dimension_numbers<[1], [0], [0], [1], [0, 0, 1, 1], [], []>} : vector<32x384xbf16>, vector<384x128xbf16>, vector<32x128xf32> -> vector<32x128xf32>
    %c0_16 = arith.constant 0 : index
    %c0_17 = arith.constant 0 : index
    %48 = vector.load %arg3[%c0_16, %c0_17] : memref<20x128xf32, #tpu.memory_space<vmem>>, vector<1x128xf32>
    %49 = vector.shape_cast %48 : vector<1x128xf32> to vector<128xf32>
    %50 = vector.shape_cast %49 : vector<128xf32> to vector<1x128xf32>
    %51 = vector.broadcast %50 : vector<1x128xf32> to vector<32x128xf32>
    %52 = arith.addf %47, %51 : vector<32x128xf32>
    %53 = tpu.iota {dimensions = array<i32: 0>} : vector<32x128xi32>
    %cst_18 = arith.constant 0.000000e+00 : f32
    %54 = vector.broadcast %cst_18 : f32 to vector<32x128xf32>
    %c16_i32_19 = arith.constant 16 : i32
    %c0_i32_20 = arith.constant 0 : i32
    %55 = arith.cmpi eq, %c16_i32_19, %c0_i32_20 : i32
    %c1_i32_21 = arith.constant 1 : i32
    %56 = arith.select %55, %c1_i32_21, %c16_i32_19 : i32
    %57 = vector.broadcast %56 : i32 to vector<32x128xi32>
    %58 = arith.remsi %53, %57 : vector<32x128xi32>
    %c0_i32_22 = arith.constant 0 : i32
    %59 = vector.broadcast %c0_i32_22 : i32 to vector<32x128xi32>
    %60 = arith.cmpi ne, %58, %59 : vector<32x128xi32>
    %c0_i32_23 = arith.constant 0 : i32
    %61 = vector.broadcast %c0_i32_23 : i32 to vector<32x128xi32>
    %62 = arith.cmpi slt, %58, %61 : vector<32x128xi32>
    %c0_i32_24 = arith.constant 0 : i32
    %63 = arith.cmpi slt, %56, %c0_i32_24 : i32
    %64 = vector.broadcast %63 : i1 to vector<32x128xi1>
    %65 = vector.broadcast %64 : vector<32x128xi1> to vector<32x128xi1>
    %66 = arith.xori %62, %65 : vector<32x128xi1>
    %67 = arith.andi %66, %60 : vector<32x128xi1>
    %68 = vector.broadcast %56 : i32 to vector<32x128xi32>
    %69 = arith.addi %58, %68 : vector<32x128xi32>
    %70 = arith.select %67, %69, %58 : vector<32x128xi1>, vector<32x128xi32>
    %c0_i32_25 = arith.constant 0 : i32
    %71 = vector.broadcast %c0_i32_25 : i32 to vector<32x128xi32>
    %72 = arith.cmpi eq, %70, %71 : vector<32x128xi32>
    %c1_i32_26 = arith.constant 1 : i32
    %73 = tpu.dynamic_rotate %52 by %c1_i32_26 dim 0 : vector<32x128xf32>, i32 -> vector<32x128xf32>
    %74 = arith.select %72, %54, %73 : vector<32x128xi1>, vector<32x128xf32>
    %c16_i32_27 = arith.constant 16 : i32
    %c0_i32_28 = arith.constant 0 : i32
    %75 = arith.cmpi eq, %c16_i32_27, %c0_i32_28 : i32
    %c1_i32_29 = arith.constant 1 : i32
    %76 = arith.select %75, %c1_i32_29, %c16_i32_27 : i32
    %77 = vector.broadcast %76 : i32 to vector<32x128xi32>
    %78 = arith.remsi %53, %77 : vector<32x128xi32>
    %c0_i32_30 = arith.constant 0 : i32
    %79 = vector.broadcast %c0_i32_30 : i32 to vector<32x128xi32>
    %80 = arith.cmpi ne, %78, %79 : vector<32x128xi32>
    %c0_i32_31 = arith.constant 0 : i32
    %81 = vector.broadcast %c0_i32_31 : i32 to vector<32x128xi32>
    %82 = arith.cmpi slt, %78, %81 : vector<32x128xi32>
    %c0_i32_32 = arith.constant 0 : i32
    %83 = arith.cmpi slt, %76, %c0_i32_32 : i32
    %84 = vector.broadcast %83 : i1 to vector<32x128xi1>
    %85 = vector.broadcast %84 : vector<32x128xi1> to vector<32x128xi1>
    %86 = arith.xori %82, %85 : vector<32x128xi1>
    %87 = arith.andi %86, %80 : vector<32x128xi1>
    %88 = vector.broadcast %76 : i32 to vector<32x128xi32>
    %89 = arith.addi %78, %88 : vector<32x128xi32>
    %90 = arith.select %87, %89, %78 : vector<32x128xi1>, vector<32x128xi32>
    %c15_i32_33 = arith.constant 15 : i32
    %91 = vector.broadcast %c15_i32_33 : i32 to vector<32x128xi32>
    %92 = arith.cmpi eq, %90, %91 : vector<32x128xi32>
    %c31_i32_34 = arith.constant 31 : i32
    %93 = tpu.dynamic_rotate %52 by %c31_i32_34 dim 0 : vector<32x128xf32>, i32 -> vector<32x128xf32>
    %94 = arith.select %92, %54, %93 : vector<32x128xi1>, vector<32x128xf32>
    %95 = tpu.concatenate %74, %52, %94 in 1 : vector<32x128xf32>, vector<32x128xf32>, vector<32x128xf32> -> vector<32x384xf32>
    %96 = arith.truncf %95 : vector<32x384xf32> to vector<32x384xbf16>
    %c1 = arith.constant 1 : index
    %c0_35 = arith.constant 0 : index
    %c0_36 = arith.constant 0 : index
    %97 = vector.load %arg2[%c1, %c0_35, %c0_36] : memref<7x384x128xbf16, #tpu.memory_space<vmem>>, vector<1x384x128xbf16>
    %98 = vector.shape_cast %97 : vector<1x384x128xbf16> to vector<384x128xbf16>
    %cst_37 = arith.constant dense<0.000000e+00> : vector<32x128xf32>
    %99 = tpu.matmul %96, %98, %cst_37 {dimension_numbers = #tpu.dot_dimension_numbers<[1], [0], [0], [1], [0, 0, 1, 1], [], []>} : vector<32x384xbf16>, vector<384x128xbf16>, vector<32x128xf32> -> vector<32x128xf32>
    %c1_38 = arith.constant 1 : index
    %c0_39 = arith.constant 0 : index
    %100 = vector.load %arg3[%c1_38, %c0_39] : memref<20x128xf32, #tpu.memory_space<vmem>>, vector<1x128xf32>
    %101 = vector.shape_cast %100 : vector<1x128xf32> to vector<128xf32>
    %102 = vector.shape_cast %101 : vector<128xf32> to vector<1x128xf32>
    %103 = vector.broadcast %102 : vector<1x128xf32> to vector<32x128xf32>
    %104 = arith.addf %99, %103 : vector<32x128xf32>
    %c0_40 = arith.constant 0 : index
    %c0_41 = arith.constant 0 : index
    %c0_42 = arith.constant 0 : index
    %105 = vector.load %arg4[%c0_40, %c0_41, %c0_42] : memref<3x128x128xbf16, #tpu.memory_space<vmem>>, vector<1x128x128xbf16>
    %106 = vector.shape_cast %105 : vector<1x128x128xbf16> to vector<128x128xbf16>
    %107 = arith.truncf %104 : vector<32x128xf32> to vector<32x128xbf16>
    %cst_43 = arith.constant dense<0.000000e+00> : vector<32x128xf32>
    %108 = tpu.matmul %107, %106, %cst_43 {dimension_numbers = #tpu.dot_dimension_numbers<[1], [0], [0], [1], [0, 0, 1, 1], [], []>} : vector<32x128xbf16>, vector<128x128xbf16>, vector<32x128xf32> -> vector<32x128xf32>
    %109 = arith.mulf %104, %104 : vector<32x128xf32>
    %110 = arith.truncf %109 : vector<32x128xf32> to vector<32x128xbf16>
    %cst_44 = arith.constant dense<0.000000e+00> : vector<32x128xf32>
    %111 = tpu.matmul %110, %106, %cst_44 {dimension_numbers = #tpu.dot_dimension_numbers<[1], [0], [0], [1], [0, 0, 1, 1], [], []>} : vector<32x128xbf16>, vector<128x128xbf16>, vector<32x128xf32> -> vector<32x128xf32>
    %112 = arith.mulf %108, %108 : vector<32x128xf32>
    %113 = arith.subf %111, %112 : vector<32x128xf32>
    %cst_45 = arith.constant 0.000000e+00 : f32
    %114 = vector.broadcast %cst_45 : f32 to vector<32x128xf32>
    %115 = arith.maximumf %113, %114 : vector<32x128xf32>
    %116 = arith.subf %104, %108 : vector<32x128xf32>
    %cst_46 = arith.constant 9.99999997E-7 : f32
    %117 = vector.broadcast %cst_46 : f32 to vector<32x128xf32>
    %118 = arith.addf %115, %117 : vector<32x128xf32>
    %119 = math.rsqrt %118 : vector<32x128xf32>
    %120 = arith.mulf %116, %119 : vector<32x128xf32>
    %c2 = arith.constant 2 : index
    %c0_47 = arith.constant 0 : index
    %121 = vector.load %arg3[%c2, %c0_47] : memref<20x128xf32, #tpu.memory_space<vmem>>, vector<1x128xf32>
    %122 = vector.shape_cast %121 : vector<1x128xf32> to vector<128xf32>
    %123 = vector.shape_cast %122 : vector<128xf32> to vector<1x128xf32>
    %124 = vector.broadcast %123 : vector<1x128xf32> to vector<32x128xf32>
    %125 = arith.mulf %120, %124 : vector<32x128xf32>
    %c3 = arith.constant 3 : index
    %c0_48 = arith.constant 0 : index
    %126 = vector.load %arg3[%c3, %c0_48] : memref<20x128xf32, #tpu.memory_space<vmem>>, vector<1x128xf32>
    %127 = vector.shape_cast %126 : vector<1x128xf32> to vector<128xf32>
    %128 = vector.shape_cast %127 : vector<128xf32> to vector<1x128xf32>
    %129 = vector.broadcast %128 : vector<1x128xf32> to vector<32x128xf32>
    %130 = arith.addf %125, %129 : vector<32x128xf32>
    %cst_49 = arith.constant 0.000000e+00 : f32
    %131 = vector.broadcast %cst_49 : f32 to vector<32x128xf32>
    %132 = arith.maximumf %130, %131 : vector<32x128xf32>
    %c31_i32_50 = arith.constant 31 : i32
    %133 = tpu.dynamic_rotate %132 by %c31_i32_50 dim 0 : vector<32x128xf32>, i32 -> vector<32x128xf32>
    %134 = tpu.concatenate %132, %133 in 1 : vector<32x128xf32>, vector<32x128xf32> -> vector<32x256xf32>
    %135 = arith.truncf %134 : vector<32x256xf32> to vector<32x256xbf16>
    %c0_51 = arith.constant 0 : index
    %c0_52 = arith.constant 0 : index
    %136 = vector.load %arg8[%c0_51, %c0_52] : memref<16x32xbf16, #tpu.memory_space<vmem>>, vector<16x32xbf16>
    %cst_53 = arith.constant dense<0.000000e+00> : vector<16x256xf32>
    %137 = tpu.matmul %136, %135, %cst_53 {dimension_numbers = #tpu.dot_dimension_numbers<[1], [0], [0], [1], [0, 0, 1, 1], [], []>} : vector<16x32xbf16>, vector<32x256xbf16>, vector<16x256xf32> -> vector<16x256xf32>
    %138 = arith.truncf %137 : vector<16x256xf32> to vector<16x256xbf16>
    %c0_54 = arith.constant 0 : index
    %c0_55 = arith.constant 0 : index
    %c0_56 = arith.constant 0 : index
    %139 = vector.load %arg5[%c0_54, %c0_55, %c0_56] : memref<2x256x128xbf16, #tpu.memory_space<vmem>>, vector<1x256x128xbf16>
    %140 = vector.shape_cast %139 : vector<1x256x128xbf16> to vector<256x128xbf16>
    %cst_57 = arith.constant dense<0.000000e+00> : vector<16x128xf32>
    %141 = tpu.matmul %138, %140, %cst_57 {dimension_numbers = #tpu.dot_dimension_numbers<[1], [0], [0], [1], [0, 0, 1, 1], [], []>} : vector<16x256xbf16>, vector<256x128xbf16>, vector<16x128xf32> -> vector<16x128xf32>
    %c4 = arith.constant 4 : index
    %c0_58 = arith.constant 0 : index
    %142 = vector.load %arg3[%c4, %c0_58] : memref<20x128xf32, #tpu.memory_space<vmem>>, vector<1x128xf32>
    %143 = vector.shape_cast %142 : vector<1x128xf32> to vector<128xf32>
    %144 = vector.shape_cast %143 : vector<128xf32> to vector<1x128xf32>
    %145 = vector.broadcast %144 : vector<1x128xf32> to vector<16x128xf32>
    %146 = arith.addf %141, %145 : vector<16x128xf32>
    %147 = tpu.iota {dimensions = array<i32: 0>} : vector<16x128xi32>
    %cst_59 = arith.constant 0.000000e+00 : f32
    %148 = vector.broadcast %cst_59 : f32 to vector<16x128xf32>
    %c8_i32 = arith.constant 8 : i32
    %c0_i32_60 = arith.constant 0 : i32
    %149 = arith.cmpi eq, %c8_i32, %c0_i32_60 : i32
    %c1_i32_61 = arith.constant 1 : i32
    %150 = arith.select %149, %c1_i32_61, %c8_i32 : i32
    %151 = vector.broadcast %150 : i32 to vector<16x128xi32>
    %152 = arith.remsi %147, %151 : vector<16x128xi32>
    %c0_i32_62 = arith.constant 0 : i32
    %153 = vector.broadcast %c0_i32_62 : i32 to vector<16x128xi32>
    %154 = arith.cmpi ne, %152, %153 : vector<16x128xi32>
    %c0_i32_63 = arith.constant 0 : i32
    %155 = vector.broadcast %c0_i32_63 : i32 to vector<16x128xi32>
    %156 = arith.cmpi slt, %152, %155 : vector<16x128xi32>
    %c0_i32_64 = arith.constant 0 : i32
    %157 = arith.cmpi slt, %150, %c0_i32_64 : i32
    %158 = vector.broadcast %157 : i1 to vector<16x128xi1>
    %159 = vector.broadcast %158 : vector<16x128xi1> to vector<16x128xi1>
    %160 = arith.xori %156, %159 : vector<16x128xi1>
    %161 = arith.andi %160, %154 : vector<16x128xi1>
    %162 = vector.broadcast %150 : i32 to vector<16x128xi32>
    %163 = arith.addi %152, %162 : vector<16x128xi32>
    %164 = arith.select %161, %163, %152 : vector<16x128xi1>, vector<16x128xi32>
    %c0_i32_65 = arith.constant 0 : i32
    %165 = vector.broadcast %c0_i32_65 : i32 to vector<16x128xi32>
    %166 = arith.cmpi eq, %164, %165 : vector<16x128xi32>
    %c1_i32_66 = arith.constant 1 : i32
    %167 = tpu.dynamic_rotate %146 by %c1_i32_66 dim 0 : vector<16x128xf32>, i32 -> vector<16x128xf32>
    %168 = arith.select %166, %148, %167 : vector<16x128xi1>, vector<16x128xf32>
    %c8_i32_67 = arith.constant 8 : i32
    %c0_i32_68 = arith.constant 0 : i32
    %169 = arith.cmpi eq, %c8_i32_67, %c0_i32_68 : i32
    %c1_i32_69 = arith.constant 1 : i32
    %170 = arith.select %169, %c1_i32_69, %c8_i32_67 : i32
    %171 = vector.broadcast %170 : i32 to vector<16x128xi32>
    %172 = arith.remsi %147, %171 : vector<16x128xi32>
    %c0_i32_70 = arith.constant 0 : i32
    %173 = vector.broadcast %c0_i32_70 : i32 to vector<16x128xi32>
    %174 = arith.cmpi ne, %172, %173 : vector<16x128xi32>
    %c0_i32_71 = arith.constant 0 : i32
    %175 = vector.broadcast %c0_i32_71 : i32 to vector<16x128xi32>
    %176 = arith.cmpi slt, %172, %175 : vector<16x128xi32>
    %c0_i32_72 = arith.constant 0 : i32
    %177 = arith.cmpi slt, %170, %c0_i32_72 : i32
    %178 = vector.broadcast %177 : i1 to vector<16x128xi1>
    %179 = vector.broadcast %178 : vector<16x128xi1> to vector<16x128xi1>
    %180 = arith.xori %176, %179 : vector<16x128xi1>
    %181 = arith.andi %180, %174 : vector<16x128xi1>
    %182 = vector.broadcast %170 : i32 to vector<16x128xi32>
    %183 = arith.addi %172, %182 : vector<16x128xi32>
    %184 = arith.select %181, %183, %172 : vector<16x128xi1>, vector<16x128xi32>
    %c7_i32 = arith.constant 7 : i32
    %185 = vector.broadcast %c7_i32 : i32 to vector<16x128xi32>
    %186 = arith.cmpi eq, %184, %185 : vector<16x128xi32>
    %c15_i32_73 = arith.constant 15 : i32
    %187 = tpu.dynamic_rotate %146 by %c15_i32_73 dim 0 : vector<16x128xf32>, i32 -> vector<16x128xf32>
    %188 = arith.select %186, %148, %187 : vector<16x128xi1>, vector<16x128xf32>
    %189 = tpu.concatenate %168, %146, %188 in 1 : vector<16x128xf32>, vector<16x128xf32>, vector<16x128xf32> -> vector<16x384xf32>
    %190 = arith.truncf %189 : vector<16x384xf32> to vector<16x384xbf16>
    %c2_74 = arith.constant 2 : index
    %c0_75 = arith.constant 0 : index
    %c0_76 = arith.constant 0 : index
    %191 = vector.load %arg2[%c2_74, %c0_75, %c0_76] : memref<7x384x128xbf16, #tpu.memory_space<vmem>>, vector<1x384x128xbf16>
    %192 = vector.shape_cast %191 : vector<1x384x128xbf16> to vector<384x128xbf16>
    %cst_77 = arith.constant dense<0.000000e+00> : vector<16x128xf32>
    %193 = tpu.matmul %190, %192, %cst_77 {dimension_numbers = #tpu.dot_dimension_numbers<[1], [0], [0], [1], [0, 0, 1, 1], [], []>} : vector<16x384xbf16>, vector<384x128xbf16>, vector<16x128xf32> -> vector<16x128xf32>
    %c5 = arith.constant 5 : index
    %c0_78 = arith.constant 0 : index
    %194 = vector.load %arg3[%c5, %c0_78] : memref<20x128xf32, #tpu.memory_space<vmem>>, vector<1x128xf32>
    %195 = vector.shape_cast %194 : vector<1x128xf32> to vector<128xf32>
    %196 = vector.shape_cast %195 : vector<128xf32> to vector<1x128xf32>
    %197 = vector.broadcast %196 : vector<1x128xf32> to vector<16x128xf32>
    %198 = arith.addf %193, %197 : vector<16x128xf32>
    %c1_79 = arith.constant 1 : index
    %c0_80 = arith.constant 0 : index
    %c0_81 = arith.constant 0 : index
    %199 = vector.load %arg4[%c1_79, %c0_80, %c0_81] : memref<3x128x128xbf16, #tpu.memory_space<vmem>>, vector<1x128x128xbf16>
    %200 = vector.shape_cast %199 : vector<1x128x128xbf16> to vector<128x128xbf16>
    %201 = arith.truncf %198 : vector<16x128xf32> to vector<16x128xbf16>
    %cst_82 = arith.constant dense<0.000000e+00> : vector<16x128xf32>
    %202 = tpu.matmul %201, %200, %cst_82 {dimension_numbers = #tpu.dot_dimension_numbers<[1], [0], [0], [1], [0, 0, 1, 1], [], []>} : vector<16x128xbf16>, vector<128x128xbf16>, vector<16x128xf32> -> vector<16x128xf32>
    %203 = arith.mulf %198, %198 : vector<16x128xf32>
    %204 = arith.truncf %203 : vector<16x128xf32> to vector<16x128xbf16>
    %cst_83 = arith.constant dense<0.000000e+00> : vector<16x128xf32>
    %205 = tpu.matmul %204, %200, %cst_83 {dimension_numbers = #tpu.dot_dimension_numbers<[1], [0], [0], [1], [0, 0, 1, 1], [], []>} : vector<16x128xbf16>, vector<128x128xbf16>, vector<16x128xf32> -> vector<16x128xf32>
    %206 = arith.mulf %202, %202 : vector<16x128xf32>
    %207 = arith.subf %205, %206 : vector<16x128xf32>
    %cst_84 = arith.constant 0.000000e+00 : f32
    %208 = vector.broadcast %cst_84 : f32 to vector<16x128xf32>
    %209 = arith.maximumf %207, %208 : vector<16x128xf32>
    %210 = arith.subf %198, %202 : vector<16x128xf32>
    %cst_85 = arith.constant 9.99999997E-7 : f32
    %211 = vector.broadcast %cst_85 : f32 to vector<16x128xf32>
    %212 = arith.addf %209, %211 : vector<16x128xf32>
    %213 = math.rsqrt %212 : vector<16x128xf32>
    %214 = arith.mulf %210, %213 : vector<16x128xf32>
    %c6 = arith.constant 6 : index
    %c0_86 = arith.constant 0 : index
    %215 = vector.load %arg3[%c6, %c0_86] : memref<20x128xf32, #tpu.memory_space<vmem>>, vector<1x128xf32>
    %216 = vector.shape_cast %215 : vector<1x128xf32> to vector<128xf32>
    %217 = vector.shape_cast %216 : vector<128xf32> to vector<1x128xf32>
    %218 = vector.broadcast %217 : vector<1x128xf32> to vector<16x128xf32>
    %219 = arith.mulf %214, %218 : vector<16x128xf32>
    %c7 = arith.constant 7 : index
    %c0_87 = arith.constant 0 : index
    %220 = vector.load %arg3[%c7, %c0_87] : memref<20x128xf32, #tpu.memory_space<vmem>>, vector<1x128xf32>
    %221 = vector.shape_cast %220 : vector<1x128xf32> to vector<128xf32>
    %222 = vector.shape_cast %221 : vector<128xf32> to vector<1x128xf32>
    %223 = vector.broadcast %222 : vector<1x128xf32> to vector<16x128xf32>
    %224 = arith.addf %219, %223 : vector<16x128xf32>
    %cst_88 = arith.constant 0.000000e+00 : f32
    %225 = vector.broadcast %cst_88 : f32 to vector<16x128xf32>
    %226 = arith.maximumf %224, %225 : vector<16x128xf32>
    %c15_i32_89 = arith.constant 15 : i32
    %227 = tpu.dynamic_rotate %226 by %c15_i32_89 dim 0 : vector<16x128xf32>, i32 -> vector<16x128xf32>
    %228 = tpu.concatenate %226, %227 in 1 : vector<16x128xf32>, vector<16x128xf32> -> vector<16x256xf32>
    %229 = arith.truncf %228 : vector<16x256xf32> to vector<16x256xbf16>
    %c0_90 = arith.constant 0 : index
    %c0_91 = arith.constant 0 : index
    %230 = vector.load %arg9[%c0_90, %c0_91] : memref<8x16xbf16, #tpu.memory_space<vmem>>, vector<8x16xbf16>
    %cst_92 = arith.constant dense<0.000000e+00> : vector<8x256xf32>
    %231 = tpu.matmul %230, %229, %cst_92 {dimension_numbers = #tpu.dot_dimension_numbers<[1], [0], [0], [1], [0, 0, 1, 1], [], []>} : vector<8x16xbf16>, vector<16x256xbf16>, vector<8x256xf32> -> vector<8x256xf32>
    %232 = arith.truncf %231 : vector<8x256xf32> to vector<8x256xbf16>
    %c1_93 = arith.constant 1 : index
    %c0_94 = arith.constant 0 : index
    %c0_95 = arith.constant 0 : index
    %233 = vector.load %arg5[%c1_93, %c0_94, %c0_95] : memref<2x256x128xbf16, #tpu.memory_space<vmem>>, vector<1x256x128xbf16>
    %234 = vector.shape_cast %233 : vector<1x256x128xbf16> to vector<256x128xbf16>
    %cst_96 = arith.constant dense<0.000000e+00> : vector<8x128xf32>
    %235 = tpu.matmul %232, %234, %cst_96 {dimension_numbers = #tpu.dot_dimension_numbers<[1], [0], [0], [1], [0, 0, 1, 1], [], []>} : vector<8x256xbf16>, vector<256x128xbf16>, vector<8x128xf32> -> vector<8x128xf32>
    %c8 = arith.constant 8 : index
    %c0_97 = arith.constant 0 : index
    %236 = vector.load %arg3[%c8, %c0_97] : memref<20x128xf32, #tpu.memory_space<vmem>>, vector<1x128xf32>
    %237 = vector.shape_cast %236 : vector<1x128xf32> to vector<128xf32>
    %238 = vector.shape_cast %237 : vector<128xf32> to vector<1x128xf32>
    %239 = vector.broadcast %238 : vector<1x128xf32> to vector<8x128xf32>
    %240 = arith.addf %235, %239 : vector<8x128xf32>
    %241 = tpu.iota {dimensions = array<i32: 0>} : vector<8x128xi32>
    %cst_98 = arith.constant 0.000000e+00 : f32
    %242 = vector.broadcast %cst_98 : f32 to vector<8x128xf32>
    %c4_i32 = arith.constant 4 : i32
    %c0_i32_99 = arith.constant 0 : i32
    %243 = arith.cmpi eq, %c4_i32, %c0_i32_99 : i32
    %c1_i32_100 = arith.constant 1 : i32
    %244 = arith.select %243, %c1_i32_100, %c4_i32 : i32
    %245 = vector.broadcast %244 : i32 to vector<8x128xi32>
    %246 = arith.remsi %241, %245 : vector<8x128xi32>
    %c0_i32_101 = arith.constant 0 : i32
    %247 = vector.broadcast %c0_i32_101 : i32 to vector<8x128xi32>
    %248 = arith.cmpi ne, %246, %247 : vector<8x128xi32>
    %c0_i32_102 = arith.constant 0 : i32
    %249 = vector.broadcast %c0_i32_102 : i32 to vector<8x128xi32>
    %250 = arith.cmpi slt, %246, %249 : vector<8x128xi32>
    %c0_i32_103 = arith.constant 0 : i32
    %251 = arith.cmpi slt, %244, %c0_i32_103 : i32
    %252 = vector.broadcast %251 : i1 to vector<8x128xi1>
    %253 = vector.broadcast %252 : vector<8x128xi1> to vector<8x128xi1>
    %254 = arith.xori %250, %253 : vector<8x128xi1>
    %255 = arith.andi %254, %248 : vector<8x128xi1>
    %256 = vector.broadcast %244 : i32 to vector<8x128xi32>
    %257 = arith.addi %246, %256 : vector<8x128xi32>
    %258 = arith.select %255, %257, %246 : vector<8x128xi1>, vector<8x128xi32>
    %c0_i32_104 = arith.constant 0 : i32
    %259 = vector.broadcast %c0_i32_104 : i32 to vector<8x128xi32>
    %260 = arith.cmpi eq, %258, %259 : vector<8x128xi32>
    %c1_i32_105 = arith.constant 1 : i32
    %261 = tpu.dynamic_rotate %240 by %c1_i32_105 dim 0 : vector<8x128xf32>, i32 -> vector<8x128xf32>
    %262 = arith.select %260, %242, %261 : vector<8x128xi1>, vector<8x128xf32>
    %c4_i32_106 = arith.constant 4 : i32
    %c0_i32_107 = arith.constant 0 : i32
    %263 = arith.cmpi eq, %c4_i32_106, %c0_i32_107 : i32
    %c1_i32_108 = arith.constant 1 : i32
    %264 = arith.select %263, %c1_i32_108, %c4_i32_106 : i32
    %265 = vector.broadcast %264 : i32 to vector<8x128xi32>
    %266 = arith.remsi %241, %265 : vector<8x128xi32>
    %c0_i32_109 = arith.constant 0 : i32
    %267 = vector.broadcast %c0_i32_109 : i32 to vector<8x128xi32>
    %268 = arith.cmpi ne, %266, %267 : vector<8x128xi32>
    %c0_i32_110 = arith.constant 0 : i32
    %269 = vector.broadcast %c0_i32_110 : i32 to vector<8x128xi32>
    %270 = arith.cmpi slt, %266, %269 : vector<8x128xi32>
    %c0_i32_111 = arith.constant 0 : i32
    %271 = arith.cmpi slt, %264, %c0_i32_111 : i32
    %272 = vector.broadcast %271 : i1 to vector<8x128xi1>
    %273 = vector.broadcast %272 : vector<8x128xi1> to vector<8x128xi1>
    %274 = arith.xori %270, %273 : vector<8x128xi1>
    %275 = arith.andi %274, %268 : vector<8x128xi1>
    %276 = vector.broadcast %264 : i32 to vector<8x128xi32>
    %277 = arith.addi %266, %276 : vector<8x128xi32>
    %278 = arith.select %275, %277, %266 : vector<8x128xi1>, vector<8x128xi32>
    %c3_i32 = arith.constant 3 : i32
    %279 = vector.broadcast %c3_i32 : i32 to vector<8x128xi32>
    %280 = arith.cmpi eq, %278, %279 : vector<8x128xi32>
    %c7_i32_112 = arith.constant 7 : i32
    %281 = tpu.dynamic_rotate %240 by %c7_i32_112 dim 0 : vector<8x128xf32>, i32 -> vector<8x128xf32>
    %282 = arith.select %280, %242, %281 : vector<8x128xi1>, vector<8x128xf32>
    %283 = tpu.concatenate %262, %240, %282 in 1 : vector<8x128xf32>, vector<8x128xf32>, vector<8x128xf32> -> vector<8x384xf32>
    %284 = arith.truncf %283 : vector<8x384xf32> to vector<8x384xbf16>
    %c3_113 = arith.constant 3 : index
    %c0_114 = arith.constant 0 : index
    %c0_115 = arith.constant 0 : index
    %285 = vector.load %arg2[%c3_113, %c0_114, %c0_115] : memref<7x384x128xbf16, #tpu.memory_space<vmem>>, vector<1x384x128xbf16>
    %286 = vector.shape_cast %285 : vector<1x384x128xbf16> to vector<384x128xbf16>
    %cst_116 = arith.constant dense<0.000000e+00> : vector<8x128xf32>
    %287 = tpu.matmul %284, %286, %cst_116 {dimension_numbers = #tpu.dot_dimension_numbers<[1], [0], [0], [1], [0, 0, 1, 1], [], []>} : vector<8x384xbf16>, vector<384x128xbf16>, vector<8x128xf32> -> vector<8x128xf32>
    %c9 = arith.constant 9 : index
    %c0_117 = arith.constant 0 : index
    %288 = vector.load %arg3[%c9, %c0_117] : memref<20x128xf32, #tpu.memory_space<vmem>>, vector<1x128xf32>
    %289 = vector.shape_cast %288 : vector<1x128xf32> to vector<128xf32>
    %290 = vector.shape_cast %289 : vector<128xf32> to vector<1x128xf32>
    %291 = vector.broadcast %290 : vector<1x128xf32> to vector<8x128xf32>
    %292 = arith.addf %287, %291 : vector<8x128xf32>
    %c2_118 = arith.constant 2 : index
    %c0_119 = arith.constant 0 : index
    %c0_120 = arith.constant 0 : index
    %293 = vector.load %arg4[%c2_118, %c0_119, %c0_120] : memref<3x128x128xbf16, #tpu.memory_space<vmem>>, vector<1x128x128xbf16>
    %294 = vector.shape_cast %293 : vector<1x128x128xbf16> to vector<128x128xbf16>
    %295 = arith.truncf %292 : vector<8x128xf32> to vector<8x128xbf16>
    %cst_121 = arith.constant dense<0.000000e+00> : vector<8x128xf32>
    %296 = tpu.matmul %295, %294, %cst_121 {dimension_numbers = #tpu.dot_dimension_numbers<[1], [0], [0], [1], [0, 0, 1, 1], [], []>} : vector<8x128xbf16>, vector<128x128xbf16>, vector<8x128xf32> -> vector<8x128xf32>
    %297 = arith.mulf %292, %292 : vector<8x128xf32>
    %298 = arith.truncf %297 : vector<8x128xf32> to vector<8x128xbf16>
    %cst_122 = arith.constant dense<0.000000e+00> : vector<8x128xf32>
    %299 = tpu.matmul %298, %294, %cst_122 {dimension_numbers = #tpu.dot_dimension_numbers<[1], [0], [0], [1], [0, 0, 1, 1], [], []>} : vector<8x128xbf16>, vector<128x128xbf16>, vector<8x128xf32> -> vector<8x128xf32>
    %300 = arith.mulf %296, %296 : vector<8x128xf32>
    %301 = arith.subf %299, %300 : vector<8x128xf32>
    %cst_123 = arith.constant 0.000000e+00 : f32
    %302 = vector.broadcast %cst_123 : f32 to vector<8x128xf32>
    %303 = arith.maximumf %301, %302 : vector<8x128xf32>
    %304 = arith.subf %292, %296 : vector<8x128xf32>
    %cst_124 = arith.constant 9.99999997E-7 : f32
    %305 = vector.broadcast %cst_124 : f32 to vector<8x128xf32>
    %306 = arith.addf %303, %305 : vector<8x128xf32>
    %307 = math.rsqrt %306 : vector<8x128xf32>
    %308 = arith.mulf %304, %307 : vector<8x128xf32>
    %c10 = arith.constant 10 : index
    %c0_125 = arith.constant 0 : index
    %309 = vector.load %arg3[%c10, %c0_125] : memref<20x128xf32, #tpu.memory_space<vmem>>, vector<1x128xf32>
    %310 = vector.shape_cast %309 : vector<1x128xf32> to vector<128xf32>
    %311 = vector.shape_cast %310 : vector<128xf32> to vector<1x128xf32>
    %312 = vector.broadcast %311 : vector<1x128xf32> to vector<8x128xf32>
    %313 = arith.mulf %308, %312 : vector<8x128xf32>
    %c11 = arith.constant 11 : index
    %c0_126 = arith.constant 0 : index
    %314 = vector.load %arg3[%c11, %c0_126] : memref<20x128xf32, #tpu.memory_space<vmem>>, vector<1x128xf32>
    %315 = vector.shape_cast %314 : vector<1x128xf32> to vector<128xf32>
    %316 = vector.shape_cast %315 : vector<128xf32> to vector<1x128xf32>
    %317 = vector.broadcast %316 : vector<1x128xf32> to vector<8x128xf32>
    %318 = arith.addf %313, %317 : vector<8x128xf32>
    %cst_127 = arith.constant 0.000000e+00 : f32
    %319 = vector.broadcast %cst_127 : f32 to vector<8x128xf32>
    %320 = arith.maximumf %318, %319 : vector<8x128xf32>
    %321 = arith.truncf %320 : vector<8x128xf32> to vector<8x128xbf16>
    %c0_128 = arith.constant 0 : index
    %c0_129 = arith.constant 0 : index
    %c0_130 = arith.constant 0 : index
    %322 = vector.load %arg6[%c0_128, %c0_129, %c0_130] : memref<2x128x256xbf16, #tpu.memory_space<vmem>>, vector<1x128x256xbf16>
    %323 = vector.shape_cast %322 : vector<1x128x256xbf16> to vector<128x256xbf16>
    %cst_131 = arith.constant dense<0.000000e+00> : vector<8x256xf32>
    %324 = tpu.matmul %321, %323, %cst_131 {dimension_numbers = #tpu.dot_dimension_numbers<[1], [0], [0], [1], [0, 0, 1, 1], [], []>} : vector<8x128xbf16>, vector<128x256xbf16>, vector<8x256xf32> -> vector<8x256xf32>
    %325 = vector.extract_strided_slice %324 {offsets = [0, 0], sizes = [8, 128], strides = [1, 1]} : vector<8x256xf32> to vector<8x128xf32>
    %326 = vector.extract_strided_slice %324 {offsets = [0, 128], sizes = [8, 128], strides = [1, 1]} : vector<8x256xf32> to vector<8x128xf32>
    %327 = tpu.concatenate %325, %326 in 0 : vector<8x128xf32>, vector<8x128xf32> -> vector<16x128xf32>
    %328 = arith.truncf %327 : vector<16x128xf32> to vector<16x128xbf16>
    %c0_132 = arith.constant 0 : index
    %c0_133 = arith.constant 0 : index
    %329 = vector.load %arg10[%c0_132, %c0_133] : memref<16x16xbf16, #tpu.memory_space<vmem>>, vector<16x16xbf16>
    %cst_134 = arith.constant dense<0.000000e+00> : vector<16x128xf32>
    %330 = tpu.matmul %329, %328, %cst_134 {dimension_numbers = #tpu.dot_dimension_numbers<[1], [0], [0], [1], [0, 0, 1, 1], [], []>} : vector<16x16xbf16>, vector<16x128xbf16>, vector<16x128xf32> -> vector<16x128xf32>
    %331 = arith.addf %330, %226 : vector<16x128xf32>
    %332 = tpu.iota {dimensions = array<i32: 0>} : vector<16x128xi32>
    %cst_135 = arith.constant 0.000000e+00 : f32
    %333 = vector.broadcast %cst_135 : f32 to vector<16x128xf32>
    %c8_i32_136 = arith.constant 8 : i32
    %c0_i32_137 = arith.constant 0 : i32
    %334 = arith.cmpi eq, %c8_i32_136, %c0_i32_137 : i32
    %c1_i32_138 = arith.constant 1 : i32
    %335 = arith.select %334, %c1_i32_138, %c8_i32_136 : i32
    %336 = vector.broadcast %335 : i32 to vector<16x128xi32>
    %337 = arith.remsi %332, %336 : vector<16x128xi32>
    %c0_i32_139 = arith.constant 0 : i32
    %338 = vector.broadcast %c0_i32_139 : i32 to vector<16x128xi32>
    %339 = arith.cmpi ne, %337, %338 : vector<16x128xi32>
    %c0_i32_140 = arith.constant 0 : i32
    %340 = vector.broadcast %c0_i32_140 : i32 to vector<16x128xi32>
    %341 = arith.cmpi slt, %337, %340 : vector<16x128xi32>
    %c0_i32_141 = arith.constant 0 : i32
    %342 = arith.cmpi slt, %335, %c0_i32_141 : i32
    %343 = vector.broadcast %342 : i1 to vector<16x128xi1>
    %344 = vector.broadcast %343 : vector<16x128xi1> to vector<16x128xi1>
    %345 = arith.xori %341, %344 : vector<16x128xi1>
    %346 = arith.andi %345, %339 : vector<16x128xi1>
    %347 = vector.broadcast %335 : i32 to vector<16x128xi32>
    %348 = arith.addi %337, %347 : vector<16x128xi32>
    %349 = arith.select %346, %348, %337 : vector<16x128xi1>, vector<16x128xi32>
    %c0_i32_142 = arith.constant 0 : i32
    %350 = vector.broadcast %c0_i32_142 : i32 to vector<16x128xi32>
    %351 = arith.cmpi eq, %349, %350 : vector<16x128xi32>
    %c1_i32_143 = arith.constant 1 : i32
    %352 = tpu.dynamic_rotate %331 by %c1_i32_143 dim 0 : vector<16x128xf32>, i32 -> vector<16x128xf32>
    %353 = arith.select %351, %333, %352 : vector<16x128xi1>, vector<16x128xf32>
    %c8_i32_144 = arith.constant 8 : i32
    %c0_i32_145 = arith.constant 0 : i32
    %354 = arith.cmpi eq, %c8_i32_144, %c0_i32_145 : i32
    %c1_i32_146 = arith.constant 1 : i32
    %355 = arith.select %354, %c1_i32_146, %c8_i32_144 : i32
    %356 = vector.broadcast %355 : i32 to vector<16x128xi32>
    %357 = arith.remsi %332, %356 : vector<16x128xi32>
    %c0_i32_147 = arith.constant 0 : i32
    %358 = vector.broadcast %c0_i32_147 : i32 to vector<16x128xi32>
    %359 = arith.cmpi ne, %357, %358 : vector<16x128xi32>
    %c0_i32_148 = arith.constant 0 : i32
    %360 = vector.broadcast %c0_i32_148 : i32 to vector<16x128xi32>
    %361 = arith.cmpi slt, %357, %360 : vector<16x128xi32>
    %c0_i32_149 = arith.constant 0 : i32
    %362 = arith.cmpi slt, %355, %c0_i32_149 : i32
    %363 = vector.broadcast %362 : i1 to vector<16x128xi1>
    %364 = vector.broadcast %363 : vector<16x128xi1> to vector<16x128xi1>
    %365 = arith.xori %361, %364 : vector<16x128xi1>
    %366 = arith.andi %365, %359 : vector<16x128xi1>
    %367 = vector.broadcast %355 : i32 to vector<16x128xi32>
    %368 = arith.addi %357, %367 : vector<16x128xi32>
    %369 = arith.select %366, %368, %357 : vector<16x128xi1>, vector<16x128xi32>
    %c7_i32_150 = arith.constant 7 : i32
    %370 = vector.broadcast %c7_i32_150 : i32 to vector<16x128xi32>
    %371 = arith.cmpi eq, %369, %370 : vector<16x128xi32>
    %c15_i32_151 = arith.constant 15 : i32
    %372 = tpu.dynamic_rotate %331 by %c15_i32_151 dim 0 : vector<16x128xf32>, i32 -> vector<16x128xf32>
    %373 = arith.select %371, %333, %372 : vector<16x128xi1>, vector<16x128xf32>
    %374 = tpu.concatenate %353, %331, %373 in 1 : vector<16x128xf32>, vector<16x128xf32>, vector<16x128xf32> -> vector<16x384xf32>
    %375 = arith.truncf %374 : vector<16x384xf32> to vector<16x384xbf16>
    %c4_152 = arith.constant 4 : index
    %c0_153 = arith.constant 0 : index
    %c0_154 = arith.constant 0 : index
    %376 = vector.load %arg2[%c4_152, %c0_153, %c0_154] : memref<7x384x128xbf16, #tpu.memory_space<vmem>>, vector<1x384x128xbf16>
    %377 = vector.shape_cast %376 : vector<1x384x128xbf16> to vector<384x128xbf16>
    %cst_155 = arith.constant dense<0.000000e+00> : vector<16x128xf32>
    %378 = tpu.matmul %375, %377, %cst_155 {dimension_numbers = #tpu.dot_dimension_numbers<[1], [0], [0], [1], [0, 0, 1, 1], [], []>} : vector<16x384xbf16>, vector<384x128xbf16>, vector<16x128xf32> -> vector<16x128xf32>
    %c12 = arith.constant 12 : index
    %c0_156 = arith.constant 0 : index
    %379 = vector.load %arg3[%c12, %c0_156] : memref<20x128xf32, #tpu.memory_space<vmem>>, vector<1x128xf32>
    %380 = vector.shape_cast %379 : vector<1x128xf32> to vector<128xf32>
    %381 = vector.shape_cast %380 : vector<128xf32> to vector<1x128xf32>
    %382 = vector.broadcast %381 : vector<1x128xf32> to vector<16x128xf32>
    %383 = arith.addf %378, %382 : vector<16x128xf32>
    %c1_157 = arith.constant 1 : index
    %c0_158 = arith.constant 0 : index
    %c0_159 = arith.constant 0 : index
    %384 = vector.load %arg4[%c1_157, %c0_158, %c0_159] : memref<3x128x128xbf16, #tpu.memory_space<vmem>>, vector<1x128x128xbf16>
    %385 = vector.shape_cast %384 : vector<1x128x128xbf16> to vector<128x128xbf16>
    %386 = arith.truncf %383 : vector<16x128xf32> to vector<16x128xbf16>
    %cst_160 = arith.constant dense<0.000000e+00> : vector<16x128xf32>
    %387 = tpu.matmul %386, %385, %cst_160 {dimension_numbers = #tpu.dot_dimension_numbers<[1], [0], [0], [1], [0, 0, 1, 1], [], []>} : vector<16x128xbf16>, vector<128x128xbf16>, vector<16x128xf32> -> vector<16x128xf32>
    %388 = arith.mulf %383, %383 : vector<16x128xf32>
    %389 = arith.truncf %388 : vector<16x128xf32> to vector<16x128xbf16>
    %cst_161 = arith.constant dense<0.000000e+00> : vector<16x128xf32>
    %390 = tpu.matmul %389, %385, %cst_161 {dimension_numbers = #tpu.dot_dimension_numbers<[1], [0], [0], [1], [0, 0, 1, 1], [], []>} : vector<16x128xbf16>, vector<128x128xbf16>, vector<16x128xf32> -> vector<16x128xf32>
    %391 = arith.mulf %387, %387 : vector<16x128xf32>
    %392 = arith.subf %390, %391 : vector<16x128xf32>
    %cst_162 = arith.constant 0.000000e+00 : f32
    %393 = vector.broadcast %cst_162 : f32 to vector<16x128xf32>
    %394 = arith.maximumf %392, %393 : vector<16x128xf32>
    %395 = arith.subf %383, %387 : vector<16x128xf32>
    %cst_163 = arith.constant 9.99999997E-7 : f32
    %396 = vector.broadcast %cst_163 : f32 to vector<16x128xf32>
    %397 = arith.addf %394, %396 : vector<16x128xf32>
    %398 = math.rsqrt %397 : vector<16x128xf32>
    %399 = arith.mulf %395, %398 : vector<16x128xf32>
    %c13 = arith.constant 13 : index
    %c0_164 = arith.constant 0 : index
    %400 = vector.load %arg3[%c13, %c0_164] : memref<20x128xf32, #tpu.memory_space<vmem>>, vector<1x128xf32>
    %401 = vector.shape_cast %400 : vector<1x128xf32> to vector<128xf32>
    %402 = vector.shape_cast %401 : vector<128xf32> to vector<1x128xf32>
    %403 = vector.broadcast %402 : vector<1x128xf32> to vector<16x128xf32>
    %404 = arith.mulf %399, %403 : vector<16x128xf32>
    %c14 = arith.constant 14 : index
    %c0_165 = arith.constant 0 : index
    %405 = vector.load %arg3[%c14, %c0_165] : memref<20x128xf32, #tpu.memory_space<vmem>>, vector<1x128xf32>
    %406 = vector.shape_cast %405 : vector<1x128xf32> to vector<128xf32>
    %407 = vector.shape_cast %406 : vector<128xf32> to vector<1x128xf32>
    %408 = vector.broadcast %407 : vector<1x128xf32> to vector<16x128xf32>
    %409 = arith.addf %404, %408 : vector<16x128xf32>
    %cst_166 = arith.constant 0.000000e+00 : f32
    %410 = vector.broadcast %cst_166 : f32 to vector<16x128xf32>
    %411 = arith.maximumf %409, %410 : vector<16x128xf32>
    %412 = arith.truncf %411 : vector<16x128xf32> to vector<16x128xbf16>
    %c1_167 = arith.constant 1 : index
    %c0_168 = arith.constant 0 : index
    %c0_169 = arith.constant 0 : index
    %413 = vector.load %arg6[%c1_167, %c0_168, %c0_169] : memref<2x128x256xbf16, #tpu.memory_space<vmem>>, vector<1x128x256xbf16>
    %414 = vector.shape_cast %413 : vector<1x128x256xbf16> to vector<128x256xbf16>
    %cst_170 = arith.constant dense<0.000000e+00> : vector<16x256xf32>
    %415 = tpu.matmul %412, %414, %cst_170 {dimension_numbers = #tpu.dot_dimension_numbers<[1], [0], [0], [1], [0, 0, 1, 1], [], []>} : vector<16x128xbf16>, vector<128x256xbf16>, vector<16x256xf32> -> vector<16x256xf32>
    %416 = vector.extract_strided_slice %415 {offsets = [0, 0], sizes = [16, 128], strides = [1, 1]} : vector<16x256xf32> to vector<16x128xf32>
    %417 = vector.extract_strided_slice %415 {offsets = [0, 128], sizes = [16, 128], strides = [1, 1]} : vector<16x256xf32> to vector<16x128xf32>
    %418 = tpu.concatenate %416, %417 in 0 : vector<16x128xf32>, vector<16x128xf32> -> vector<32x128xf32>
    %419 = arith.truncf %418 : vector<32x128xf32> to vector<32x128xbf16>
    %c0_171 = arith.constant 0 : index
    %c0_172 = arith.constant 0 : index
    %420 = vector.load %arg11[%c0_171, %c0_172] : memref<32x32xbf16, #tpu.memory_space<vmem>>, vector<32x32xbf16>
    %cst_173 = arith.constant dense<0.000000e+00> : vector<32x128xf32>
    %421 = tpu.matmul %420, %419, %cst_173 {dimension_numbers = #tpu.dot_dimension_numbers<[1], [0], [0], [1], [0, 0, 1, 1], [], []>} : vector<32x32xbf16>, vector<32x128xbf16>, vector<32x128xf32> -> vector<32x128xf32>
    %422 = arith.addf %421, %132 : vector<32x128xf32>
    %423 = tpu.iota {dimensions = array<i32: 0>} : vector<32x128xi32>
    %cst_174 = arith.constant 0.000000e+00 : f32
    %424 = vector.broadcast %cst_174 : f32 to vector<32x128xf32>
    %c16_i32_175 = arith.constant 16 : i32
    %c0_i32_176 = arith.constant 0 : i32
    %425 = arith.cmpi eq, %c16_i32_175, %c0_i32_176 : i32
    %c1_i32_177 = arith.constant 1 : i32
    %426 = arith.select %425, %c1_i32_177, %c16_i32_175 : i32
    %427 = vector.broadcast %426 : i32 to vector<32x128xi32>
    %428 = arith.remsi %423, %427 : vector<32x128xi32>
    %c0_i32_178 = arith.constant 0 : i32
    %429 = vector.broadcast %c0_i32_178 : i32 to vector<32x128xi32>
    %430 = arith.cmpi ne, %428, %429 : vector<32x128xi32>
    %c0_i32_179 = arith.constant 0 : i32
    %431 = vector.broadcast %c0_i32_179 : i32 to vector<32x128xi32>
    %432 = arith.cmpi slt, %428, %431 : vector<32x128xi32>
    %c0_i32_180 = arith.constant 0 : i32
    %433 = arith.cmpi slt, %426, %c0_i32_180 : i32
    %434 = vector.broadcast %433 : i1 to vector<32x128xi1>
    %435 = vector.broadcast %434 : vector<32x128xi1> to vector<32x128xi1>
    %436 = arith.xori %432, %435 : vector<32x128xi1>
    %437 = arith.andi %436, %430 : vector<32x128xi1>
    %438 = vector.broadcast %426 : i32 to vector<32x128xi32>
    %439 = arith.addi %428, %438 : vector<32x128xi32>
    %440 = arith.select %437, %439, %428 : vector<32x128xi1>, vector<32x128xi32>
    %c0_i32_181 = arith.constant 0 : i32
    %441 = vector.broadcast %c0_i32_181 : i32 to vector<32x128xi32>
    %442 = arith.cmpi eq, %440, %441 : vector<32x128xi32>
    %c1_i32_182 = arith.constant 1 : i32
    %443 = tpu.dynamic_rotate %422 by %c1_i32_182 dim 0 : vector<32x128xf32>, i32 -> vector<32x128xf32>
    %444 = arith.select %442, %424, %443 : vector<32x128xi1>, vector<32x128xf32>
    %c16_i32_183 = arith.constant 16 : i32
    %c0_i32_184 = arith.constant 0 : i32
    %445 = arith.cmpi eq, %c16_i32_183, %c0_i32_184 : i32
    %c1_i32_185 = arith.constant 1 : i32
    %446 = arith.select %445, %c1_i32_185, %c16_i32_183 : i32
    %447 = vector.broadcast %446 : i32 to vector<32x128xi32>
    %448 = arith.remsi %423, %447 : vector<32x128xi32>
    %c0_i32_186 = arith.constant 0 : i32
    %449 = vector.broadcast %c0_i32_186 : i32 to vector<32x128xi32>
    %450 = arith.cmpi ne, %448, %449 : vector<32x128xi32>
    %c0_i32_187 = arith.constant 0 : i32
    %451 = vector.broadcast %c0_i32_187 : i32 to vector<32x128xi32>
    %452 = arith.cmpi slt, %448, %451 : vector<32x128xi32>
    %c0_i32_188 = arith.constant 0 : i32
    %453 = arith.cmpi slt, %446, %c0_i32_188 : i32
    %454 = vector.broadcast %453 : i1 to vector<32x128xi1>
    %455 = vector.broadcast %454 : vector<32x128xi1> to vector<32x128xi1>
    %456 = arith.xori %452, %455 : vector<32x128xi1>
    %457 = arith.andi %456, %450 : vector<32x128xi1>
    %458 = vector.broadcast %446 : i32 to vector<32x128xi32>
    %459 = arith.addi %448, %458 : vector<32x128xi32>
    %460 = arith.select %457, %459, %448 : vector<32x128xi1>, vector<32x128xi32>
    %c15_i32_189 = arith.constant 15 : i32
    %461 = vector.broadcast %c15_i32_189 : i32 to vector<32x128xi32>
    %462 = arith.cmpi eq, %460, %461 : vector<32x128xi32>
    %c31_i32_190 = arith.constant 31 : i32
    %463 = tpu.dynamic_rotate %422 by %c31_i32_190 dim 0 : vector<32x128xf32>, i32 -> vector<32x128xf32>
    %464 = arith.select %462, %424, %463 : vector<32x128xi1>, vector<32x128xf32>
    %465 = tpu.concatenate %444, %422, %464 in 1 : vector<32x128xf32>, vector<32x128xf32>, vector<32x128xf32> -> vector<32x384xf32>
    %466 = arith.truncf %465 : vector<32x384xf32> to vector<32x384xbf16>
    %c5_191 = arith.constant 5 : index
    %c0_192 = arith.constant 0 : index
    %c0_193 = arith.constant 0 : index
    %467 = vector.load %arg2[%c5_191, %c0_192, %c0_193] : memref<7x384x128xbf16, #tpu.memory_space<vmem>>, vector<1x384x128xbf16>
    %468 = vector.shape_cast %467 : vector<1x384x128xbf16> to vector<384x128xbf16>
    %cst_194 = arith.constant dense<0.000000e+00> : vector<32x128xf32>
    %469 = tpu.matmul %466, %468, %cst_194 {dimension_numbers = #tpu.dot_dimension_numbers<[1], [0], [0], [1], [0, 0, 1, 1], [], []>} : vector<32x384xbf16>, vector<384x128xbf16>, vector<32x128xf32> -> vector<32x128xf32>
    %c15 = arith.constant 15 : index
    %c0_195 = arith.constant 0 : index
    %470 = vector.load %arg3[%c15, %c0_195] : memref<20x128xf32, #tpu.memory_space<vmem>>, vector<1x128xf32>
    %471 = vector.shape_cast %470 : vector<1x128xf32> to vector<128xf32>
    %472 = vector.shape_cast %471 : vector<128xf32> to vector<1x128xf32>
    %473 = vector.broadcast %472 : vector<1x128xf32> to vector<32x128xf32>
    %474 = arith.addf %469, %473 : vector<32x128xf32>
    %c0_196 = arith.constant 0 : index
    %c0_197 = arith.constant 0 : index
    %c0_198 = arith.constant 0 : index
    %475 = vector.load %arg4[%c0_196, %c0_197, %c0_198] : memref<3x128x128xbf16, #tpu.memory_space<vmem>>, vector<1x128x128xbf16>
    %476 = vector.shape_cast %475 : vector<1x128x128xbf16> to vector<128x128xbf16>
    %477 = arith.truncf %474 : vector<32x128xf32> to vector<32x128xbf16>
    %cst_199 = arith.constant dense<0.000000e+00> : vector<32x128xf32>
    %478 = tpu.matmul %477, %476, %cst_199 {dimension_numbers = #tpu.dot_dimension_numbers<[1], [0], [0], [1], [0, 0, 1, 1], [], []>} : vector<32x128xbf16>, vector<128x128xbf16>, vector<32x128xf32> -> vector<32x128xf32>
    %479 = arith.mulf %474, %474 : vector<32x128xf32>
    %480 = arith.truncf %479 : vector<32x128xf32> to vector<32x128xbf16>
    %cst_200 = arith.constant dense<0.000000e+00> : vector<32x128xf32>
    %481 = tpu.matmul %480, %476, %cst_200 {dimension_numbers = #tpu.dot_dimension_numbers<[1], [0], [0], [1], [0, 0, 1, 1], [], []>} : vector<32x128xbf16>, vector<128x128xbf16>, vector<32x128xf32> -> vector<32x128xf32>
    %482 = arith.mulf %478, %478 : vector<32x128xf32>
    %483 = arith.subf %481, %482 : vector<32x128xf32>
    %cst_201 = arith.constant 0.000000e+00 : f32
    %484 = vector.broadcast %cst_201 : f32 to vector<32x128xf32>
    %485 = arith.maximumf %483, %484 : vector<32x128xf32>
    %486 = arith.subf %474, %478 : vector<32x128xf32>
    %cst_202 = arith.constant 9.99999997E-7 : f32
    %487 = vector.broadcast %cst_202 : f32 to vector<32x128xf32>
    %488 = arith.addf %485, %487 : vector<32x128xf32>
    %489 = math.rsqrt %488 : vector<32x128xf32>
    %490 = arith.mulf %486, %489 : vector<32x128xf32>
    %c16 = arith.constant 16 : index
    %c0_203 = arith.constant 0 : index
    %491 = vector.load %arg3[%c16, %c0_203] : memref<20x128xf32, #tpu.memory_space<vmem>>, vector<1x128xf32>
    %492 = vector.shape_cast %491 : vector<1x128xf32> to vector<128xf32>
    %493 = vector.shape_cast %492 : vector<128xf32> to vector<1x128xf32>
    %494 = vector.broadcast %493 : vector<1x128xf32> to vector<32x128xf32>
    %495 = arith.mulf %490, %494 : vector<32x128xf32>
    %c17 = arith.constant 17 : index
    %c0_204 = arith.constant 0 : index
    %496 = vector.load %arg3[%c17, %c0_204] : memref<20x128xf32, #tpu.memory_space<vmem>>, vector<1x128xf32>
    %497 = vector.shape_cast %496 : vector<1x128xf32> to vector<128xf32>
    %498 = vector.shape_cast %497 : vector<128xf32> to vector<1x128xf32>
    %499 = vector.broadcast %498 : vector<1x128xf32> to vector<32x128xf32>
    %500 = arith.addf %495, %499 : vector<32x128xf32>
    %cst_205 = arith.constant 0.000000e+00 : f32
    %501 = vector.broadcast %cst_205 : f32 to vector<32x128xf32>
    %502 = arith.maximumf %500, %501 : vector<32x128xf32>
    %503 = tpu.iota {dimensions = array<i32: 0>} : vector<32x128xi32>
    %cst_206 = arith.constant 0.000000e+00 : f32
    %504 = vector.broadcast %cst_206 : f32 to vector<32x128xf32>
    %c16_i32_207 = arith.constant 16 : i32
    %c0_i32_208 = arith.constant 0 : i32
    %505 = arith.cmpi eq, %c16_i32_207, %c0_i32_208 : i32
    %c1_i32_209 = arith.constant 1 : i32
    %506 = arith.select %505, %c1_i32_209, %c16_i32_207 : i32
    %507 = vector.broadcast %506 : i32 to vector<32x128xi32>
    %508 = arith.remsi %503, %507 : vector<32x128xi32>
    %c0_i32_210 = arith.constant 0 : i32
    %509 = vector.broadcast %c0_i32_210 : i32 to vector<32x128xi32>
    %510 = arith.cmpi ne, %508, %509 : vector<32x128xi32>
    %c0_i32_211 = arith.constant 0 : i32
    %511 = vector.broadcast %c0_i32_211 : i32 to vector<32x128xi32>
    %512 = arith.cmpi slt, %508, %511 : vector<32x128xi32>
    %c0_i32_212 = arith.constant 0 : i32
    %513 = arith.cmpi slt, %506, %c0_i32_212 : i32
    %514 = vector.broadcast %513 : i1 to vector<32x128xi1>
    %515 = vector.broadcast %514 : vector<32x128xi1> to vector<32x128xi1>
    %516 = arith.xori %512, %515 : vector<32x128xi1>
    %517 = arith.andi %516, %510 : vector<32x128xi1>
    %518 = vector.broadcast %506 : i32 to vector<32x128xi32>
    %519 = arith.addi %508, %518 : vector<32x128xi32>
    %520 = arith.select %517, %519, %508 : vector<32x128xi1>, vector<32x128xi32>
    %c0_i32_213 = arith.constant 0 : i32
    %521 = vector.broadcast %c0_i32_213 : i32 to vector<32x128xi32>
    %522 = arith.cmpi eq, %520, %521 : vector<32x128xi32>
    %c1_i32_214 = arith.constant 1 : i32
    %523 = tpu.dynamic_rotate %502 by %c1_i32_214 dim 0 : vector<32x128xf32>, i32 -> vector<32x128xf32>
    %524 = arith.select %522, %504, %523 : vector<32x128xi1>, vector<32x128xf32>
    %c16_i32_215 = arith.constant 16 : i32
    %c0_i32_216 = arith.constant 0 : i32
    %525 = arith.cmpi eq, %c16_i32_215, %c0_i32_216 : i32
    %c1_i32_217 = arith.constant 1 : i32
    %526 = arith.select %525, %c1_i32_217, %c16_i32_215 : i32
    %527 = vector.broadcast %526 : i32 to vector<32x128xi32>
    %528 = arith.remsi %503, %527 : vector<32x128xi32>
    %c0_i32_218 = arith.constant 0 : i32
    %529 = vector.broadcast %c0_i32_218 : i32 to vector<32x128xi32>
    %530 = arith.cmpi ne, %528, %529 : vector<32x128xi32>
    %c0_i32_219 = arith.constant 0 : i32
    %531 = vector.broadcast %c0_i32_219 : i32 to vector<32x128xi32>
    %532 = arith.cmpi slt, %528, %531 : vector<32x128xi32>
    %c0_i32_220 = arith.constant 0 : i32
    %533 = arith.cmpi slt, %526, %c0_i32_220 : i32
    %534 = vector.broadcast %533 : i1 to vector<32x128xi1>
    %535 = vector.broadcast %534 : vector<32x128xi1> to vector<32x128xi1>
    %536 = arith.xori %532, %535 : vector<32x128xi1>
    %537 = arith.andi %536, %530 : vector<32x128xi1>
    %538 = vector.broadcast %526 : i32 to vector<32x128xi32>
    %539 = arith.addi %528, %538 : vector<32x128xi32>
    %540 = arith.select %537, %539, %528 : vector<32x128xi1>, vector<32x128xi32>
    %c15_i32_221 = arith.constant 15 : i32
    %541 = vector.broadcast %c15_i32_221 : i32 to vector<32x128xi32>
    %542 = arith.cmpi eq, %540, %541 : vector<32x128xi32>
    %c31_i32_222 = arith.constant 31 : i32
    %543 = tpu.dynamic_rotate %502 by %c31_i32_222 dim 0 : vector<32x128xf32>, i32 -> vector<32x128xf32>
    %544 = arith.select %542, %504, %543 : vector<32x128xi1>, vector<32x128xf32>
    %545 = tpu.concatenate %524, %502, %544 in 1 : vector<32x128xf32>, vector<32x128xf32>, vector<32x128xf32> -> vector<32x384xf32>
    %546 = arith.truncf %545 : vector<32x384xf32> to vector<32x384xbf16>
    %c6_223 = arith.constant 6 : index
    %c0_224 = arith.constant 0 : index
    %c0_225 = arith.constant 0 : index
    %547 = vector.load %arg2[%c6_223, %c0_224, %c0_225] : memref<7x384x128xbf16, #tpu.memory_space<vmem>>, vector<1x384x128xbf16>
    %548 = vector.shape_cast %547 : vector<1x384x128xbf16> to vector<384x128xbf16>
    %cst_226 = arith.constant dense<0.000000e+00> : vector<32x128xf32>
    %549 = tpu.matmul %546, %548, %cst_226 {dimension_numbers = #tpu.dot_dimension_numbers<[1], [0], [0], [1], [0, 0, 1, 1], [], []>} : vector<32x384xbf16>, vector<384x128xbf16>, vector<32x128xf32> -> vector<32x128xf32>
    %c18 = arith.constant 18 : index
    %c0_227 = arith.constant 0 : index
    %550 = vector.load %arg3[%c18, %c0_227] : memref<20x128xf32, #tpu.memory_space<vmem>>, vector<1x128xf32>
    %551 = vector.shape_cast %550 : vector<1x128xf32> to vector<128xf32>
    %552 = vector.shape_cast %551 : vector<128xf32> to vector<1x128xf32>
    %553 = vector.broadcast %552 : vector<1x128xf32> to vector<32x128xf32>
    %554 = arith.addf %549, %553 : vector<32x128xf32>
    %555 = arith.truncf %0 : vector<32x128xf32> to vector<32x128xbf16>
    %c0_228 = arith.constant 0 : index
    %c0_229 = arith.constant 0 : index
    %556 = vector.load %arg7[%c0_228, %c0_229] : memref<128x128xbf16, #tpu.memory_space<vmem>>, vector<128x128xbf16>
    %cst_230 = arith.constant dense<0.000000e+00> : vector<32x128xf32>
    %557 = tpu.matmul %555, %556, %cst_230 {dimension_numbers = #tpu.dot_dimension_numbers<[1], [0], [0], [1], [0, 0, 1, 1], [], []>} : vector<32x128xbf16>, vector<128x128xbf16>, vector<32x128xf32> -> vector<32x128xf32>
    %c19 = arith.constant 19 : index
    %c0_231 = arith.constant 0 : index
    %558 = vector.load %arg3[%c19, %c0_231] : memref<20x128xf32, #tpu.memory_space<vmem>>, vector<1x128xf32>
    %559 = vector.shape_cast %558 : vector<1x128xf32> to vector<128xf32>
    %560 = vector.shape_cast %559 : vector<128xf32> to vector<1x128xf32>
    %561 = vector.broadcast %560 : vector<1x128xf32> to vector<32x128xf32>
    %562 = arith.addf %557, %561 : vector<32x128xf32>
    %563 = arith.addf %554, %562 : vector<32x128xf32>
    %564 = arith.negf %563 : vector<32x128xf32>
    %565 = math.exp %564 : vector<32x128xf32>
    %cst_232 = arith.constant 1.000000e+00 : f32
    %566 = vector.broadcast %cst_232 : f32 to vector<32x128xf32>
    %567 = arith.addf %566, %565 : vector<32x128xf32>
    %568 = arith.divf %566, %567 : vector<32x128xf32>
    %c0_233 = arith.constant 0 : index
    %c0_234 = arith.constant 0 : index
    %569 = vector.load %arg12[%c0_233, %c0_234] : memref<32x128xf32, #tpu.memory_space<vmem>>, vector<32x128xf32>
    tpu.vector_store %arg12[%c0_233, %c0_234], %568 {strides = array<i32>} : memref<32x128xf32, #tpu.memory_space<vmem>>, vector<32x128xf32>,
    return
  }
  func.func @transform_0(%arg0: i32) -> (i32, i32) {
    %c0_i32 = arith.constant 0 : i32
    %c0_i32_0 = arith.constant 0 : i32
    return %arg0, %c0_i32 : i32, i32
  }
  func.func @transform_1(%arg0: i32) -> (i32, i32, i32) {
    %c0_i32 = arith.constant 0 : i32
    %c0_i32_0 = arith.constant 0 : i32
    %c0_i32_1 = arith.constant 0 : i32
    %c0_i32_2 = arith.constant 0 : i32
    return %c0_i32, %c0_i32_0, %c0_i32_1 : i32, i32, i32
  }
  func.func @transform_2(%arg0: i32) -> (i32, i32) {
    %c0_i32 = arith.constant 0 : i32
    %c0_i32_0 = arith.constant 0 : i32
    %c0_i32_1 = arith.constant 0 : i32
    return %c0_i32, %c0_i32_0 : i32, i32
  }
  func.func @transform_3(%arg0: i32) -> (i32, i32, i32) {
    %c0_i32 = arith.constant 0 : i32
    %c0_i32_0 = arith.constant 0 : i32
    %c0_i32_1 = arith.constant 0 : i32
    %c0_i32_2 = arith.constant 0 : i32
    return %c0_i32, %c0_i32_0, %c0_i32_1 : i32, i32, i32
  }
  func.func @transform_4(%arg0: i32) -> (i32, i32, i32) {
    %c0_i32 = arith.constant 0 : i32
    %c0_i32_0 = arith.constant 0 : i32
    %c0_i32_1 = arith.constant 0 : i32
    %c0_i32_2 = arith.constant 0 : i32
    return %c0_i32, %c0_i32_0, %c0_i32_1 : i32, i32, i32
  }
  func.func @transform_5(%arg0: i32) -> (i32, i32, i32) {
    %c0_i32 = arith.constant 0 : i32
    %c0_i32_0 = arith.constant 0 : i32
    %c0_i32_1 = arith.constant 0 : i32
    %c0_i32_2 = arith.constant 0 : i32
    return %c0_i32, %c0_i32_0, %c0_i32_1 : i32, i32, i32
  }
  func.func @transform_6(%arg0: i32) -> (i32, i32) {
    %c0_i32 = arith.constant 0 : i32
    %c0_i32_0 = arith.constant 0 : i32
    %c0_i32_1 = arith.constant 0 : i32
    return %c0_i32, %c0_i32_0 : i32, i32
  }
  func.func @transform_7(%arg0: i32) -> (i32, i32) {
    %c0_i32 = arith.constant 0 : i32
    %c0_i32_0 = arith.constant 0 : i32
    %c0_i32_1 = arith.constant 0 : i32
    return %c0_i32, %c0_i32_0 : i32, i32
  }
  func.func @transform_8(%arg0: i32) -> (i32, i32) {
    %c0_i32 = arith.constant 0 : i32
    %c0_i32_0 = arith.constant 0 : i32
    %c0_i32_1 = arith.constant 0 : i32
    return %c0_i32, %c0_i32_0 : i32, i32
  }
  func.func @transform_9(%arg0: i32) -> (i32, i32) {
    %c0_i32 = arith.constant 0 : i32
    %c0_i32_0 = arith.constant 0 : i32
    %c0_i32_1 = arith.constant 0 : i32
    return %c0_i32, %c0_i32_0 : i32, i32
  }
  func.func @transform_10(%arg0: i32) -> (i32, i32) {
    %c0_i32 = arith.constant 0 : i32
    %c0_i32_0 = arith.constant 0 : i32
    %c0_i32_1 = arith.constant 0 : i32
    return %c0_i32, %c0_i32_0 : i32, i32
  }
  func.func @transform_11(%arg0: i32) -> (i32, i32) {
    %c0_i32 = arith.constant 0 : i32
    %c0_i32_0 = arith.constant 0 : i32
    return %arg0, %c0_i32 : i32, i32
  }
}

</mosaic_0001>

<bundles_post_ra>
// kernel: unet_forward_packed.1
= control target key start
LH: loop header
LB: loop body
LE: loop exit
PB: predicated region body
PF: predicated region fallthrough
CT: control target
= control target key end

     0   :  { %16 = vsyncpa [#allocation3], 0  ;;  %s6810_s0 = inlined_call_operand.vmem [shape: f32[32,128], index: 0, kind: input, shape index: {}]   ;;  %s6811_s1 = inlined_call_operand.vmem [shape: bf16[7,384,128], index: 1, kind: input, shape index: {}]   ;;  %s6812_s2 = inlined_call_operand.vmem [shape: f32[20,128], index: 2, kind: input, shape index: {}]   ;;  %s6813_s3 = inlined_call_operand.hbm [shape: bf16[3,128,128], index: 3, kind: input, shape index: {}]   ;;  %s6814_s4 = inlined_call_operand.hbm [shape: bf16[2,256,128], index: 4, kind: input, shape index: {}]   ;;  %s6815_s5 = inlined_call_operand.hbm [shape: bf16[2,128,256], index: 5, kind: input, shape index: {}]   ;;  %s6816_s6 = inlined_call_operand.vmem [shape: bf16[128,128], index: 6, kind: input, shape index: {}]   ;;  %s6817_s7 = inlined_call_operand.vmem [shape: bf16[16,32], index: 7, kind: input, shape index: {}]   ;;  %s6818_s8 = inlined_call_operand.hbm [shape: bf16[8,16], index: 8, kind: input, shape index: {}]   ;;  %s6819_s9 = inlined_call_operand.hbm [shape: bf16[16,16], index: 9, kind: input, shape index: {}]   ;;  %s6820_s10 = inlined_call_operand.hbm [shape: bf16[32,32], index: 10, kind: input, shape index: {}]   ;;  %s6821_s11 = inlined_call_operand.vmem [shape: f32[32,128], index: 11, kind: output, shape index: {}]  }
   0x1   :  { %17 = vsyncpa [#allocation5], 0 }
   0x2   :  { %18 = vsyncpa [#allocation8], 0 }
   0x3   :  { %19 = vsyncpa [#allocation11], 0  ;;  %s43_s19 = sshll.u32 %s6814_s4, 4  ;;  %s5633_s20 = smov [#allocation4]   ;;  %s44_s19 = int_to_ptr.hbm [resolvable:$true] %s43_s19 }
   0x4   :  { %s45_s21 = sshll.u32 %s5633_s20, 4  ;;  %s74_s24 = sshll.u32 %s6818_s8, 4  ;;  %s46_s21 = int_to_ptr.vmem [resolvable:$true] %s45_s21  ;;  %s75_s24 = int_to_ptr.hbm [resolvable:$true] %s74_s24 }
   0x5   :  { %s5634_s25 = smov 64   ;;  %s5635_s26 = smov 4  }
   0x6   :  { %51 = dma.hbm_to_vmem [thread:$0]  %s44_s19, 4096, %s46_s21, [#allocation5], %s5634_s25, %s5634_s25, %s5635_s26  }
   0x7   :  { %s5636_s27 = smov [#allocation7]   ;;  %s30_s4 = sshll.u32 %s6813_s3, 4  ;;  %s31_s4 = int_to_ptr.hbm [resolvable:$true] %s30_s4 }
   0x8   :  { %s76_s28 = sshll.u32 %s5636_s27, 4  ;;  %s56_s8 = sshll.u32 %s6815_s5, 4  ;;  %s77_s28 = int_to_ptr.vmem [resolvable:$true] %s76_s28  ;;  %s57_s8 = int_to_ptr.hbm [resolvable:$true] %s56_s8 }
   0x9   :  { %79 = dma.hbm_to_vmem [thread:$0]  %s75_s24, 64, %s77_s28, [#allocation8]  }
   0xa   :  { %s5637_s14 = smov [#allocation2]   ;;  %s5638_s16 = smov [#allocation6]  }
   0xb   :  { %s32_s15 = sshll.u32 %s5637_s14, 4  ;;  %s58_s17 = sshll.u32 %s5638_s16, 4  ;;  %s33_s15 = int_to_ptr.vmem [resolvable:$true] %s32_s15  ;;  %s59_s17 = int_to_ptr.vmem [resolvable:$true] %s58_s17 }
   0xc   :  { %38 = dma.hbm_to_vmem [thread:$0]  %s31_s4, 3072, %s33_s15, [#allocation3], %s5634_s25, %s5634_s25, %s5635_s26  }
   0xd   :  { %s5639_s18 = smov 128   ;;  %s5640_s3 = smov 8  }
   0xe   :  { %64 = dma.hbm_to_vmem [thread:$0]  %s57_s8, 4096, %s59_s17, [#allocation5], %s5639_s18, %s5639_s18, %s5640_s3  }
   0xf   :  { %s84_s21 = sshll.u32 %s6819_s9, 4  ;;  %s5641_s5 = smov [#allocation9]   ;;  %s85_s21 = int_to_ptr.hbm [resolvable:$true] %s84_s21 }
  0x10   :  { %s86_s22 = sshll.u32 %s5641_s5, 4  ;;  %s97_s27 = sshll.u32 %s6820_s10, 4  ;;  %s87_s22 = int_to_ptr.vmem [resolvable:$true] %s86_s22  ;;  %s98_s27 = int_to_ptr.hbm [resolvable:$true] %s97_s27 }
  0x11   :  { %92 = dma.hbm_to_vmem [thread:$0]  %s85_s21, 128, %s87_s22, [#allocation8], %s5634_s25, %s5634_s25, %s5635_s26  }
  0x12   :  { %s5642_s28 = smov [#allocation10]  }
  0x13   :  { %s99_s29 = sshll.u32 %s5642_s28, 4  ;;  %s100_s29 = int_to_ptr.vmem [resolvable:$true] %s99_s29 }
  0x14   :  { %105 = dma.hbm_to_vmem [thread:$0]  %s98_s27, 256, %s100_s29, [#allocation11], %s5634_s25, %s5634_s25, %s5635_s26  }
  0x15   :  { %5625 = dma.done.wait [#allocation3], 3072  }
  0x16   :  { %5626 = vsyncadd [#allocation3], 4294964224 }
  0x17   :  { %5627 = dma.done.wait [#allocation5], 8192  }
  0x18   :  { %5628 = vsyncadd [#allocation5], 4294959104 }
  0x19   :  { %5629 = dma.done.wait [#allocation8], 192  }
  0x1a   :  { %5630 = vsyncadd [#allocation8], 4294967104 }
  0x1b   :  { %5631 = dma.done.wait [#allocation11], 256  }
  0x1c   :  { %5632 = vsyncadd [#allocation11], 4294967040  ;;  %v5129_v0 = vld [vmem:[%s6811_s1 + $0x38] sm:$0xff]  ;;  %v5128_v3 = vld [vmem:[%s6811_s1 + $0x30] sm:$0xff]  ;;  %v135_v12 = vlaneseq  ;;  %vm5643_vm4 = vmmov 1  }
  0x1d   :  { %v5137_v1 = vld [vmem:[%s6811_s1 + $0x78] sm:$0xff]  ;;  %422 = vmatpush.bf16.msra.mxu0 %v5129_v0  ;;  %v5136_v4 = vld [vmem:[%s6811_s1 + $0x70] sm:$0xff]  ;;  %v5127_v6 = vld [vmem:[%s6811_s1 + $0x28] sm:$0xff] }
  0x1e   :  { %v5145_v2 = vld [vmem:[%s6811_s1 + $0xb8] sm:$0xff]  ;;  %441 = vmatpush.bf16.msra.mxu1 %v5137_v1  ;;  %v5144_v5 = vld [vmem:[%s6811_s1 + $0xb0] sm:$0xff]  ;;  %v5135_v7 = vld [vmem:[%s6811_s1 + $0x68] sm:$0xff]  ;;  %v5779_v16 = vshrl.u32 %v135_v12, 7 }
  0x1f   :  { %460 = vmatpush.bf16.msra.mxu2 %v5145_v2  ;;  %v5143_v8 = vld [vmem:[%s6811_s1 + $0xa8] sm:$0xff]  ;;  %v5126_v9 = vld [vmem:[%s6811_s1 + $0x20] sm:$0xff]  ;;  %v5125_v13 = vld [vmem:[%s6811_s1 + $0x18] sm:$0xff] }
  0x20   :  { %v5134_v10 = vld [vmem:[%s6811_s1 + $0x60] sm:$0xff]  ;;  %v5133_v14 = vld [vmem:[%s6811_s1 + $0x58] sm:$0xff]  ;;  %v5124_v17 = vld [vmem:[%s6811_s1 + $0x10] sm:$0xff]  ;;  %v5809_v24 = vadd.s32 8, %v5779_v16  ;;  %v144_v27 = vand.u32 15, %v5779_v16  ;;  %vm196_vm0 = vcmp.lt.s32.totalorder %v5779_v16, 1 }
  0x21   :  { %423 = vmatpush.bf16.msra.mxu0 %v5128_v3  ;;  %v5142_v11 = vld [vmem:[%s6811_s1 + $0xa0] sm:$0xff]  ;;  %v5141_v15 = vld [vmem:[%s6811_s1 + $0x98] sm:$0xff]  ;;  %v5132_v18 = vld [vmem:[%s6811_s1 + $0x50] sm:$0xff]  ;;  %vm213_vm1 = vcmp.lt.s32.totalorder %v5779_v16, 7  ;;  %v138_v51 = vadd.s32 16, %v5779_v16  ;;  %v139_v53 = vadd.s32 24, %v5779_v16 }
  0x22   :  { %442 = vmatpush.bf16.msra.mxu1 %v5136_v4  ;;  %v5140_v19 = vld [vmem:[%s6811_s1 + $0x90] sm:$0xff]  ;;  %v5793_v20 = vld [vmem:[%s6810_s0] sm:$0xff]  ;;  %v132_v21 = vld [vmem:[%s6810_s0 + $0x8] sm:$0xff]  ;;  %v151_v35 = vand.u32 15, %v5809_v24  ;;  %vm5390_vm2 = vcmp.ne.s32.totalorder %v144_v27, 0 }
  0x23   :  { %461 = vmatpush.bf16.msra.mxu2 %v5144_v5  ;;  %v5801_v22 = vld [vmem:[%s6810_s0 + $0x18] sm:$0xff]  ;;  %v5806_v23 = vld [vmem:[%s6810_s0 + $0x10] sm:$0xff]  ;;  %v5123_v25 = vld [vmem:[%s6811_s1 + $0x8] sm:$0xff]  ;;  %v192_v28 = vrot.slane %v5793_v20, 7  ;;  %v193_v29 = vrot.slane %v132_v21, 7  ;;  %v209_v32 = vrot.slane %v5793_v20, 1  ;;  %v5852_v46 = vpack.c.bf16 %v132_v21, %v5793_v20 }
  0x24   :  { %v5131_v26 = vld [vmem:[%s6811_s1 + $0x48] sm:$0xff]  ;;  %v195_v30 = vrot.slane %v5801_v22, 7  ;;  %v210_v33 = vrot.slane %v132_v21, 1  ;;  %v211_v34 = vrot.slane %v5806_v23, 1  ;;  %v5122_v36 = vld [vmem:[%s6811_s1] sm:$0xff]  ;;  %v5161_v43 = vld [vmem:[%s6811_s1 + $0x138] sm:$0xff]  ;;  %v5889_v63 = vpack.c.bf16 %v5801_v22, %v5806_v23 }
  0x25   :  { %424 = vmatpush.bf16.msra.mxu0 %v5127_v6  ;;  %v5139_v31 = vld [vmem:[%s6811_s1 + $0x88] sm:$0xff]  ;;  %v5130_v37 = vld [vmem:[%s6811_s1 + $0x40] sm:$0xff]  ;;  %v199_v38 = vsel %vm196_vm0, %v192_v28, %v193_v29  ;;  %vm5392_vm3 = vcmp.ne.s32.totalorder %v151_v35, 15  ;;  %v5169_v44 = vld [vmem:[%s6811_s1 + $0x178] sm:$0xff]  ;;  %v194_v54 = vrot.slane %v5806_v23, 7  ;;  %v158_v55 = vand.u32 15, %v138_v51 }
  0x26   :  { %443 = vmatpush.bf16.msra.mxu1 %v5135_v7  ;;  %v200_v39 = vsel %vm196_vm0, %v195_v30, %v192_v28  ;;  %v5138_v40 = vld [vmem:[%s6811_s1 + $0x80] sm:$0xff]  ;;  %v215_v41 = vsel %vm213_vm1, %v210_v33, %v211_v34  ;;  %v216_v42 = vsel %vm213_vm1, %v209_v32, %v210_v33  ;;  %vm5855_vm5 = vmpackc.low %vm5643_vm4, %vm5390_vm2  ;;  %v5160_v50 = vld [vmem:[%s6811_s1 + $0x130] sm:$0xff]  ;;  %v212_v56 = vrot.slane %v5801_v22, 1 }
  0x27   :  { %462 = vmatpush.bf16.msra.mxu2 %v5143_v8  ;;  %v3755_v45 = vpack.c.bf16 %v199_v38, %v200_v39  ;;  %v3763_v48 = vpack.c.bf16 %v215_v41, %v216_v42  ;;  %vm5860_vm6 = vmpackc.low %vm5392_vm3, %vm5643_vm4  ;;  %v5159_v52 = vld [vmem:[%s6811_s1 + $0x128] sm:$0xff]  ;;  %v165_v57 = vand.u32 15, %v139_v53  ;;  %v197_v58 = vsel %vm196_vm0, %v194_v54, %v195_v30  ;;  %v5158_v3 = vld [vmem:[%s6811_s1 + $0x120] sm:$0xff] }
  0x28   :  { %v198_v59 = vsel %vm196_vm0, %v193_v29, %v194_v54  ;;  %vm5391_vm7 = vcmp.ne.s32.totalorder %v158_v55, 0  ;;  %v214_v60 = vsel %vm213_vm1, %v211_v34, %v212_v56  ;;  %v217_v61 = vsel %vm213_vm1, %v212_v56, %v209_v32  ;;  %v5168_v4 = vld [vmem:[%s6811_s1 + $0x170] sm:$0xff]  ;;  %v5157_v5 = vld [vmem:[%s6811_s1 + $0x118] sm:$0xff]  ;;  %v5167_v7 = vld [vmem:[%s6811_s1 + $0x168] sm:$0xff] }
  0x29   :  { %425 = vmatpush.bf16.msra.mxu0 %v5126_v9  ;;  %vm5393_vm8 = vcmp.ne.s32.totalorder %v165_v57, 15  ;;  %v3759_v62 = vpack.c.bf16 %v197_v58, %v198_v59  ;;  %vm5892_vm9 = vmpackc.low %vm5643_vm4, %vm5391_vm7  ;;  %v3767_v1 = vpack.c.bf16 %v217_v61, %v214_v60  ;;  %v5153_v6 = vld [vmem:[%s6811_s1 + $0xf8] sm:$0xff]  ;;  %v5156_v8 = vld [vmem:[%s6811_s1 + $0x110] sm:$0xff] }
  0x2a   :  { %444 = vmatpush.bf16.msra.mxu1 %v5134_v10  ;;  %vm5897_vm10 = vmpackc.low %vm5393_vm8, %vm5643_vm4  ;;  %704 = vmatpush.bf16.msra.mxu3 %v5153_v6  ;;  %v5152_v9 = vld [vmem:[%s6811_s1 + $0xf0] sm:$0xff]  ;;  %v5166_v10 = vld [vmem:[%s6811_s1 + $0x160] sm:$0xff] }
  0x2b   :  { %463 = vmatpush.bf16.msra.mxu2 %v5142_v11  ;;  %v5155_v11 = vld [vmem:[%s6811_s1 + $0x108] sm:$0xff]  ;;  %v5148_v20 = vld [vmem:[%s6811_s1 + $0xd0] sm:$0xff]  ;;  %v5162_v21 = vld [vmem:[%s6811_s1 + $0x140] sm:$0xff] }
  0x2c   :  { %v5151_v12 = vld [vmem:[%s6811_s1 + $0xe8] sm:$0xff]  ;;  %v5411_v27 = vld [vmem:[%s6812_s2] ss:$0 sm:$0xff]  ;;  %v5430_v2 = vld [vmem:[%s6812_s2 + $0x13] ss:$0 sm:$0xff] }
  0x2d   :  { %426 = vmatpush.bf16.msra.mxu0 %v5125_v13  ;;  %v5165_v13 = vld [vmem:[%s6811_s1 + $0x158] sm:$0xff]  ;;  %v5147_v22 = vld [vmem:[%s6811_s1 + $0xc8] sm:$0xff] }
  0x2e   :  { %445 = vmatpush.bf16.msra.mxu1 %v5133_v14  ;;  %705 = vmatpush.bf16.msra.mxu3 %v5152_v9  ;;  %v5154_v14 = vld [vmem:[%s6811_s1 + $0x100] sm:$0xff] }
  0x2f   :  { %464 = vmatpush.bf16.msra.mxu2 %v5141_v15  ;;  %v5150_v15 = vld [vmem:[%s6811_s1 + $0xe0] sm:$0xff] }
  0x31   :  { %427 = vmatpush.bf16.msra.mxu0 %v5124_v17  ;;  %v5164_v17 = vld [vmem:[%s6811_s1 + $0x150] sm:$0xff] }
  0x32   :  { %446 = vmatpush.bf16.msra.mxu1 %v5132_v18  ;;  %706 = vmatpush.bf16.msra.mxu3 %v5151_v12  ;;  %v5149_v18 = vld [vmem:[%s6811_s1 + $0xd8] sm:$0xff] }
  0x33   :  { %465 = vmatpush.bf16.msra.mxu2 %v5140_v19  ;;  %v5163_v19 = vld [vmem:[%s6811_s1 + $0x148] sm:$0xff] }
  0x35   :  { %428 = vmatpush.bf16.msra.mxu0 %v5123_v25 }
  0x36   :  { %447 = vmatpush.bf16.msra.mxu1 %v5131_v26  ;;  %707 = vmatpush.bf16.msra.mxu3 %v5150_v15  ;;  %v5146_v26 = vld [vmem:[%s6811_s1 + $0xc0] sm:$0xff]  ;;  %v5176_v15 = vld [vmem:[#allocation2 + $0x30] sm:$0xff] }
  0x37   :  { %466 = vmatpush.bf16.msra.mxu2 %v5139_v31 }
  0x39   :  { %429 = vmatpush.bf16.msra.mxu0 %v5122_v36 }
  0x3a   :  { %448 = vmatpush.bf16.msra.mxu1 %v5130_v37  ;;  %708 = vmatpush.bf16.msra.mxu3 %v5149_v18  ;;  %v5174_v18 = vld [vmem:[#allocation2 + $0x20] sm:$0xff] }
  0x3b   :  { %467 = vmatpush.bf16.msra.mxu2 %v5138_v40 }
  0x3c   :  { %3756 = vmatmul.msk.bf16.vlgmr.msra.gmra.mxu0 %vm5855_vm5, %v3755_v45 }
  0x3d   :  { %723 = vmatpush.bf16.msrb.mxu0 %v5161_v43  ;;  %449 = vmatmul.bf16.vlgmr.msra.gmra.mxu1 %v5852_v46 }
  0x3e   :  { %742 = vmatpush.bf16.msrb.mxu1 %v5169_v44  ;;  %3764 = vmatmul.msk.bf16.vlgmr.msra.gmra.mxu2 %vm5860_vm6, %v3763_v48 }
  0x3f   :  { %709 = vmatpush.bf16.msra.mxu3 %v5148_v20  ;;  %v5172_v20 = vld [vmem:[#allocation2 + $0x10] sm:$0xff] }
  0x41   :  { %724 = vmatpush.bf16.msrb.mxu0 %v5160_v50 }
  0x42   :  { %743 = vmatpush.bf16.msrb.mxu1 %v5168_v4 }
  0x43   :  { %710 = vmatpush.bf16.msra.mxu3 %v5147_v22  ;;  %v5170_v22 = vld [vmem:[#allocation2] sm:$0xff] }
  0x45   :  { %725 = vmatpush.bf16.msrb.mxu0 %v5159_v52 }
  0x46   :  { %744 = vmatpush.bf16.msrb.mxu1 %v5167_v7 }
  0x47   :  { %711 = vmatpush.bf16.msra.mxu3 %v5146_v26  ;;  %v5412_v26 = vld [vmem:[%s6812_s2 + $0x1] ss:$0 sm:$0xff] }
  0x49   :  { %726 = vmatpush.bf16.msrb.mxu0 %v5158_v3 }
  0x4a   :  { %745 = vmatpush.bf16.msrb.mxu1 %v5166_v10 }
  0x4c   :  { %3760 = vmatmul.msk.bf16.gmra.mxu0 %vm5892_vm9, %v3759_v62 }
  0x4d   :  { %454 = vmatmul.bf16.gmra.mxu1 %v5889_v63  ;;  %727 = vmatpush.bf16.msrb.mxu0 %v5157_v5 }
  0x4e   :  { %3768 = vmatmul.msk.bf16.gmra.mxu2 %vm5897_vm10, %v3767_v1  ;;  %746 = vmatpush.bf16.msrb.mxu1 %v5165_v13 }
  0x51   :  { %728 = vmatpush.bf16.msrb.mxu0 %v5156_v8 }
  0x52   :  { %747 = vmatpush.bf16.msrb.mxu1 %v5164_v17  ;;  %v5175_v17 = vld [vmem:[#allocation2 + $0x28] sm:$0xff] }
  0x55   :  { %729 = vmatpush.bf16.msrb.mxu0 %v5155_v11 }
  0x56   :  { %748 = vmatpush.bf16.msrb.mxu1 %v5163_v19  ;;  %v5173_v19 = vld [vmem:[#allocation2 + $0x18] sm:$0xff] }
  0x59   :  { %730 = vmatpush.bf16.msrb.mxu0 %v5154_v14  ;;  %v5177_v14 = vld [vmem:[#allocation2 + $0x38] sm:$0xff] }
  0x5a   :  { %749 = vmatpush.bf16.msrb.mxu1 %v5162_v21  ;;  %827 = vmatpush.bf16.msrb.mxu2 %v5177_v14  ;;  %v5171_v21 = vld [vmem:[#allocation2 + $0x8] sm:$0xff] }
  0x5b   :  { %852 = vmatpush.bf16.msrb.mxu3 %v5177_v14 }
  0x5e   :  { %828 = vmatpush.bf16.msrb.mxu2 %v5176_v15 }
  0x5f   :  { %853 = vmatpush.bf16.msrb.mxu3 %v5176_v15 }
  0x62   :  { %829 = vmatpush.bf16.msrb.mxu2 %v5175_v17 }
  0x63   :  { %854 = vmatpush.bf16.msrb.mxu3 %v5175_v17 }
  0x66   :  { %830 = vmatpush.bf16.msrb.mxu2 %v5174_v18 }
  0x67   :  { %855 = vmatpush.bf16.msrb.mxu3 %v5174_v18 }
  0x6a   :  { %831 = vmatpush.bf16.msrb.mxu2 %v5173_v19 }
  0x6b   :  { %856 = vmatpush.bf16.msrb.mxu3 %v5173_v19 }
  0x6e   :  { %832 = vmatpush.bf16.msrb.mxu2 %v5172_v20 }
  0x6f   :  { %857 = vmatpush.bf16.msrb.mxu3 %v5172_v20 }
  0x72   :  { %833 = vmatpush.bf16.msrb.mxu2 %v5171_v21 }
  0x73   :  { %858 = vmatpush.bf16.msrb.mxu3 %v5171_v21 }
  0x76   :  { %834 = vmatpush.bf16.msrb.mxu2 %v5170_v22 }
  0x77   :  { %859 = vmatpush.bf16.msrb.mxu3 %v5170_v22 }
  0xb9   :  { %v431_v23 = vpop.f32.mrf.mxu0 }
  0xba   :  { %v450_v25 = vpop.f32.mrf.mxu1  ;;  %v432_v29 = vadd.f32 %v5411_v27, %v431_v23 }
  0xbc   :  { %v451_v33 = vadd.f32 %v450_v25, %v432_v29 }
  0xc1   :  { %v469_v28 = vpop.f32.mrf.mxu2  ;;  %v433_v30 = vpop.f32.mrf.mxu0 }
  0xc2   :  { %v452_v31 = vpop.f32.mrf.mxu1  ;;  %v434_v32 = vadd.f32 %v5411_v27, %v433_v30  ;;  %v470_v36 = vadd.f32 %v469_v28, %v451_v33 }
  0xc4   :  { %v453_v34 = vadd.f32 %v452_v31, %v434_v32  ;;  %v491_v50 = vrot.slane %v470_v36, 1  ;;  %v479_v61 = vrot.slane %v470_v36, 7 }
  0xc9   :  { %v471_v35 = vpop.f32.mrf.mxu2  ;;  %v436_v38 = vpop.f32.mrf.mxu0 }
  0xca   :  { %v472_v37 = vadd.f32 %v471_v35, %v453_v34  ;;  %v437_v39 = vadd.f32 %v5411_v27, %v436_v38  ;;  %v455_v41 = vpop.f32.mrf.mxu1 }
  0xcc   :  { %v504_v40 = vpack.c.bf16 %v472_v37, %v470_v36  ;;  %v456_v42 = vadd.f32 %v455_v41, %v437_v39  ;;  %v492_v44 = vrot.slane %v472_v37, 1  ;;  %v480_v59 = vrot.slane %v472_v37, 7 }
  0xce   :  { %731 = vmatmul.bf16.vlgmr.msrb.gmra.mxu0 %v504_v40  ;;  %v497_v54 = vsel %vm213_vm1, %v491_v50, %v492_v44  ;;  %v485_v3 = vsel %vm196_vm0, %v479_v61, %v480_v59 }
  0xd1   :  { %v474_v43 = vpop.f32.mrf.mxu2  ;;  %v438_v48 = vpop.f32.mrf.mxu0 }
  0xd2   :  { %v475_v45 = vadd.f32 %v474_v43, %v456_v42  ;;  %v439_v52 = vadd.f32 %v5411_v27, %v438_v48  ;;  %v457_v55 = vpop.f32.mrf.mxu1 }
  0xd4   :  { %v493_v51 = vrot.slane %v475_v45, 1  ;;  %v458_v57 = vadd.f32 %v457_v55, %v439_v52  ;;  %v481_v10 = vrot.slane %v475_v45, 7 }
  0xd6   :  { %v496_v53 = vsel %vm213_vm1, %v492_v44, %v493_v51  ;;  %v484_v12 = vsel %vm196_vm0, %v480_v59, %v481_v10 }
  0xd7   :  { %v3923_v56 = vpack.c.bf16 %v496_v53, %v497_v54 }
  0xd9   :  { %v476_v58 = vpop.f32.mrf.mxu2  ;;  %3924 = vmatmul.msk.bf16.vlgmr.msrb.gmra.mxu1 %vm5860_vm6, %v3923_v56 }
  0xda   :  { %v477_v60 = vadd.f32 %v476_v58, %v458_v57 }
  0xdc   :  { %v482_v62 = vrot.slane %v477_v60, 7  ;;  %v507_v1 = vpack.c.bf16 %v477_v60, %v475_v45  ;;  %v494_v6 = vrot.slane %v477_v60, 1 }
  0xde   :  { %736 = vmatmul.bf16.gmra.mxu0 %v507_v1  ;;  %v486_v4 = vsel %vm196_vm0, %v482_v62, %v479_v61  ;;  %v495_v7 = vsel %vm213_vm1, %v493_v51, %v494_v6  ;;  %v498_v8 = vsel %vm213_vm1, %v494_v6, %v491_v50  ;;  %v483_v11 = vsel %vm196_vm0, %v481_v10, %v482_v62 }
  0xdf   :  { %v3915_v5 = vpack.c.bf16 %v485_v3, %v486_v4  ;;  %v3927_v9 = vpack.c.bf16 %v498_v8, %v495_v7  ;;  %v3919_v13 = vpack.c.bf16 %v483_v11, %v484_v12 }
  0xe1   :  { %3916 = vmatmul.msk.bf16.vlgmr.msra.gmra.mxu3 %vm5855_vm5, %v3915_v5 }
  0xe9   :  { %3928 = vmatmul.msk.bf16.gmra.mxu1 %vm5897_vm10, %v3927_v9 }
  0xf1   :  { %3920 = vmatmul.msk.bf16.gmra.mxu3 %vm5892_vm9, %v3919_v13 }
 0x14b   :  { %v732_v23 = vpop.f32.mrf.mxu0 }
 0x153   :  { %v734_v29 = vpop.f32.mrf.mxu0 }
 0x156   :  { %v751_v25 = vpop.f32.mrf.mxu1 }
 0x15b   :  { %v737_v40 = vpop.f32.mrf.mxu0 }
 0x15e   :  { %v753_v31 = vpop.f32.mrf.mxu1 }
 0x163   :  { %v739_v51 = vpop.f32.mrf.mxu0 }
 0x164   :  { %v713_v27 = vpop.f32.mrf.mxu3 }
 0x165   :  { %v714_v28 = vadd.f32 %v5412_v26, %v713_v27 }
 0x166   :  { %v756_v43 = vpop.f32.mrf.mxu1 }
 0x167   :  { %v733_v30 = vadd.f32 %v732_v23, %v714_v28 }
 0x169   :  { %v5996_v34 = vadd.f32 %v751_v25, %v733_v30 }
 0x16b   :  { %v846_v38 = vmul.f32 %v5996_v34, %v5996_v34 }
 0x16c   :  { %v715_v32 = vpop.f32.mrf.mxu3 }
 0x16d   :  { %v716_v33 = vadd.f32 %v5412_v26, %v715_v32 }
 0x16e   :  { %v758_v54 = vpop.f32.mrf.mxu1 }
 0x16f   :  { %v735_v35 = vadd.f32 %v734_v29, %v716_v33 }
 0x171   :  { %v5998_v36 = vadd.f32 %v753_v31, %v735_v35 }
 0x173   :  { %v777_v37 = vpack.c.bf16 %v5998_v36, %v5996_v34  ;;  %v847_v39 = vmul.f32 %v5998_v36, %v5998_v36 }
 0x174   :  { %v718_v41 = vpop.f32.mrf.mxu3 }
 0x175   :  { %835 = vmatmul.bf16.vlgmr.msrb.gmra.mxu2 %v777_v37  ;;  %v850_v42 = vpack.c.bf16 %v847_v39, %v846_v38  ;;  %v719_v44 = vadd.f32 %v5412_v26, %v718_v41 }
 0x177   :  { %860 = vmatmul.bf16.vlgmr.msrb.gmra.mxu3 %v850_v42  ;;  %v738_v45 = vadd.f32 %v737_v40, %v719_v44 }
 0x179   :  { %v6006_v52 = vadd.f32 %v756_v43, %v738_v45 }
 0x17b   :  { %v848_v57 = vmul.f32 %v6006_v52, %v6006_v52 }
 0x17c   :  { %v720_v48 = vpop.f32.mrf.mxu3 }
 0x17d   :  { %v721_v50 = vadd.f32 %v5412_v26, %v720_v48  ;;  %v5186_v48 = vld [vmem:[#allocation4 + $0x38] sm:$0xff] }
 0x17e   :  { %1134 = vmatpush.bf16.msra.mxu2 %v5186_v48  ;;  %v5181_v48 = vld [vmem:[#allocation4 + $0x10] sm:$0xff] }
 0x17f   :  { %v740_v53 = vadd.f32 %v739_v51, %v721_v50  ;;  %v5194_v50 = vld [vmem:[#allocation4 + $0x78] sm:$0xff] }
 0x180   :  { %1148 = vmatpush.bf16.msra.mxu3 %v5194_v50  ;;  %v5189_v50 = vld [vmem:[#allocation4 + $0x50] sm:$0xff] }
 0x181   :  { %v6008_v55 = vadd.f32 %v758_v54, %v740_v53  ;;  %v5188_v53 = vld [vmem:[#allocation4 + $0x48] sm:$0xff] }
 0x183   :  { %v778_v56 = vpack.c.bf16 %v6008_v55, %v6006_v52  ;;  %v849_v58 = vmul.f32 %v6008_v55, %v6008_v55 }
 0x185   :  { %840 = vmatmul.bf16.gmra.mxu2 %v778_v56  ;;  %v851_v59 = vpack.c.bf16 %v849_v58, %v848_v57 }
 0x187   :  { %865 = vmatmul.bf16.gmra.mxu3 %v851_v59  ;;  %v5185_v59 = vld [vmem:[#allocation4 + $0x30] sm:$0xff] }
 0x188   :  { %1135 = vmatpush.bf16.msra.mxu2 %v5185_v59  ;;  %v5218_v59 = vld [vmem:[%s6811_s1 + $0x238] sm:$0xff] }
 0x1f8   :  { %v6016_v60 = vpop.f32.mrf.mxu2 }
 0x1f9   :  { %v871_v61 = vmul.f32 %v6016_v60, %v6016_v60  ;;  %v883_v57 = vsub.f32 %v5996_v34, %v6016_v60 }
 0x1fa   :  { %v861_v62 = vpop.f32.mrf.mxu3 }
 0x1fb   :  { %v875_v1 = vsub.f32 %v861_v62, %v871_v61  ;;  %v5193_v61 = vld [vmem:[#allocation4 + $0x70] sm:$0xff] }
 0x1fc   :  { %1149 = vmatpush.bf16.msra.mxu3 %v5193_v61  ;;  %v5209_v61 = vld [vmem:[%s6811_s1 + $0x1f0] sm:$0xff] }
 0x1fd   :  { %v879_v3 = vmax.f32 %v875_v1, 0.0 }
 0x1ff   :  { %v887_v4 = vadd.f32 1e-06, %v879_v3 }
 0x200   :  { %v6020_v5 = vpop.f32.mrf.mxu2 }
 0x201   :  { %v872_v6 = vmul.f32 %v6020_v5, %v6020_v5  ;;  %5431 = vrsqrt.f32 %v887_v4  ;;  %vm897_vm13 = vweird.f32 %v887_v4  ;;  %v884_v34 = vsub.f32 %v5998_v36, %v6020_v5 }
 0x202   :  { %v863_v7 = vpop.f32.mrf.mxu3 }
 0x203   :  { %v876_v8 = vsub.f32 %v863_v7, %v872_v6  ;;  %v5413_v6 = vld [vmem:[%s6812_s2 + $0x2] ss:$0 sm:$0xff] }
 0x205   :  { %v880_v9 = vmax.f32 %v876_v8, 0.0  ;;  %v5184_v8 = vld [vmem:[#allocation4 + $0x28] sm:$0xff] }
 0x206   :  { %1136 = vmatpush.bf16.msra.mxu2 %v5184_v8 }
 0x207   :  { %v888_v10 = vadd.f32 1e-06, %v880_v9  ;;  %v5432_v12 = vpop.eup %5431  ;;  %v5192_v9 = vld [vmem:[#allocation4 + $0x68] sm:$0xff] }
 0x208   :  { %v841_v11 = vpop.f32.mrf.mxu2  ;;  %v892_v17 = vmul.f32 %v5432_v12, %v887_v4  ;;  %vm898_vm11 = vweird.f32 %v5432_v12  ;;  %1150 = vmatpush.bf16.msra.mxu3 %v5192_v9 }
 0x209   :  { %5433 = vrsqrt.f32 %v888_v10  ;;  %v873_v13 = vmul.f32 %v841_v11, %v841_v11  ;;  %vm6028_vm15 = vmor %vm897_vm13, %vm898_vm11  ;;  %vm907_vm2 = vweird.f32 %v888_v10  ;;  %v885_v58 = vsub.f32 %v6006_v52, %v841_v11 }
 0x20a   :  { %v866_v14 = vpop.f32.mrf.mxu3  ;;  %v893_v21 = vmul.f32 %v5432_v12, %v892_v17  ;;  %v5191_v17 = vld [vmem:[#allocation4 + $0x60] sm:$0xff]  ;;  %vm6822_vm13 = vcmask 261120  }
 0x20b   :  { %v877_v15 = vsub.f32 %v866_v14, %v873_v13 }
 0x20c   :  { %v894_v29 = vmul.f32 0.5, %v893_v21  ;;  %1151 = vmatpush.bf16.msra.mxu3 %v5191_v17  ;;  %v5213_v17 = vld [vmem:[%s6811_s1 + $0x210] sm:$0xff] }
 0x20d   :  { %v881_v18 = vmax.f32 %v877_v15, 0.0  ;;  %v5183_v15 = vld [vmem:[#allocation4 + $0x20] sm:$0xff] }
 0x20e   :  { %v895_v35 = vsub.f32 1.5, %v894_v29  ;;  %1137 = vmatpush.bf16.msra.mxu2 %v5183_v15  ;;  %v5197_v15 = vld [vmem:[%s6811_s1 + $0x190] sm:$0xff] }
 0x20f   :  { %v5434_v19 = vpop.eup %5433  ;;  %v889_v20 = vadd.f32 1e-06, %v881_v18 }
 0x210   :  { %v902_v22 = vmul.f32 %v5434_v19, %v888_v10  ;;  %v6024_v23 = vpop.f32.mrf.mxu2  ;;  %v896_v40 = vmul.f32 %v5432_v12, %v895_v35  ;;  %vm908_vm12 = vweird.f32 %v5434_v19 }
 0x211   :  { %5435 = vrsqrt.f32 %v889_v20  ;;  %v874_v25 = vmul.f32 %v6024_v23, %v6024_v23  ;;  %vm6034_vm3 = vmor %vm907_vm2, %vm908_vm12  ;;  %vm917_vm4 = vweird.f32 %v889_v20  ;;  %v886_v36 = vsub.f32 %v6008_v55, %v6024_v23 }
 0x212   :  { %v903_v26 = vmul.f32 %v5434_v19, %v902_v22  ;;  %v868_v27 = vpop.f32.mrf.mxu3  ;;  %v900_v51 = vsel %vm6028_vm15, %v5432_v12, %v896_v40  ;;  %v5414_v12 = vld [vmem:[%s6812_s2 + $0x3] ss:$0 sm:$0xff] }
 0x213   :  { %v878_v28 = vsub.f32 %v868_v27, %v874_v25  ;;  %v931_v4 = vmul.f32 %v900_v51, %v883_v57  ;;  %v5190_v27 = vld [vmem:[#allocation4 + $0x58] sm:$0xff]  ;;  %v5180_v51 = vld [vmem:[#allocation4 + $0x8] sm:$0xff] }
 0x214   :  { %v904_v31 = vmul.f32 0.5, %v903_v26  ;;  %v5182_v26 = vld [vmem:[#allocation4 + $0x18] sm:$0xff]  ;;  %1152 = vmatpush.bf16.msra.mxu3 %v5190_v27  ;;  %v6158_v27 = vld [vmem:[#allocation2 + $0x70] sm:$0xff] }
 0x215   :  { %v882_v30 = vmax.f32 %v878_v28, 0.0  ;;  %v937_v11 = vmul.f32 %v5413_v6, %v931_v4  ;;  %1138 = vmatpush.bf16.msra.mxu2 %v5182_v26  ;;  %v5210_v57 = vld [vmem:[%s6811_s1 + $0x1f8] sm:$0xff]  ;;  %v5200_v4 = vld [vmem:[%s6811_s1 + $0x1a8] sm:$0xff] }
 0x216   :  { %v905_v38 = vsub.f32 1.5, %v904_v31  ;;  %v6154_v26 = vld [vmem:[#allocation2 + $0x78] sm:$0xff] }
 0x217   :  { %v5436_v32 = vpop.eup %5435  ;;  %v890_v33 = vadd.f32 1e-06, %v882_v30 }
 0x218   :  { %v912_v37 = vmul.f32 %v5436_v32, %v889_v20  ;;  %v906_v42 = vmul.f32 %v5434_v19, %v905_v38  ;;  %vm918_vm14 = vweird.f32 %v5436_v32  ;;  %1153 = vmatpush.bf16.msra.mxu3 %v5189_v50 }
 0x219   :  { %5437 = vrsqrt.f32 %v890_v33  ;;  %vm919_vm7 = vmor %vm917_vm4, %vm918_vm14  ;;  %vm927_vm11 = vweird.f32 %v890_v33  ;;  %1139 = vmatpush.bf16.msra.mxu2 %v5181_v48 }
 0x21a   :  { %v913_v39 = vmul.f32 %v5436_v32, %v912_v37  ;;  %v910_v62 = vsel %vm6034_vm3, %v5434_v19, %v906_v42  ;;  %v943_v19 = vadd.f32 %v5414_v12, %v937_v11  ;;  %v5199_v11 = vld [vmem:[%s6811_s1 + $0x1a0] sm:$0xff] }
 0x21b   :  { %v932_v7 = vmul.f32 %v910_v62, %v884_v34  ;;  %v5201_v62 = vld [vmem:[%s6811_s1 + $0x1b0] sm:$0xff]  ;;  %v5207_v34 = vld [vmem:[%s6811_s1 + $0x1e0] sm:$0xff] }
 0x21c   :  { %v914_v41 = vmul.f32 0.5, %v913_v39  ;;  %v6053_v28 = vmax.f32 %v943_v19, 0.0  ;;  %1154 = vmatpush.bf16.msra.mxu3 %v5188_v53  ;;  %v5196_v19 = vld [vmem:[%s6811_s1 + $0x188] sm:$0xff] }
 0x21d   :  { %v938_v5 = vmul.f32 %v5413_v6, %v932_v7  ;;  %1140 = vmatpush.bf16.msra.mxu2 %v5180_v51 }
 0x21e   :  { %v915_v43 = vsub.f32 1.5, %v914_v41 }
 0x21f   :  { %v5438_v44 = vpop.eup %5437  ;;  %v944_v25 = vadd.f32 %v5414_v12, %v938_v5  ;;  %v5205_v5 = vld [vmem:[%s6811_s1 + $0x1d0] sm:$0xff] }
 0x220   :  { %v916_v54 = vmul.f32 %v5436_v32, %v915_v43  ;;  %v922_v56 = vmul.f32 %v5438_v44, %v890_v33  ;;  %vm928_vm8 = vweird.f32 %v5438_v44  ;;  %v5178_v43 = vld [vmem:[%s6817_s7] sm:$0xff] }
 0x221   :  { %vm929_vm12 = vmor %vm927_vm11, %vm928_vm8  ;;  %v6059_v30 = vmax.f32 %v944_v25, 0.0  ;;  %v5211_v25 = vld [vmem:[%s6811_s1 + $0x200] sm:$0xff] }
 0x222   :  { %v920_v1 = vsel %vm919_vm7, %v5436_v32, %v916_v54  ;;  %v923_v3 = vmul.f32 %v5438_v44, %v922_v56  ;;  %v951_v32 = vrot.slane %v6053_v28, 1  ;;  %v5179_v54 = vld [vmem:[#allocation4] sm:$0xff] }
 0x223   :  { %v933_v60 = vmul.f32 %v920_v1, %v885_v58  ;;  %v952_v39 = vrot.slane %v6059_v30, 1  ;;  %v959_v41 = vpack.c.bf16 %v6059_v30, %v6053_v28  ;;  %1141 = vmatpush.bf16.msra.mxu2 %v5179_v54  ;;  %v5187_v56 = vld [vmem:[#allocation4 + $0x40] sm:$0xff]  ;;  %v5202_v58 = vld [vmem:[%s6811_s1 + $0x1b8] sm:$0xff]  ;;  %v5217_v1 = vld [vmem:[%s6811_s1 + $0x230] sm:$0xff] }
 0x224   :  { %v924_v52 = vmul.f32 0.5, %v923_v3  ;;  %1155 = vmatpush.bf16.msra.mxu3 %v5187_v56  ;;  %v5208_v3 = vld [vmem:[%s6811_s1 + $0x1e8] sm:$0xff] }
 0x225   :  { %v939_v13 = vmul.f32 %v5413_v6, %v933_v60 }
 0x226   :  { %v925_v10 = vsub.f32 1.5, %v924_v52 }
 0x227   :  { %v945_v21 = vadd.f32 %v5414_v12, %v939_v13  ;;  %1428 = vmatpush.bf16.msrb.mxu2 %v5218_v59  ;;  %v5206_v13 = vld [vmem:[%s6811_s1 + $0x1d8] sm:$0xff] }
 0x228   :  { %v926_v14 = vmul.f32 %v5438_v44, %v925_v10  ;;  %1508 = vmatpush.bf16.msrb.mxu3 %v6154_v26 }
 0x229   :  { %v6055_v55 = vmax.f32 %v945_v21, 0.0  ;;  %v5203_v21 = vld [vmem:[%s6811_s1 + $0x1c0] sm:$0xff] }
 0x22a   :  { %v930_v18 = vsel %vm929_vm12, %v5438_v44, %v926_v14  ;;  %v957_v44 = vsel %vm213_vm1, %v951_v32, %v952_v39  ;;  %v5198_v14 = vld [vmem:[%s6811_s1 + $0x198] sm:$0xff] }
 0x22b   :  { %v934_v20 = vmul.f32 %v930_v18, %v886_v36  ;;  %v953_v33 = vrot.slane %v6055_v55, 1  ;;  %1429 = vmatpush.bf16.msrb.mxu2 %v5217_v1  ;;  %v5214_v36 = vld [vmem:[%s6811_s1 + $0x218] sm:$0xff]  ;;  %v5204_v18 = vld [vmem:[%s6811_s1 + $0x1c8] sm:$0xff] }
 0x22c   :  { %1509 = vmatpush.bf16.msrb.mxu3 %v6158_v27 }
 0x22d   :  { %v940_v22 = vmul.f32 %v5413_v6, %v934_v20  ;;  %v956_v42 = vsel %vm213_vm1, %v952_v39, %v953_v33  ;;  %v5216_v6 = vld [vmem:[%s6811_s1 + $0x228] sm:$0xff]  ;;  %v1173_v39 = vand.u32 7, %v5809_v24 }
 0x22e   :  { %v960_v45 = vpack.c.bf16 %v956_v42, %v957_v44  ;;  %v5212_v20 = vld [vmem:[%s6811_s1 + $0x208] sm:$0xff] }
 0x22f   :  { %v946_v29 = vadd.f32 %v5414_v12, %v940_v22  ;;  %1430 = vmatpush.bf16.msrb.mxu2 %v5216_v6  ;;  %v5215_v12 = vld [vmem:[%s6811_s1 + $0x220] sm:$0xff]  ;;  %vm6171_vm14 = vcmp.ne.s32.totalorder %v1173_v39, 0  ;;  %vm6179_vm2 = vcmp.ne.s32.totalorder %v1173_v39, 7  ;;  %v6221_v6 = vld [vmem:[#allocation2 + $0x50] sm:$0xff] }
 0x230   :  { %v5195_v22 = vld [vmem:[%s6811_s1 + $0x180] sm:$0xff] }
 0x231   :  { %v6057_v23 = vmax.f32 %v946_v29, 0.0  ;;  %v6162_v29 = vld [vmem:[#allocation2 + $0x68] sm:$0xff] }
 0x232   :  { %1510 = vmatpush.bf16.msrb.mxu3 %v6162_v29 }
 0x233   :  { %v961_v31 = vpack.c.bf16 %v6057_v23, %v6055_v55  ;;  %v954_v35 = vrot.slane %v6057_v23, 1  ;;  %1431 = vmatpush.bf16.msrb.mxu2 %v5215_v12 }
 0x235   :  { %980 = vmatpush.bf16.msra.mxu0 %v961_v31  ;;  %v955_v37 = vsel %vm213_vm1, %v953_v33, %v954_v35  ;;  %v958_v38 = vsel %vm213_vm1, %v954_v35, %v951_v32  ;;  %v5415_v32 = vld [vmem:[%s6812_s2 + $0x4] ss:$0 sm:$0xff] }
 0x236   :  { %v962_v40 = vpack.c.bf16 %v958_v38, %v955_v37  ;;  %v1166_v38 = vand.u32 7, %v5779_v16 }
 0x237   :  { %1432 = vmatpush.bf16.msrb.mxu2 %v5214_v36 }
 0x238   :  { %994 = vmatpush.bf16.msra.mxu1 %v962_v40  ;;  %vm6175_vm15 = vcmp.ne.s32.totalorder %v1166_v38, 0  ;;  %vm6183_vm3 = vcmp.ne.s32.totalorder %v1166_v38, 7 }
 0x239   :  { %981 = vmatpush.bf16.msra.mxu0 %v959_v41  ;;  %vm6824_vm4 = vmpackc.low %vm6171_vm14, %vm6175_vm15 }
 0x23a   :  { %vm6823_vm7 = vmpackc.low %vm6179_vm2, %vm6183_vm3 }
 0x23b   :  { %1433 = vmatpush.bf16.msrb.mxu2 %v5213_v17 }
 0x23c   :  { %3965 = vmatmul.msk.bf16.vlgmr.msra.gmra.mxu0 %vm6822_vm13, %v5178_v43  ;;  %995 = vmatpush.bf16.msra.mxu1 %v960_v45 }
 0x23d   :  { %1400 = vmatpush.bf16.msrb.mxu0 %v5202_v58 }
 0x23f   :  { %3966 = vmatmul.msk.bf16.vlgmr.msra.gmra.mxu1 %vm6822_vm13, %v5178_v43  ;;  %1434 = vmatpush.bf16.msrb.mxu2 %v5212_v20 }
 0x240   :  { %1414 = vmatpush.bf16.msrb.mxu1 %v5210_v57 }
 0x241   :  { %1401 = vmatpush.bf16.msrb.mxu0 %v5201_v62 }
 0x243   :  { %1435 = vmatpush.bf16.msrb.mxu2 %v5211_v25 }
 0x244   :  { %1415 = vmatpush.bf16.msrb.mxu1 %v5209_v61 }
 0x245   :  { %1402 = vmatpush.bf16.msrb.mxu0 %v5200_v4  ;;  %v6217_v4 = vld [vmem:[#allocation2 + $0x58] sm:$0xff] }
 0x248   :  { %1416 = vmatpush.bf16.msrb.mxu1 %v5208_v3  ;;  %v6213_v3 = vld [vmem:[#allocation2 + $0x60] sm:$0xff] }
 0x249   :  { %1403 = vmatpush.bf16.msrb.mxu0 %v5199_v11  ;;  %1511 = vmatpush.bf16.msrb.mxu3 %v6213_v3 }
 0x24c   :  { %1417 = vmatpush.bf16.msrb.mxu1 %v5207_v34  ;;  %v6225_v34 = vld [vmem:[#allocation2 + $0x48] sm:$0xff] }
 0x24d   :  { %1404 = vmatpush.bf16.msrb.mxu0 %v5198_v14  ;;  %1512 = vmatpush.bf16.msrb.mxu3 %v6217_v4 }
 0x250   :  { %1418 = vmatpush.bf16.msrb.mxu1 %v5206_v13 }
 0x251   :  { %1405 = vmatpush.bf16.msrb.mxu0 %v5197_v15  ;;  %1513 = vmatpush.bf16.msrb.mxu3 %v6221_v6 }
 0x254   :  { %1419 = vmatpush.bf16.msrb.mxu1 %v5205_v5 }
 0x255   :  { %1406 = vmatpush.bf16.msrb.mxu0 %v5196_v19  ;;  %1514 = vmatpush.bf16.msrb.mxu3 %v6225_v34 }
 0x258   :  { %1420 = vmatpush.bf16.msrb.mxu1 %v5204_v18 }
 0x259   :  { %1407 = vmatpush.bf16.msrb.mxu0 %v5195_v22 }
 0x25c   :  { %1421 = vmatpush.bf16.msrb.mxu1 %v5203_v21 }
 0x25d   :  { %1525 = vmatpush.bf16.msra.mxu0 %v6154_v26 }
 0x261   :  { %1526 = vmatpush.bf16.msra.mxu0 %v6158_v27 }
 0x265   :  { %1527 = vmatpush.bf16.msra.mxu0 %v6162_v29 }
 0x269   :  { %1528 = vmatpush.bf16.msra.mxu0 %v6213_v3 }
 0x26d   :  { %1529 = vmatpush.bf16.msra.mxu0 %v6217_v4 }
 0x271   :  { %1530 = vmatpush.bf16.msra.mxu0 %v6221_v6 }
 0x275   :  { %1531 = vmatpush.bf16.msra.mxu0 %v6225_v34 }
 0x2b9   :  { %v983_v60 = vpop.f32.mrf.mxu0 }
 0x2bc   :  { %v997_v52 = vpop.f32.mrf.mxu1 }
 0x2c1   :  { %v985_v7 = vpop.f32.mrf.mxu0 }
 0x2c2   :  { %v1002_v8 = vpack.c.bf16 %v985_v7, %v983_v60  ;;  %v6229_v60 = vld [vmem:[#allocation2 + $0x40] sm:$0xff] }
 0x2c3   :  { %1515 = vmatpush.bf16.msrb.mxu3 %v6229_v60  ;;  %1532 = vmatpush.bf16.msra.mxu0 %v6229_v60 }
 0x2c4   :  { %v999_v9 = vpop.f32.mrf.mxu1  ;;  %1142 = vmatmul.bf16.vlgmr.msra.gmra.mxu2 %v1002_v8  ;;  %v5416_v8 = vld [vmem:[%s6812_s2 + $0x5] ss:$0 sm:$0xff] }
 0x2c5   :  { %v1003_v10 = vpack.c.bf16 %v999_v9, %v997_v52 }
 0x2c7   :  { %1156 = vmatmul.bf16.vlgmr.msra.gmra.mxu3 %v1003_v10 }
 0x347   :  { %v1143_v31 = vpop.f32.mrf.mxu2 }
 0x348   :  { %v1144_v35 = vadd.f32 %v5415_v32, %v1143_v31 }
 0x34a   :  { %v1157_v33 = vpop.f32.mrf.mxu3 }
 0x34b   :  { %v1158_v40 = vadd.f32 %v1157_v33, %v1144_v35 }
 0x34d   :  { %v1188_v48 = vrot.slane %v1158_v40, 7  ;;  %v1196_v24 = vrot.slane %v1158_v40, 1 }
 0x34f   :  { %v1145_v37 = vpop.f32.mrf.mxu2 }
 0x350   :  { %v1146_v41 = vadd.f32 %v5415_v32, %v1145_v37 }
 0x352   :  { %v1159_v42 = vpop.f32.mrf.mxu3 }
 0x353   :  { %v1160_v43 = vadd.f32 %v1159_v42, %v1146_v41 }
 0x355   :  { %v1189_v53 = vrot.slane %v1160_v43, 7  ;;  %v1197_v54 = vrot.slane %v1160_v43, 1  ;;  %v1203_v56 = vpack.c.bf16 %v1160_v43, %v1158_v40 }
 0x357   :  { %v1190_v57 = vsel %vm196_vm0, %v1188_v48, %v1189_v53  ;;  %v1191_v58 = vsel %vm196_vm0, %v1189_v53, %v1188_v48  ;;  %v1198_v59 = vsel %vm213_vm1, %v1196_v24, %v1197_v54  ;;  %v1199_v61 = vsel %vm213_vm1, %v1197_v54, %v1196_v24  ;;  %1422 = vmatmul.bf16.vlgmr.msrb.gmra.mxu1 %v1203_v56 }
 0x358   :  { %v4178_v62 = vpack.c.bf16 %v1190_v57, %v1191_v58  ;;  %v4183_v1 = vpack.c.bf16 %v1199_v61, %v1198_v59 }
 0x35a   :  { %4179 = vmatmul.msk.bf16.vlgmr.msrb.gmra.mxu0 %vm6824_vm4, %v4178_v62  ;;  %4184 = vmatmul.msk.bf16.vlgmr.msrb.gmra.mxu2 %vm6823_vm7, %v4183_v1 }
 0x3d4   :  { %v1423_v7 = vpop.f32.mrf.mxu1 }
 0x3d7   :  { %v1409_v52 = vpop.f32.mrf.mxu0 }
 0x3d8   :  { %v1410_v10 = vadd.f32 %v5416_v8, %v1409_v52  ;;  %v5417_v52 = vld [vmem:[%s6812_s2 + $0x6] ss:$0 sm:$0xff] }
 0x3da   :  { %v1424_v13 = vadd.f32 %v1423_v7, %v1410_v10  ;;  %v5418_v10 = vld [vmem:[%s6812_s2 + $0x7] ss:$0 sm:$0xff] }
 0x3dc   :  { %v1425_v14 = vpop.f32.mrf.mxu1 }
 0x3dd   :  { %v1437_v9 = vpop.f32.mrf.mxu2 }
 0x3de   :  { %v1438_v36 = vadd.f32 %v1437_v9, %v1424_v13 }
 0x3df   :  { %v1411_v11 = vpop.f32.mrf.mxu0 }
 0x3e0   :  { %v1412_v12 = vadd.f32 %v5416_v8, %v1411_v11  ;;  %v1522_v18 = vmul.f32 %v1438_v36, %v1438_v36 }
 0x3e2   :  { %v1426_v5 = vadd.f32 %v1425_v14, %v1412_v12 }
 0x3e5   :  { %v1439_v15 = vpop.f32.mrf.mxu2 }
 0x3e6   :  { %v1440_v17 = vadd.f32 %v1439_v15, %v1426_v5 }
 0x3e8   :  { %v1459_v19 = vpack.c.bf16 %v1440_v17, %v1438_v36  ;;  %v1523_v20 = vmul.f32 %v1440_v17, %v1440_v17 }
 0x3ea   :  { %v1524_v21 = vpack.c.bf16 %v1523_v20, %v1522_v18  ;;  %1516 = vmatmul.bf16.vlgmr.msrb.gmra.mxu3 %v1459_v19  ;;  %v5242_v20 = vld [vmem:[#allocation4 + $0xf8] sm:$0xff] }
 0x3ec   :  { %1533 = vmatmul.bf16.vlgmr.msra.gmra.mxu0 %v1524_v21 }
 0x469   :  { %v1534_v22 = vpop.f32.mrf.mxu0 }
 0x46d   :  { %v1517_v25 = vpop.f32.mrf.mxu3 }
 0x46e   :  { %v1539_v31 = vmul.f32 %v1517_v25, %v1517_v25  ;;  %v1545_v59 = vsub.f32 %v1438_v36, %v1517_v25 }
 0x470   :  { %v1541_v32 = vsub.f32 %v1534_v22, %v1539_v31 }
 0x471   :  { %v1536_v39 = vpop.f32.mrf.mxu0 }
 0x472   :  { %v1543_v33 = vmax.f32 %v1541_v32, 0.0  ;;  %v1587_v32 = vld [vmem:[#allocation7] sm:$0xf] }
 0x474   :  { %v1547_v35 = vadd.f32 1e-06, %v1543_v33  ;;  %v5234_v33 = vld [vmem:[#allocation4 + $0xb8] sm:$0xff] }
 0x475   :  { %v1519_v37 = vpop.f32.mrf.mxu3 }
 0x476   :  { %5439 = vrsqrt.f32 %v1547_v35  ;;  %v1540_v38 = vmul.f32 %v1519_v37, %v1519_v37  ;;  %vm1555_vm11 = vweird.f32 %v1547_v35  ;;  %v1546_v12 = vsub.f32 %v1440_v17, %v1519_v37  ;;  %v5241_v37 = vld [vmem:[#allocation4 + $0xf0] sm:$0xff] }
 0x478   :  { %v1542_v40 = vsub.f32 %v1536_v39, %v1540_v38  ;;  %v5233_v38 = vld [vmem:[#allocation4 + $0xb0] sm:$0xff]  ;;  %v5240_v39 = vld [vmem:[#allocation4 + $0xe8] sm:$0xff] }
 0x47a   :  { %v1544_v41 = vmax.f32 %v1542_v40, 0.0  ;;  %v5232_v40 = vld [vmem:[#allocation4 + $0xa8] sm:$0xff] }
 0x47c   :  { %v5440_v42 = vpop.eup %5439  ;;  %v1548_v43 = vadd.f32 1e-06, %v1544_v41  ;;  %v5239_v41 = vld [vmem:[#allocation4 + $0xe0] sm:$0xff] }
 0x47d   :  { %v1550_v48 = vmul.f32 %v5440_v42, %v1547_v35  ;;  %vm1556_vm8 = vweird.f32 %v5440_v42 }
 0x47e   :  { %5441 = vrsqrt.f32 %v1548_v43  ;;  %vm1557_vm12 = vmor %vm1555_vm11, %vm1556_vm8  ;;  %vm1565_vm7 = vweird.f32 %v1548_v43 }
 0x47f   :  { %v1551_v24 = vmul.f32 %v5440_v42, %v1550_v48  ;;  %v5230_v48 = vld [vmem:[#allocation4 + $0x98] sm:$0xff] }
 0x481   :  { %v1552_v53 = vmul.f32 0.5, %v1551_v24  ;;  %v5229_v24 = vld [vmem:[#allocation4 + $0x90] sm:$0xff] }
 0x483   :  { %v1553_v54 = vsub.f32 1.5, %v1552_v53  ;;  %v5228_v53 = vld [vmem:[#allocation4 + $0x88] sm:$0xff] }
 0x484   :  { %v5442_v56 = vpop.eup %5441 }
 0x485   :  { %v1554_v57 = vmul.f32 %v5440_v42, %v1553_v54  ;;  %v1560_v58 = vmul.f32 %v5442_v56, %v1548_v43  ;;  %vm1566_vm13 = vweird.f32 %v5442_v56  ;;  %v5238_v43 = vld [vmem:[#allocation4 + $0xd8] sm:$0xff]  ;;  %v5227_v54 = vld [vmem:[#allocation4 + $0x80] sm:$0xff] }
 0x486   :  { %vm1567_vm4 = vmor %vm1565_vm7, %vm1566_vm13  ;;  %vm1588_vm13 = vcmask 130048  }
 0x487   :  { %v1558_v61 = vsel %vm1557_vm12, %v5440_v42, %v1554_v57  ;;  %v1561_v62 = vmul.f32 %v5442_v56, %v1560_v58  ;;  %v5231_v42 = vld [vmem:[#allocation4 + $0xa0] sm:$0xff]  ;;  %v5236_v57 = vld [vmem:[#allocation4 + $0xc8] sm:$0xff] }
 0x488   :  { %v1569_v1 = vmul.f32 %v1558_v61, %v1545_v59  ;;  %v5235_v58 = vld [vmem:[#allocation4 + $0xc0] sm:$0xff]  ;;  %v5250_v59 = vld [vmem:[%s6811_s1 + $0x278] sm:$0xff] }
 0x489   :  { %v1562_v7 = vmul.f32 0.5, %v1561_v62  ;;  %v5258_v61 = vld [vmem:[%s6811_s1 + $0x2b8] sm:$0xff]  ;;  %1993 = vmatpush.bf16.msra.mxu2 %v5250_v59 }
 0x48a   :  { %v1573_v9 = vmul.f32 %v5417_v52, %v1569_v1  ;;  %v5266_v62 = vld [vmem:[%s6811_s1 + $0x2f8] sm:$0xff]  ;;  %2006 = vmatpush.bf16.msrb.mxu0 %v5258_v61  ;;  %v5249_v1 = vld [vmem:[%s6811_s1 + $0x270] sm:$0xff] }
 0x48b   :  { %v1563_v8 = vsub.f32 1.5, %v1562_v7  ;;  %v5265_v7 = vld [vmem:[%s6811_s1 + $0x2f0] sm:$0xff] }
 0x48c   :  { %v1577_v14 = vadd.f32 %v5418_v10, %v1573_v9  ;;  %v5256_v9 = vld [vmem:[%s6811_s1 + $0x2a8] sm:$0xff] }
 0x48d   :  { %v1564_v11 = vmul.f32 %v5442_v56, %v1563_v8  ;;  %1994 = vmatpush.bf16.msra.mxu2 %v5249_v1  ;;  %v5248_v8 = vld [vmem:[%s6811_s1 + $0x268] sm:$0xff] }
 0x48e   :  { %v6242_v15 = vmax.f32 %v1577_v14, 0.0  ;;  %v5246_v14 = vld [vmem:[%s6811_s1 + $0x258] sm:$0xff] }
 0x48f   :  { %v1568_v13 = vsel %vm1567_vm4, %v5442_v56, %v1564_v11  ;;  %v5237_v56 = vld [vmem:[#allocation4 + $0xd0] sm:$0xff]  ;;  %v5247_v11 = vld [vmem:[%s6811_s1 + $0x260] sm:$0xff] }
 0x490   :  { %v1570_v36 = vmul.f32 %v1568_v13, %v1546_v12  ;;  %v1581_v21 = vrot.slane %v6242_v15, 1  ;;  %v5255_v12 = vld [vmem:[%s6811_s1 + $0x2a0] sm:$0xff] }
 0x491   :  { %1995 = vmatpush.bf16.msra.mxu2 %v5248_v8  ;;  %v5263_v13 = vld [vmem:[%s6811_s1 + $0x2e0] sm:$0xff] }
 0x492   :  { %v1574_v5 = vmul.f32 %v5417_v52, %v1570_v36  ;;  %v5257_v52 = vld [vmem:[%s6811_s1 + $0x2b0] sm:$0xff] }
 0x493   :  { %2007 = vmatpush.bf16.msrb.mxu0 %v5257_v52 }
 0x494   :  { %v1578_v18 = vadd.f32 %v5418_v10, %v1574_v5  ;;  %v5264_v10 = vld [vmem:[%s6811_s1 + $0x2e8] sm:$0xff]  ;;  %v5254_v5 = vld [vmem:[%s6811_s1 + $0x298] sm:$0xff] }
 0x495   :  { %1996 = vmatpush.bf16.msra.mxu2 %v5247_v11  ;;  %v5269_v11 = vld [vmem:[#allocation2 + $0x90] sm:$0xff] }
 0x496   :  { %v6244_v19 = vmax.f32 %v1578_v18, 0.0  ;;  %v5262_v18 = vld [vmem:[%s6811_s1 + $0x2d8] sm:$0xff] }
 0x497   :  { %2008 = vmatpush.bf16.msrb.mxu0 %v5256_v9 }
 0x498   :  { %v1582_v22 = vrot.slane %v6244_v19, 1  ;;  %v1585_v25 = vpack.c.bf16 %v6244_v19, %v6242_v15 }
 0x499   :  { %1997 = vmatpush.bf16.msra.mxu2 %v5246_v14 }
 0x49a   :  { %1599 = vmatpush.bf16.msra.mxu1 %v1585_v25  ;;  %v1583_v17 = vsel %vm213_vm1, %v1581_v21, %v1582_v22  ;;  %v1584_v31 = vsel %vm213_vm1, %v1582_v22, %v1581_v21  ;;  %v5245_v21 = vld [vmem:[%s6811_s1 + $0x250] sm:$0xff] }
 0x49b   :  { %v1586_v35 = vpack.c.bf16 %v1584_v31, %v1583_v17  ;;  %2009 = vmatpush.bf16.msrb.mxu0 %v5255_v12  ;;  %v5268_v12 = vld [vmem:[#allocation2 + $0x88] sm:$0xff] }
 0x49d   :  { %1612 = vmatpush.bf16.msra.mxu3 %v1586_v35  ;;  %4217 = vmatmul.msk.bf16.vlgmr.msra.gmra.mxu1 %vm1588_vm13, %v1587_v32  ;;  %v5252_v35 = vld [vmem:[%s6811_s1 + $0x288] sm:$0xff] }
 0x49e   :  { %1764 = vmatpush.bf16.msrb.mxu1 %v5242_v20  ;;  %1998 = vmatpush.bf16.msra.mxu2 %v5245_v21 }
 0x49f   :  { %2010 = vmatpush.bf16.msrb.mxu0 %v5254_v5 }
 0x4a0   :  { %4218 = vmatmul.msk.bf16.vlgmr.msra.gmra.mxu3 %vm1588_vm13, %v1587_v32  ;;  %v5253_v32 = vld [vmem:[%s6811_s1 + $0x290] sm:$0xff] }
 0x4a1   :  { %1751 = vmatpush.bf16.msrb.mxu3 %v5234_v33  ;;  %v5261_v33 = vld [vmem:[%s6811_s1 + $0x2d0] sm:$0xff] }
 0x4a2   :  { %1765 = vmatpush.bf16.msrb.mxu1 %v5241_v37  ;;  %v5244_v37 = vld [vmem:[%s6811_s1 + $0x248] sm:$0xff] }
 0x4a3   :  { %2011 = vmatpush.bf16.msrb.mxu0 %v5253_v32  ;;  %1999 = vmatpush.bf16.msra.mxu2 %v5244_v37  ;;  %v4527_v37 = vld [vmem:[#allocation6 + $0x70] sm:$0xf] }
 0x4a5   :  { %1752 = vmatpush.bf16.msrb.mxu3 %v5233_v38  ;;  %v5260_v38 = vld [vmem:[%s6811_s1 + $0x2c8] sm:$0xff] }
 0x4a6   :  { %1766 = vmatpush.bf16.msrb.mxu1 %v5240_v39  ;;  %v5251_v39 = vld [vmem:[%s6811_s1 + $0x280] sm:$0xff] }
 0x4a7   :  { %2012 = vmatpush.bf16.msrb.mxu0 %v5252_v35 }
 0x4a9   :  { %1753 = vmatpush.bf16.msrb.mxu3 %v5232_v40  ;;  %v5243_v40 = vld [vmem:[%s6811_s1 + $0x240] sm:$0xff] }
 0x4aa   :  { %1767 = vmatpush.bf16.msrb.mxu1 %v5239_v41  ;;  %v5259_v41 = vld [vmem:[%s6811_s1 + $0x2c0] sm:$0xff]  ;;  %2000 = vmatpush.bf16.msra.mxu2 %v5243_v40 }
 0x4ab   :  { %2013 = vmatpush.bf16.msrb.mxu0 %v5251_v39  ;;  %v5289_v39 = vld [vmem:[#allocation6 + $0x74] sm:$0xf] }
 0x4ad   :  { %1754 = vmatpush.bf16.msrb.mxu3 %v5231_v42  ;;  %v5274_v42 = vld [vmem:[#allocation2 + $0xb8] sm:$0xff] }
 0x4ae   :  { %1768 = vmatpush.bf16.msrb.mxu1 %v5238_v43  ;;  %2113 = vmatpush.bf16.msrb.mxu2 %v5274_v42  ;;  %v5273_v43 = vld [vmem:[#allocation2 + $0xb0] sm:$0xff] }
 0x4b1   :  { %1755 = vmatpush.bf16.msrb.mxu3 %v5230_v48  ;;  %v5272_v48 = vld [vmem:[#allocation2 + $0xa8] sm:$0xff] }
 0x4b2   :  { %1769 = vmatpush.bf16.msrb.mxu1 %v5237_v56  ;;  %2114 = vmatpush.bf16.msrb.mxu2 %v5273_v43  ;;  %v1781_v56 = vand.u32 3, %v5779_v16 }
 0x4b4   :  { %vm5398_vm4 = vcmp.ne.s32.totalorder %v1781_v56, 0  ;;  %vm5399_vm7 = vcmp.ne.s32.totalorder %v1781_v56, 3 }
 0x4b5   :  { %1756 = vmatpush.bf16.msrb.mxu3 %v5229_v24  ;;  %v5271_v24 = vld [vmem:[#allocation2 + $0xa0] sm:$0xff]  ;;  %vm4429_vm8 = vmpackc.low %vm5398_vm4, %vm5398_vm4 }
 0x4b6   :  { %1770 = vmatpush.bf16.msrb.mxu1 %v5236_v57  ;;  %2115 = vmatpush.bf16.msrb.mxu2 %v5272_v48  ;;  %vm4434_vm11 = vmpackc.low %vm5399_vm7, %vm5399_vm7 }
 0x4b9   :  { %1757 = vmatpush.bf16.msrb.mxu3 %v5228_v53  ;;  %v5270_v53 = vld [vmem:[#allocation2 + $0x98] sm:$0xff] }
 0x4ba   :  { %1771 = vmatpush.bf16.msrb.mxu1 %v5235_v58  ;;  %2116 = vmatpush.bf16.msrb.mxu2 %v5271_v24 }
 0x4bd   :  { %1758 = vmatpush.bf16.msrb.mxu3 %v5227_v54  ;;  %v5419_v54 = vld [vmem:[%s6812_s2 + $0x8] ss:$0 sm:$0xff] }
 0x4be   :  { %2098 = vmatpush.bf16.msra.mxu1 %v5274_v42  ;;  %2117 = vmatpush.bf16.msrb.mxu2 %v5270_v53 }
 0x4c1   :  { %2019 = vmatpush.bf16.msra.mxu3 %v5266_v62 }
 0x4c2   :  { %2099 = vmatpush.bf16.msra.mxu1 %v5273_v43  ;;  %2118 = vmatpush.bf16.msrb.mxu2 %v5269_v11  ;;  %v4519_v43 = vld [vmem:[#allocation6 + $0x60] sm:$0xf] }
 0x4c5   :  { %2020 = vmatpush.bf16.msra.mxu3 %v5265_v7 }
 0x4c6   :  { %2100 = vmatpush.bf16.msra.mxu1 %v5272_v48  ;;  %2119 = vmatpush.bf16.msrb.mxu2 %v5268_v12  ;;  %v5288_v48 = vld [vmem:[#allocation6 + $0x64] sm:$0xf0] }
 0x4c9   :  { %2021 = vmatpush.bf16.msra.mxu3 %v5264_v10 }
 0x4ca   :  { %2101 = vmatpush.bf16.msra.mxu1 %v5271_v24  ;;  %v5287_v24 = vld [vmem:[#allocation6 + $0x64] sm:$0xf] }
 0x4cd   :  { %2022 = vmatpush.bf16.msra.mxu3 %v5263_v13  ;;  %v5267_v13 = vld [vmem:[#allocation2 + $0x80] sm:$0xff] }
 0x4ce   :  { %2102 = vmatpush.bf16.msra.mxu1 %v5270_v53  ;;  %2120 = vmatpush.bf16.msrb.mxu2 %v5267_v13  ;;  %v4520_v53 = vor.u32 %v5288_v48, %v4519_v43  ;;  %v5275_v48 = vld [vmem:[#allocation6 + $0x4] sm:$0xf] }
 0x4d1   :  { %2023 = vmatpush.bf16.msra.mxu3 %v5262_v18 }
 0x4d2   :  { %2103 = vmatpush.bf16.msra.mxu1 %v5269_v11 }
 0x4d5   :  { %2024 = vmatpush.bf16.msra.mxu3 %v5261_v33 }
 0x4d6   :  { %2104 = vmatpush.bf16.msra.mxu1 %v5268_v12  ;;  %v4495_v12 = vld [vmem:[#allocation6 + $0x30] sm:$0xf] }
 0x4d9   :  { %2025 = vmatpush.bf16.msra.mxu3 %v5260_v38  ;;  %v5290_v38 = vld [vmem:[#allocation6 + $0x74] sm:$0xf0] }
 0x4da   :  { %2105 = vmatpush.bf16.msra.mxu1 %v5267_v13  ;;  %v4528_v40 = vor.u32 %v5290_v38, %v4527_v37  ;;  %v5282_v13 = vld [vmem:[#allocation6 + $0x34] sm:$0xf0]  ;;  %v5277_v38 = vld [vmem:[#allocation6 + $0x14] sm:$0xf] }
 0x4db   :  { %v5278_v37 = vld [vmem:[#allocation6 + $0x14] sm:$0xf0] }
 0x4dc   :  { %2246 = vmatpush.bf16.msra.mxu0 %v4528_v40  ;;  %v4481_v40 = vld [vmem:[#allocation6 + $0x18] sm:$0xf0] }
 0x4dd   :  { %2026 = vmatpush.bf16.msra.mxu3 %v5259_v41  ;;  %v4529_v41 = vld [vmem:[#allocation6 + $0x78] sm:$0xf0]  ;;  %v4484_v43 = vor.u32 %v5277_v38, %v4481_v40  ;;  %v5296_v38 = vld [vmem:[%s6811_s1 + $0x320] sm:$0xff] }
 0x4de   :  { %v4532_v42 = vor.u32 %v5289_v39, %v4529_v41  ;;  %v4471_v41 = vld [vmem:[#allocation6] sm:$0xf] }
 0x4e0   :  { %2247 = vmatpush.bf16.msra.mxu0 %v4520_v53 }
 0x51a   :  { %v1601_v36 = vpop.f32.mrf.mxu1 }
 0x51b   :  { %v1618_v20 = vpack.c.bf16 %v1601_v36, %v1601_v36  ;;  %v5420_v36 = vld [vmem:[%s6812_s2 + $0x9] ss:$0 sm:$0xff] }
 0x51d   :  { %1759 = vmatmul.bf16.vlgmr.msrb.gmra.mxu3 %v1618_v20 }
 0x51e   :  { %2259 = vmatpush.bf16.msrb.mxu3 %v4532_v42  ;;  %v5276_v42 = vld [vmem:[#allocation6 + $0x4] sm:$0xf0] }
 0x51f   :  { %v4472_v53 = vor.u32 %v5276_v42, %v4471_v41  ;;  %v5315_v42 = vld [vmem:[%s6811_s1 + $0x3b8] sm:$0xff] }
 0x522   :  { %v1603_v22 = vpop.f32.mrf.mxu1 }
 0x523   :  { %v1614_v25 = vpop.f32.mrf.mxu3 }
 0x524   :  { %v1619_v17 = vpack.c.bf16 %v1614_v25, %v1614_v25 }
 0x526   :  { %1772 = vmatmul.bf16.vlgmr.msrb.gmra.mxu1 %v1619_v17 }
 0x52b   :  { %v1616_v31 = vpop.f32.mrf.mxu3 }
 0x5a0   :  { %v1760_v57 = vpop.f32.mrf.mxu3 }
 0x5a1   :  { %v1761_v58 = vadd.f32 %v5419_v54, %v1760_v57  ;;  %v4521_v54 = vld [vmem:[#allocation6 + $0x68] sm:$0xf0]  ;;  %v4511_v57 = vld [vmem:[#allocation6 + $0x50] sm:$0xf] }
 0x5a2   :  { %v4524_v56 = vor.u32 %v5287_v24, %v4521_v54  ;;  %v4473_v24 = vld [vmem:[#allocation6 + $0x8] sm:$0xf0] }
 0x5a3   :  { %v1773_v59 = vpop.f32.mrf.mxu1  ;;  %v4476_v54 = vor.u32 %v5275_v48, %v4473_v24  ;;  %v5291_v24 = vld [vmem:[#allocation9] sm:$0xff] }
 0x5a4   :  { %v1774_v61 = vadd.f32 %v1773_v59, %v1761_v58  ;;  %2260 = vmatpush.bf16.msrb.mxu3 %v4524_v56  ;;  %v5286_v58 = vld [vmem:[#allocation6 + $0x54] sm:$0xf0]  ;;  %v5285_v59 = vld [vmem:[#allocation6 + $0x54] sm:$0xf] }
 0x5a6   :  { %v1790_v62 = vrot.slane %v1774_v61, 7  ;;  %v1793_v1 = vrot.slane %v1774_v61, 1  ;;  %v1796_v52 = vpack.c.bf16 %v1774_v61, %v1774_v61  ;;  %v4512_v61 = vor.u32 %v5286_v58, %v4511_v57 }
 0x5a8   :  { %v4430_v7 = vpack.c.bf16 %v1790_v62, %v1790_v62  ;;  %v4435_v8 = vpack.c.bf16 %v1793_v1, %v1793_v1  ;;  %2014 = vmatmul.bf16.vlgmr.msrb.gmra.mxu0 %v1796_v52  ;;  %v1762_v9 = vpop.f32.mrf.mxu3  ;;  %v4513_v62 = vld [vmem:[#allocation6 + $0x58] sm:$0xf0]  ;;  %v4503_v52 = vld [vmem:[#allocation6 + $0x40] sm:$0xf] }
 0x5a9   :  { %v4516_v1 = vor.u32 %v5285_v59, %v4513_v62  ;;  %2248 = vmatpush.bf16.msra.mxu0 %v4512_v61 }
 0x5aa   :  { %4431 = vmatmul.msk.bf16.vlgmr.msra.gmra.mxu2 %vm4429_vm8, %v4430_v7  ;;  %4436 = vmatmul.msk.bf16.vlgmr.msra.gmra.mxu3 %vm4434_vm11, %v4435_v8  ;;  %v5284_v7 = vld [vmem:[#allocation6 + $0x44] sm:$0xf0]  ;;  %v5283_v8 = vld [vmem:[#allocation6 + $0x44] sm:$0xf]  ;;  %vm6846_vm8 = vmpackc.low %vm6179_vm2, %vm6183_vm3 }
 0x5ab   :  { %v1775_v10 = vpop.f32.mrf.mxu1  ;;  %2261 = vmatpush.bf16.msrb.mxu3 %v4516_v1  ;;  %v4504_v9 = vor.u32 %v5284_v7, %v4503_v52 }
 0x5ac   :  { %v4505_v10 = vld [vmem:[#allocation6 + $0x48] sm:$0xf0] }
 0x5ad   :  { %v4508_v11 = vor.u32 %v5283_v8, %v4505_v10  ;;  %2249 = vmatpush.bf16.msra.mxu0 %v4504_v9 }
 0x5af   :  { %2262 = vmatpush.bf16.msrb.mxu3 %v4508_v11 }
 0x625   :  { %v2015_v14 = vpop.f32.mrf.mxu0 }
 0x62d   :  { %v2002_v5 = vpop.f32.mrf.mxu2  ;;  %v2017_v18 = vpop.f32.mrf.mxu0 }
 0x62e   :  { %v2003_v20 = vadd.f32 %v5420_v36, %v2002_v5  ;;  %v2028_v21 = vpop.f32.mrf.mxu3  ;;  %v4496_v36 = vor.u32 %v5282_v13, %v4495_v12  ;;  %v4497_v5 = vld [vmem:[#allocation6 + $0x38] sm:$0xf0]  ;;  %v5421_v13 = vld [vmem:[%s6812_s2 + $0xa] ss:$0 sm:$0xff] }
 0x630   :  { %v2016_v22 = vadd.f32 %v2015_v14, %v2003_v20  ;;  %v5281_v14 = vld [vmem:[#allocation6 + $0x34] sm:$0xf]  ;;  %2250 = vmatpush.bf16.msra.mxu0 %v4496_v36  ;;  %v4487_v20 = vld [vmem:[#allocation6 + $0x20] sm:$0xf] }
 0x631   :  { %v4500_v18 = vor.u32 %v5281_v14, %v4497_v5  ;;  %v5422_v5 = vld [vmem:[%s6812_s2 + $0xb] ss:$0 sm:$0xff] }
 0x632   :  { %v6335_v25 = vadd.f32 %v2028_v21, %v2016_v22  ;;  %v5280_v21 = vld [vmem:[#allocation6 + $0x24] sm:$0xf0]  ;;  %v5279_v22 = vld [vmem:[#allocation6 + $0x24] sm:$0xf] }
 0x633   :  { %2263 = vmatpush.bf16.msrb.mxu3 %v4500_v18 }
 0x634   :  { %v2049_v17 = vpack.c.bf16 %v6335_v25, %v6335_v25  ;;  %v2111_v31 = vmul.f32 %v6335_v25, %v6335_v25 }
 0x635   :  { %v2004_v32 = vpop.f32.mrf.mxu2 }
 0x636   :  { %v2112_v33 = vpack.c.bf16 %v2111_v31, %v2111_v31  ;;  %2106 = vmatmul.bf16.vlgmr.msra.gmra.mxu1 %v2049_v17  ;;  %v2030_v35 = vpop.f32.mrf.mxu3  ;;  %v4488_v17 = vor.u32 %v5280_v21, %v4487_v20  ;;  %v4489_v31 = vld [vmem:[#allocation6 + $0x28] sm:$0xf0] }
 0x637   :  { %v4479_v35 = vld [vmem:[#allocation6 + $0x10] sm:$0xf] }
 0x638   :  { %2121 = vmatmul.bf16.vlgmr.msrb.gmra.mxu2 %v2112_v33  ;;  %v4492_v33 = vor.u32 %v5279_v22, %v4489_v31  ;;  %2251 = vmatpush.bf16.msra.mxu0 %v4488_v17  ;;  %v4480_v39 = vor.u32 %v5278_v37, %v4479_v35  ;;  %v5307_v22 = vld [vmem:[%s6811_s1 + $0x378] sm:$0xff]  ;;  %v5306_v31 = vld [vmem:[%s6811_s1 + $0x370] sm:$0xff]  ;;  %v5297_v35 = vld [vmem:[%s6811_s1 + $0x328] sm:$0xff] }
 0x639   :  { %v5299_v17 = vld [vmem:[%s6811_s1 + $0x338] sm:$0xff]  ;;  %v5304_v37 = vld [vmem:[%s6811_s1 + $0x360] sm:$0xff] }
 0x63a   :  { %2264 = vmatpush.bf16.msrb.mxu3 %v4492_v33  ;;  %2507 = vmatpush.bf16.msra.mxu2 %v5299_v17  ;;  %v5305_v33 = vld [vmem:[%s6811_s1 + $0x368] sm:$0xff] }
 0x63c   :  { %2252 = vmatpush.bf16.msra.mxu0 %v4480_v39  ;;  %v5303_v39 = vld [vmem:[%s6811_s1 + $0x358] sm:$0xff] }
 0x63e   :  { %2265 = vmatpush.bf16.msrb.mxu3 %v4484_v43 }
 0x640   :  { %2253 = vmatpush.bf16.msra.mxu0 %v4472_v53  ;;  %v5314_v53 = vld [vmem:[%s6811_s1 + $0x3b0] sm:$0xff] }
 0x642   :  { %2266 = vmatpush.bf16.msrb.mxu3 %v4476_v54 }
 0x644   :  { %2521 = vmatpush.bf16.msrb.mxu0 %v5307_v22 }
 0x646   :  { %2550 = vmatpush.bf16.msra.mxu3 %v6154_v26 }
 0x648   :  { %2522 = vmatpush.bf16.msrb.mxu0 %v5306_v31 }
 0x64a   :  { %2551 = vmatpush.bf16.msra.mxu3 %v6158_v27 }
 0x64c   :  { %2523 = vmatpush.bf16.msrb.mxu0 %v5305_v33 }
 0x64e   :  { %2552 = vmatpush.bf16.msra.mxu3 %v6162_v29 }
 0x650   :  { %2524 = vmatpush.bf16.msrb.mxu0 %v5304_v37 }
 0x652   :  { %2553 = vmatpush.bf16.msra.mxu3 %v6213_v3 }
 0x654   :  { %2525 = vmatpush.bf16.msrb.mxu0 %v5303_v39 }
 0x656   :  { %2554 = vmatpush.bf16.msra.mxu3 %v6217_v4 }
 0x65a   :  { %2555 = vmatpush.bf16.msra.mxu3 %v6221_v6 }
 0x65e   :  { %2556 = vmatpush.bf16.msra.mxu3 %v6225_v34 }
 0x662   :  { %2557 = vmatpush.bf16.msra.mxu3 %v6229_v60 }
 0x6b3   :  { %v2107_v32 = vpop.f32.mrf.mxu1 }
 0x6b4   :  { %v2126_v56 = vmul.f32 %v2107_v32, %v2107_v32  ;;  %v2129_v12 = vsub.f32 %v6335_v25, %v2107_v32  ;;  %v5298_v32 = vld [vmem:[%s6811_s1 + $0x330] sm:$0xff] }
 0x6b5   :  { %2508 = vmatpush.bf16.msra.mxu2 %v5298_v32 }
 0x6b9   :  { %2509 = vmatpush.bf16.msra.mxu2 %v5297_v35 }
 0x6bb   :  { %v2109_v57 = vpop.f32.mrf.mxu1  ;;  %v2122_v58 = vpop.f32.mrf.mxu2 }
 0x6bc   :  { %v2127_v59 = vsub.f32 %v2122_v58, %v2126_v56  ;;  %v5313_v56 = vld [vmem:[%s6811_s1 + $0x3a8] sm:$0xff]  ;;  %v5312_v57 = vld [vmem:[%s6811_s1 + $0x3a0] sm:$0xff]  ;;  %v5295_v58 = vld [vmem:[%s6811_s1 + $0x318] sm:$0xff] }
 0x6bd   :  { %2510 = vmatpush.bf16.msra.mxu2 %v5296_v38 }
 0x6be   :  { %v2128_v61 = vmax.f32 %v2127_v59, 0.0  ;;  %v5311_v59 = vld [vmem:[%s6811_s1 + $0x398] sm:$0xff] }
 0x6c0   :  { %v2130_v62 = vadd.f32 1e-06, %v2128_v61  ;;  %v5302_v61 = vld [vmem:[%s6811_s1 + $0x350] sm:$0xff] }
 0x6c1   :  { %2511 = vmatpush.bf16.msra.mxu2 %v5295_v58  ;;  %2526 = vmatpush.bf16.msrb.mxu0 %v5302_v61  ;;  %v4744_v58 = vld [vmem:[#allocation6 + $0xe8] sm:$0xf0]  ;;  %v4734_v61 = vld [vmem:[#allocation6 + $0xd0] sm:$0xf] }
 0x6c2   :  { %5443 = vrsqrt.f32 %v2130_v62  ;;  %vm2137_vm4 = vweird.f32 %v2130_v62 }
 0x6c3   :  { %v2124_v1 = vpop.f32.mrf.mxu2 }
 0x6c4   :  { %v5310_v1 = vld [vmem:[%s6811_s1 + $0x390] sm:$0xff] }
 0x6c8   :  { %v5444_v52 = vpop.eup %5443 }
 0x6c9   :  { %v2132_v7 = vmul.f32 %v5444_v52, %v2130_v62  ;;  %vm2138_vm12 = vweird.f32 %v5444_v52  ;;  %v5294_v62 = vld [vmem:[%s6811_s1 + $0x310] sm:$0xff] }
 0x6ca   :  { %vm2139_vm7 = vmor %vm2137_vm4, %vm2138_vm12  ;;  %2512 = vmatpush.bf16.msra.mxu2 %v5294_v62  ;;  %v5327_v62 = vld [vmem:[#allocation6 + $0xd4] sm:$0xf0]  ;;  %vm6847_vm4 = vcmask 261120  }
 0x6cb   :  { %v2133_v8 = vmul.f32 %v5444_v52, %v2132_v7  ;;  %v5293_v7 = vld [vmem:[%s6811_s1 + $0x308] sm:$0xff] }
 0x6cd   :  { %v2134_v9 = vmul.f32 0.5, %v2133_v8  ;;  %v5309_v8 = vld [vmem:[%s6811_s1 + $0x388] sm:$0xff] }
 0x6ce   :  { %2513 = vmatpush.bf16.msra.mxu2 %v5293_v7  ;;  %v4736_v7 = vld [vmem:[#allocation6 + $0xd8] sm:$0xf0] }
 0x6cf   :  { %v2135_v10 = vsub.f32 1.5, %v2134_v9  ;;  %v5300_v9 = vld [vmem:[%s6811_s1 + $0x340] sm:$0xff] }
 0x6d1   :  { %v2136_v11 = vmul.f32 %v5444_v52, %v2135_v10  ;;  %v5292_v10 = vld [vmem:[%s6811_s1 + $0x300] sm:$0xff] }
 0x6d2   :  { %2514 = vmatpush.bf16.msra.mxu2 %v5292_v10  ;;  %v5325_v10 = vld [vmem:[#allocation6 + $0xc4] sm:$0xf0] }
 0x6d3   :  { %v2140_v14 = vsel %vm2139_vm7, %v5444_v52, %v2136_v11  ;;  %v5301_v52 = vld [vmem:[%s6811_s1 + $0x348] sm:$0xff]  ;;  %v5308_v11 = vld [vmem:[%s6811_s1 + $0x380] sm:$0xff]  ;;  %vm6848_vm7 = vmmov %vm6847_vm4 }
 0x6d4   :  { %v2141_v36 = vmul.f32 %v2140_v14, %v2129_v12  ;;  %2527 = vmatpush.bf16.msrb.mxu0 %v5301_v52  ;;  %v4735_v52 = vor.u32 %v5327_v62, %v4734_v61  ;;  %v6477_v61 = vld [vmem:[#allocation2 + $0x30] sm:$0xff] }
 0x6d6   :  { %v2144_v18 = vmul.f32 %v5421_v13, %v2141_v36  ;;  %2567 = vmatpush.bf16.msrb.mxu2 %v6154_v26 }
 0x6d8   :  { %v2147_v20 = vadd.f32 %v5422_v5, %v2144_v18  ;;  %2528 = vmatpush.bf16.msrb.mxu0 %v5300_v9  ;;  %v4726_v9 = vld [vmem:[#allocation6 + $0xc0] sm:$0xf] }
 0x6da   :  { %v2148_v21 = vmax.f32 %v2147_v20, 0.0  ;;  %2568 = vmatpush.bf16.msrb.mxu2 %v6158_v27 }
 0x6dc   :  { %v2149_v25 = vpack.c.bf16 %v2148_v21, %v2148_v21 }
 0x6de   :  { %2254 = vmatmul.bf16.vlgmr.msra.gmra.mxu0 %v2149_v25  ;;  %2267 = vmatmul.bf16.vlgmr.msrb.gmra.mxu3 %v2149_v25 }
 0x6df   :  { %2569 = vmatpush.bf16.msrb.mxu2 %v6162_v29 }
 0x6e3   :  { %2570 = vmatpush.bf16.msrb.mxu2 %v6213_v3 }
 0x6e7   :  { %2571 = vmatpush.bf16.msrb.mxu2 %v6217_v4 }
 0x6eb   :  { %2572 = vmatpush.bf16.msrb.mxu2 %v6221_v6 }
 0x6ef   :  { %2573 = vmatpush.bf16.msrb.mxu2 %v6225_v34 }
 0x6f3   :  { %2574 = vmatpush.bf16.msrb.mxu2 %v6229_v60  ;;  %v5423_v60 = vld [vmem:[%s6812_s2 + $0xc] ss:$0 sm:$0xff] }
 0x75b   :  { %v2255_v40 = vpop.f32.mrf.mxu0 }
 0x761   :  { %v2268_v41 = vpop.f32.mrf.mxu3 }
 0x762   :  { %v2272_v43 = vpack.c.bf16 %v2268_v41, %v2255_v40  ;;  %v4750_v40 = vld [vmem:[#allocation6 + $0xf0] sm:$0xf]  ;;  %v5331_v41 = vld [vmem:[#allocation6 + $0xf4] sm:$0xf0] }
 0x763   :  { %v2257_v48 = vpop.f32.mrf.mxu0 }
 0x764   :  { %2290 = vmatpush.bf16.msrb.mxu1 %v2272_v43  ;;  %v4751_v43 = vor.u32 %v5331_v41, %v4750_v40  ;;  %v4752_v48 = vld [vmem:[#allocation6 + $0xf8] sm:$0xf0] }
 0x766   :  { %2721 = vmatpush.bf16.msra.mxu0 %v4751_v43 }
 0x767   :  { %4537 = vmatmul.msk.bf16.vlgmr.msrb.gmra.mxu1 %vm1588_vm13, %v5291_v24  ;;  %vm6845_vm13 = vmpackc.low %vm6171_vm14, %vm6175_vm15 }
 0x768   :  { %2535 = vmatpush.bf16.msra.mxu1 %v5315_v42  ;;  %v5330_v42 = vld [vmem:[#allocation6 + $0xf4] sm:$0xf] }
 0x769   :  { %v2270_v54 = vpop.f32.mrf.mxu3  ;;  %v4755_v24 = vor.u32 %v5330_v42, %v4752_v48 }
 0x76a   :  { %v5329_v54 = vld [vmem:[#allocation6 + $0xe4] sm:$0xf0] }
 0x76c   :  { %2536 = vmatpush.bf16.msra.mxu1 %v5314_v53  ;;  %v4742_v53 = vld [vmem:[#allocation6 + $0xe0] sm:$0xf] }
 0x770   :  { %2537 = vmatpush.bf16.msra.mxu1 %v5313_v56  ;;  %v5328_v56 = vld [vmem:[#allocation6 + $0xe4] sm:$0xf] }
 0x774   :  { %2538 = vmatpush.bf16.msra.mxu1 %v5312_v57  ;;  %v4743_v57 = vor.u32 %v5329_v54, %v4742_v53 }
 0x776   :  { %2722 = vmatpush.bf16.msra.mxu0 %v4743_v57 }
 0x778   :  { %2539 = vmatpush.bf16.msra.mxu1 %v5311_v59  ;;  %v4747_v59 = vor.u32 %v5328_v56, %v4744_v58  ;;  %v6474_v56 = vld [vmem:[#allocation2 + $0x38] sm:$0xff] }
 0x77a   :  { %2723 = vmatpush.bf16.msra.mxu0 %v4735_v52  ;;  %v6480_v52 = vld [vmem:[#allocation2 + $0x28] sm:$0xff] }
 0x77c   :  { %2540 = vmatpush.bf16.msra.mxu1 %v5310_v1  ;;  %v5326_v1 = vld [vmem:[#allocation6 + $0xd4] sm:$0xf] }
 0x780   :  { %2541 = vmatpush.bf16.msra.mxu1 %v5309_v8  ;;  %v4739_v8 = vor.u32 %v5326_v1, %v4736_v7 }
 0x784   :  { %2542 = vmatpush.bf16.msra.mxu1 %v5308_v11  ;;  %v5324_v11 = vld [vmem:[#allocation6 + $0xc4] sm:$0xf] }
 0x788   :  { %2735 = vmatpush.bf16.msrb.mxu1 %v4755_v24 }
 0x78c   :  { %2736 = vmatpush.bf16.msrb.mxu1 %v4747_v59 }
 0x790   :  { %2737 = vmatpush.bf16.msrb.mxu1 %v4739_v8 }
 0x7e4   :  { %v2292_v12 = vpop.f32.mrf.mxu1 }
 0x7e5   :  { %v2293_v13 = vadd.f32 %v2292_v12, %v6242_v15  ;;  %v4727_v12 = vor.u32 %v5325_v10, %v4726_v9 }
 0x7e7   :  { %v2297_v5 = vrot.slane %v2293_v13, 7  ;;  %v2303_v26 = vrot.slane %v2293_v13, 1  ;;  %2724 = vmatpush.bf16.msra.mxu0 %v4727_v12 }
 0x7ec   :  { %v2294_v14 = vpop.f32.mrf.mxu1 }
 0x7ed   :  { %v2295_v36 = vadd.f32 %v2294_v14, %v6244_v19 }
 0x7ef   :  { %v2298_v18 = vrot.slane %v2295_v36, 7  ;;  %v2304_v27 = vrot.slane %v2295_v36, 1  ;;  %v2310_v20 = vpack.c.bf16 %v2295_v36, %v2293_v13  ;;  %v4728_v13 = vld [vmem:[#allocation6 + $0xc8] sm:$0xf0]  ;;  %v4718_v36 = vld [vmem:[#allocation6 + $0xb0] sm:$0xf] }
 0x7f0   :  { %v4731_v14 = vor.u32 %v5324_v11, %v4728_v13  ;;  %v6483_v11 = vld [vmem:[#allocation2 + $0x20] sm:$0xff] }
 0x7f1   :  { %v2299_v29 = vsel %vm196_vm0, %v2297_v5, %v2298_v18  ;;  %v2300_v3 = vsel %vm196_vm0, %v2298_v18, %v2297_v5  ;;  %v2305_v4 = vsel %vm213_vm1, %v2303_v26, %v2304_v27  ;;  %v2306_v6 = vsel %vm213_vm1, %v2304_v27, %v2303_v26  ;;  %2529 = vmatmul.bf16.vlgmr.msrb.gmra.mxu0 %v2310_v20  ;;  %v5323_v5 = vld [vmem:[#allocation6 + $0xb4] sm:$0xf0]  ;;  %v5322_v26 = vld [vmem:[#allocation6 + $0xb4] sm:$0xf]  ;;  %v4720_v27 = vld [vmem:[#allocation6 + $0xb8] sm:$0xf0] }
 0x7f2   :  { %v4685_v34 = vpack.c.bf16 %v2299_v29, %v2300_v3  ;;  %v4690_v15 = vpack.c.bf16 %v2306_v6, %v2305_v4  ;;  %2738 = vmatpush.bf16.msrb.mxu1 %v4731_v14  ;;  %v4719_v18 = vor.u32 %v5323_v5, %v4718_v36  ;;  %v4723_v20 = vor.u32 %v5322_v26, %v4720_v27  ;;  %v4710_v3 = vld [vmem:[#allocation6 + $0xa0] sm:$0xf]  ;;  %v5321_v4 = vld [vmem:[#allocation6 + $0xa4] sm:$0xf0]  ;;  %v5320_v6 = vld [vmem:[#allocation6 + $0xa4] sm:$0xf] }
 0x7f3   :  { %v5424_v26 = vld [vmem:[%s6812_s2 + $0xd] ss:$0 sm:$0xff] }
 0x7f4   :  { %4686 = vmatmul.msk.bf16.vlgmr.msra.gmra.mxu2 %vm6845_vm13, %v4685_v34  ;;  %4691 = vmatmul.msk.bf16.vlgmr.msra.gmra.mxu1 %vm6846_vm8, %v4690_v15  ;;  %v4711_v15 = vor.u32 %v5321_v4, %v4710_v3 }
 0x7f5   :  { %2725 = vmatpush.bf16.msra.mxu0 %v4719_v18  ;;  %v6491_v18 = vld [vmem:[#allocation2 + $0x18] sm:$0xff] }
 0x7f6   :  { %2739 = vmatpush.bf16.msrb.mxu1 %v4723_v20 }
 0x7f9   :  { %2726 = vmatpush.bf16.msra.mxu0 %v4711_v15 }
 0x86e   :  { %v2530_v19 = vpop.f32.mrf.mxu0 }
 0x871   :  { %v2544_v25 = vpop.f32.mrf.mxu1 }
 0x876   :  { %v2532_v45 = vpop.f32.mrf.mxu0 }
 0x877   :  { %v2516_v21 = vpop.f32.mrf.mxu2 }
 0x878   :  { %v2517_v22 = vadd.f32 %v5423_v60, %v2516_v21 }
 0x879   :  { %v2546_v50 = vpop.f32.mrf.mxu1 }
 0x87a   :  { %v2531_v17 = vadd.f32 %v2530_v19, %v2517_v22  ;;  %v4702_v22 = vld [vmem:[#allocation6 + $0x90] sm:$0xf] }
 0x87c   :  { %v6460_v32 = vadd.f32 %v2544_v25, %v2531_v17  ;;  %v5319_v17 = vld [vmem:[#allocation6 + $0x94] sm:$0xf0] }
 0x87e   :  { %v2564_v51 = vmul.f32 %v6460_v32, %v6460_v32 }
 0x87f   :  { %v2518_v44 = vpop.f32.mrf.mxu2 }
 0x880   :  { %v2519_v31 = vadd.f32 %v5423_v60, %v2518_v44  ;;  %v4712_v60 = vld [vmem:[#allocation6 + $0xa8] sm:$0xf0]  ;;  %v5318_v44 = vld [vmem:[#allocation6 + $0x94] sm:$0xf] }
 0x881   :  { %v4715_v21 = vor.u32 %v5320_v6, %v4712_v60 }
 0x882   :  { %v2533_v33 = vadd.f32 %v2532_v45, %v2519_v31  ;;  %v4703_v31 = vor.u32 %v5319_v17, %v4702_v22  ;;  %v4704_v45 = vld [vmem:[#allocation6 + $0x98] sm:$0xf0]  ;;  %v6504_v22 = vld [vmem:[#allocation2] sm:$0xff] }
 0x883   :  { %2740 = vmatpush.bf16.msrb.mxu1 %v4715_v21 }
 0x884   :  { %v6462_v35 = vadd.f32 %v2546_v50, %v2533_v33  ;;  %v4694_v33 = vld [vmem:[#allocation6 + $0x80] sm:$0xf]  ;;  %v5317_v50 = vld [vmem:[#allocation6 + $0x84] sm:$0xf0]  ;;  %2727 = vmatpush.bf16.msra.mxu0 %v4703_v31 }
 0x885   :  { %v4695_v41 = vor.u32 %v5317_v50, %v4694_v33  ;;  %v5356_v33 = vld [vmem:[%s6811_s1 + $0x470] sm:$0xff] }
 0x886   :  { %v2565_v37 = vmul.f32 %v6462_v35, %v6462_v35  ;;  %v2549_v38 = vpack.c.bf16 %v6462_v35, %v6460_v32 }
 0x888   :  { %2558 = vmatmul.bf16.vlgmr.msra.gmra.mxu3 %v2549_v38  ;;  %v2566_v39 = vpack.c.bf16 %v2565_v37, %v2564_v51  ;;  %v4707_v37 = vor.u32 %v5318_v44, %v4704_v45  ;;  %v5316_v38 = vld [vmem:[#allocation6 + $0x84] sm:$0xf]  ;;  %2728 = vmatpush.bf16.msra.mxu0 %v4695_v41  ;;  %v5357_v45 = vld [vmem:[%s6811_s1 + $0x478] sm:$0xff]  ;;  %v5348_v41 = vld [vmem:[%s6811_s1 + $0x430] sm:$0xff] }
 0x88a   :  { %2575 = vmatmul.bf16.vlgmr.msrb.gmra.mxu2 %v2566_v39  ;;  %v4696_v39 = vld [vmem:[#allocation6 + $0x88] sm:$0xf0]  ;;  %2741 = vmatpush.bf16.msrb.mxu1 %v4707_v37 }
 0x88b   :  { %v4699_v43 = vor.u32 %v5316_v38, %v4696_v39  ;;  %v5349_v38 = vld [vmem:[%s6811_s1 + $0x438] sm:$0xff] }
 0x88c   :  { %3053 = vmatpush.bf16.msrb.mxu0 %v5357_v45 }
 0x88e   :  { %2742 = vmatpush.bf16.msrb.mxu1 %v4699_v43  ;;  %v5346_v43 = vld [vmem:[%s6811_s1 + $0x420] sm:$0xff] }
 0x890   :  { %3054 = vmatpush.bf16.msrb.mxu0 %v5356_v33 }
 0x892   :  { %3074 = vmatpush.bf16.msra.mxu1 %v6474_v56 }
 0x896   :  { %3075 = vmatpush.bf16.msra.mxu1 %v6477_v61 }
 0x89a   :  { %3076 = vmatpush.bf16.msra.mxu1 %v6480_v52 }
 0x89e   :  { %3077 = vmatpush.bf16.msra.mxu1 %v6483_v11 }
 0x8a2   :  { %3078 = vmatpush.bf16.msra.mxu1 %v6491_v18 }
 0x90b   :  { %v6470_v29 = vpop.f32.mrf.mxu3 }
 0x90c   :  { %v2581_v34 = vmul.f32 %v6470_v29, %v6470_v29  ;;  %v2587_v14 = vsub.f32 %v6460_v32, %v6470_v29  ;;  %v5425_v32 = vld [vmem:[%s6812_s2 + $0xe] ss:$0 sm:$0xff]  ;;  %v6498_v29 = vld [vmem:[#allocation2 + $0x10] sm:$0xff] }
 0x90d   :  { %v2576_v19 = vpop.f32.mrf.mxu2  ;;  %3079 = vmatpush.bf16.msra.mxu1 %v6498_v29 }
 0x90e   :  { %v2583_v25 = vsub.f32 %v2576_v19, %v2581_v34  ;;  %v6501_v19 = vld [vmem:[#allocation2 + $0x8] sm:$0xff] }
 0x910   :  { %v2585_v51 = vmax.f32 %v2583_v25, 0.0 }
 0x911   :  { %3080 = vmatpush.bf16.msra.mxu1 %v6501_v19 }
 0x912   :  { %v2589_v40 = vadd.f32 1e-06, %v2585_v51 }
 0x913   :  { %v2561_v42 = vpop.f32.mrf.mxu3 }
 0x914   :  { %5445 = vrsqrt.f32 %v2589_v40  ;;  %v2582_v48 = vmul.f32 %v2561_v42, %v2561_v42  ;;  %vm2597_vm15 = vweird.f32 %v2589_v40  ;;  %v2588_v3 = vsub.f32 %v6462_v35, %v2561_v42  ;;  %v5347_v42 = vld [vmem:[%s6811_s1 + $0x428] sm:$0xff] }
 0x915   :  { %v2578_v24 = vpop.f32.mrf.mxu2  ;;  %3081 = vmatpush.bf16.msra.mxu1 %v6504_v22 }
 0x916   :  { %v2584_v53 = vsub.f32 %v2578_v24, %v2582_v48  ;;  %v5345_v48 = vld [vmem:[%s6811_s1 + $0x418] sm:$0xff] }
 0x917   :  { %v5333_v24 = vld [vmem:[#allocation10 + $0x8] sm:$0xff] }
 0x918   :  { %v2586_v54 = vmax.f32 %v2584_v53, 0.0  ;;  %v5341_v53 = vld [vmem:[%s6811_s1 + $0x3f8] sm:$0xff] }
 0x919   :  { %3015 = vmatpush.bf16.msra.mxu2 %v5341_v53 }
 0x91a   :  { %v5446_v57 = vpop.eup %5445  ;;  %v2590_v58 = vadd.f32 1e-06, %v2586_v54  ;;  %v5355_v54 = vld [vmem:[%s6811_s1 + $0x468] sm:$0xff] }
 0x91b   :  { %v2592_v59 = vmul.f32 %v5446_v57, %v2589_v40  ;;  %vm2598_vm14 = vweird.f32 %v5446_v57  ;;  %v5332_v40 = vld [vmem:[#allocation10] sm:$0xff]  ;;  %3055 = vmatpush.bf16.msrb.mxu0 %v5355_v54 }
 0x91c   :  { %5447 = vrsqrt.f32 %v2590_v58  ;;  %vm2599_vm2 = vmor %vm2597_vm15, %vm2598_vm14  ;;  %vm2607_vm11 = vweird.f32 %v2590_v58 }
 0x91d   :  { %v2593_v62 = vmul.f32 %v5446_v57, %v2592_v59  ;;  %v5354_v59 = vld [vmem:[%s6811_s1 + $0x460] sm:$0xff] }
 0x91f   :  { %v2594_v1 = vmul.f32 0.5, %v2593_v62  ;;  %v5343_v62 = vld [vmem:[%s6811_s1 + $0x408] sm:$0xff]  ;;  %3056 = vmatpush.bf16.msrb.mxu0 %v5354_v59 }
 0x921   :  { %v2595_v7 = vsub.f32 1.5, %v2594_v1  ;;  %v5339_v1 = vld [vmem:[%s6811_s1 + $0x3e8] sm:$0xff] }
 0x922   :  { %v5448_v8 = vpop.eup %5447 }
 0x923   :  { %v2596_v9 = vmul.f32 %v5446_v57, %v2595_v7  ;;  %v2602_v10 = vmul.f32 %v5448_v8, %v2590_v58  ;;  %vm2608_vm3 = vweird.f32 %v5448_v8  ;;  %v5340_v58 = vld [vmem:[%s6811_s1 + $0x3f0] sm:$0xff]  ;;  %v5353_v7 = vld [vmem:[%s6811_s1 + $0x458] sm:$0xff] }
 0x924   :  { %vm2609_vm12 = vmor %vm2607_vm11, %vm2608_vm3  ;;  %3016 = vmatpush.bf16.msra.mxu2 %v5340_v58  ;;  %3057 = vmatpush.bf16.msrb.mxu0 %v5353_v7 }
 0x925   :  { %v2600_v12 = vsel %vm2599_vm2, %v5446_v57, %v2596_v9  ;;  %v2603_v13 = vmul.f32 %v5448_v8, %v2602_v10  ;;  %v5344_v57 = vld [vmem:[%s6811_s1 + $0x410] sm:$0xff]  ;;  %v5338_v9 = vld [vmem:[%s6811_s1 + $0x3e0] sm:$0xff] }
 0x926   :  { %v2611_v5 = vmul.f32 %v2600_v12, %v2587_v14  ;;  %v5352_v10 = vld [vmem:[%s6811_s1 + $0x450] sm:$0xff]  ;;  %v5337_v12 = vld [vmem:[%s6811_s1 + $0x3d8] sm:$0xff] }
 0x927   :  { %v2604_v36 = vmul.f32 0.5, %v2603_v13  ;;  %v5351_v13 = vld [vmem:[%s6811_s1 + $0x448] sm:$0xff]  ;;  %v5336_v14 = vld [vmem:[%s6811_s1 + $0x3d0] sm:$0xff] }
 0x928   :  { %v2615_v4 = vmul.f32 %v5424_v26, %v2611_v5  ;;  %3017 = vmatpush.bf16.msra.mxu2 %v5339_v1  ;;  %3058 = vmatpush.bf16.msrb.mxu0 %v5352_v10  ;;  %v5335_v5 = vld [vmem:[%s6811_s1 + $0x3c8] sm:$0xff] }
 0x929   :  { %v2605_v27 = vsub.f32 1.5, %v2604_v36  ;;  %v5350_v36 = vld [vmem:[%s6811_s1 + $0x440] sm:$0xff] }
 0x92a   :  { %v2619_v60 = vadd.f32 %v5425_v32, %v2615_v4 }
 0x92b   :  { %v2606_v20 = vmul.f32 %v5448_v8, %v2605_v27 }
 0x92c   :  { %v2621_v35 = vmax.f32 %v2619_v60, 0.0  ;;  %3018 = vmatpush.bf16.msra.mxu2 %v5338_v9  ;;  %3059 = vmatpush.bf16.msrb.mxu0 %v5351_v13 }
 0x92d   :  { %v2610_v6 = vsel %vm2609_vm12, %v5448_v8, %v2606_v20  ;;  %v5342_v8 = vld [vmem:[%s6811_s1 + $0x400] sm:$0xff] }
 0x92e   :  { %v2612_v34 = vmul.f32 %v2610_v6, %v2588_v3 }
 0x930   :  { %v2616_v15 = vmul.f32 %v5424_v26, %v2612_v34  ;;  %3019 = vmatpush.bf16.msra.mxu2 %v5337_v12  ;;  %3060 = vmatpush.bf16.msrb.mxu0 %v5350_v36  ;;  %v5334_v26 = vld [vmem:[%s6811_s1 + $0x3c0] sm:$0xff] }
 0x932   :  { %v2620_v21 = vadd.f32 %v5425_v32, %v2616_v15 }
 0x934   :  { %v2622_v25 = vmax.f32 %v2620_v21, 0.0  ;;  %3020 = vmatpush.bf16.msra.mxu2 %v5336_v14 }
 0x936   :  { %v2623_v17 = vpack.c.bf16 %v2622_v25, %v2621_v35 }
 0x938   :  { %2729 = vmatmul.bf16.vlgmr.msra.gmra.mxu0 %v2623_v17  ;;  %2743 = vmatmul.bf16.vlgmr.msrb.gmra.mxu1 %v2623_v17 }
 0x939   :  { %3021 = vmatpush.bf16.msra.mxu2 %v5335_v5 }
 0x93d   :  { %3022 = vmatpush.bf16.msra.mxu2 %v5334_v26 }
 0x941   :  { %3099 = vmatpush.bf16.msrb.mxu2 %v6474_v56 }
 0x945   :  { %3100 = vmatpush.bf16.msrb.mxu2 %v6477_v61 }
 0x949   :  { %3101 = vmatpush.bf16.msrb.mxu2 %v6480_v52 }
 0x94d   :  { %3102 = vmatpush.bf16.msrb.mxu2 %v6483_v11 }
 0x951   :  { %3103 = vmatpush.bf16.msrb.mxu2 %v6491_v18 }
 0x955   :  { %3104 = vmatpush.bf16.msrb.mxu2 %v6498_v29 }
 0x959   :  { %3105 = vmatpush.bf16.msrb.mxu2 %v6501_v19 }
 0x95d   :  { %3106 = vmatpush.bf16.msrb.mxu2 %v6504_v22 }
 0x9b5   :  { %v2730_v44 = vpop.f32.mrf.mxu0  ;;  %v2744_v31 = vpop.f32.mrf.mxu1 }
 0x9bd   :  { %v2746_v50 = vpop.f32.mrf.mxu1  ;;  %v2732_v37 = vpop.f32.mrf.mxu0 }
 0x9be   :  { %v2750_v51 = vpack.c.bf16 %v2746_v50, %v2744_v31  ;;  %v2749_v39 = vpack.c.bf16 %v2732_v37, %v2730_v44 }
 0x9c0   :  { %2777 = vmatpush.bf16.msrb.mxu3 %v2750_v51 }
 0x9c4   :  { %2778 = vmatpush.bf16.msrb.mxu3 %v2749_v39 }
 0x9c7   :  { %4764 = vmatmul.msk.bf16.vlgmr.msrb.gmra.mxu3 %vm6847_vm4, %v5332_v40 }
 0x9c8   :  { %3034 = vmatpush.bf16.msra.mxu3 %v5349_v38  ;;  %v5426_v38 = vld [vmem:[%s6812_s2 + $0xf] ss:$0 sm:$0xff] }
 0x9cc   :  { %3035 = vmatpush.bf16.msra.mxu3 %v5348_v41 }
 0x9d0   :  { %3036 = vmatpush.bf16.msra.mxu3 %v5347_v42 }
 0x9d4   :  { %3037 = vmatpush.bf16.msra.mxu3 %v5346_v43 }
 0x9d7   :  { %4765 = vmatmul.msk.bf16.gmra.mxu3 %vm6848_vm7, %v5333_v24 }
 0x9d8   :  { %3038 = vmatpush.bf16.msra.mxu3 %v5345_v48 }
 0x9dc   :  { %3039 = vmatpush.bf16.msra.mxu3 %v5344_v57 }
 0x9e0   :  { %3040 = vmatpush.bf16.msra.mxu3 %v5343_v62 }
 0x9e4   :  { %3041 = vmatpush.bf16.msra.mxu3 %v5342_v8 }
 0xa4a   :  { %v2780_v27 = vpop.f32.mrf.mxu3 }
 0xa4b   :  { %v2781_v3 = vadd.f32 %v2780_v27, %v6053_v28 }
 0xa4d   :  { %v2802_v15 = vrot.slane %v2781_v3, 1  ;;  %v2790_v18 = vrot.slane %v2781_v3, 7 }
 0xa52   :  { %v2782_v20 = vpop.f32.mrf.mxu3 }
 0xa53   :  { %v2783_v4 = vadd.f32 %v2782_v20, %v6059_v30 }
 0xa55   :  { %v2815_v32 = vpack.c.bf16 %v2783_v4, %v2781_v3  ;;  %v2803_v34 = vrot.slane %v2783_v4, 1  ;;  %v2791_v11 = vrot.slane %v2783_v4, 7 }
 0xa57   :  { %3042 = vmatmul.bf16.vlgmr.msra.gmra.mxu3 %v2815_v32  ;;  %v2808_v61 = vsel %vm213_vm1, %v2802_v15, %v2803_v34  ;;  %v2796_v29 = vsel %vm196_vm0, %v2790_v18, %v2791_v11 }
 0xa5a   :  { %v2785_v6 = vpop.f32.mrf.mxu3 }
 0xa5b   :  { %v2786_v56 = vadd.f32 %v2785_v6, %v6055_v55 }
 0xa5d   :  { %v2804_v60 = vrot.slane %v2786_v56, 1  ;;  %v2792_v22 = vrot.slane %v2786_v56, 7 }
 0xa5f   :  { %v2807_v28 = vsel %vm213_vm1, %v2803_v34, %v2804_v60  ;;  %v2795_v33 = vsel %vm196_vm0, %v2791_v11, %v2792_v22  ;;  %v5373_v34 = vld [vmem:[%s6811_s1 + $0x4f8] sm:$0xff] }
 0xa60   :  { %v4920_v30 = vpack.c.bf16 %v2807_v28, %v2808_v61  ;;  %3442 = vmatpush.bf16.msra.mxu0 %v5373_v34  ;;  %v5370_v61 = vld [vmem:[%s6811_s1 + $0x4e0] sm:$0xff]  ;;  %v5369_v11 = vld [vmem:[%s6811_s1 + $0x4d8] sm:$0xff] }
 0xa62   :  { %v2787_v52 = vpop.f32.mrf.mxu3  ;;  %4921 = vmatmul.msk.bf16.vlgmr.msrb.gmra.mxu0 %vm5860_vm6, %v4920_v30  ;;  %v5380_v30 = vld [vmem:[%s6811_s1 + $0x530] sm:$0xff] }
 0xa63   :  { %v2788_v55 = vadd.f32 %v2787_v52, %v6057_v23  ;;  %v5389_v52 = vld [vmem:[%s6816_s6 + $0x38] sm:$0xff] }
 0xa65   :  { %v2793_v21 = vrot.slane %v2788_v55, 7  ;;  %v2818_v35 = vpack.c.bf16 %v2788_v55, %v2786_v56  ;;  %v2805_v17 = vrot.slane %v2788_v55, 1  ;;  %v5372_v56 = vld [vmem:[%s6811_s1 + $0x4f0] sm:$0xff]  ;;  %v5365_v55 = vld [vmem:[%s6811_s1 + $0x4b8] sm:$0xff] }
 0xa66   :  { %3443 = vmatpush.bf16.msra.mxu0 %v5372_v56  ;;  %3423 = vmatpush.bf16.msrb.mxu3 %v5365_v55 }
 0xa67   :  { %v2797_v25 = vsel %vm196_vm0, %v2793_v21, %v2790_v18  ;;  %3047 = vmatmul.bf16.gmra.mxu3 %v2818_v35  ;;  %v2806_v23 = vsel %vm213_vm1, %v2804_v60, %v2805_v17  ;;  %v2809_v44 = vsel %vm213_vm1, %v2805_v17, %v2802_v15  ;;  %v2794_v45 = vsel %vm196_vm0, %v2792_v22, %v2793_v21  ;;  %v5371_v15 = vld [vmem:[%s6811_s1 + $0x4e8] sm:$0xff]  ;;  %v5381_v60 = vld [vmem:[%s6811_s1 + $0x538] sm:$0xff]  ;;  %v5388_v21 = vld [vmem:[%s6816_s6 + $0x30] sm:$0xff] }
 0xa68   :  { %v4912_v19 = vpack.c.bf16 %v2796_v29, %v2797_v25  ;;  %v4924_v31 = vpack.c.bf16 %v2809_v44, %v2806_v23  ;;  %v4916_v50 = vpack.c.bf16 %v2794_v45, %v2795_v33  ;;  %3461 = vmatpush.bf16.msrb.mxu1 %v5381_v60  ;;  %v5379_v18 = vld [vmem:[%s6811_s1 + $0x528] sm:$0xff]  ;;  %v5368_v29 = vld [vmem:[%s6811_s1 + $0x4d0] sm:$0xff]  ;;  %v5378_v44 = vld [vmem:[%s6811_s1 + $0x520] sm:$0xff] }
 0xa69   :  { %v5364_v23 = vld [vmem:[%s6811_s1 + $0x4b0] sm:$0xff]  ;;  %v5367_v45 = vld [vmem:[%s6811_s1 + $0x4c8] sm:$0xff] }
 0xa6a   :  { %4913 = vmatmul.msk.bf16.vlgmr.msra.gmra.mxu2 %vm5855_vm5, %v4912_v19  ;;  %3444 = vmatpush.bf16.msra.mxu0 %v5371_v15  ;;  %v5359_v60 = vld [vmem:[%s6811_s1 + $0x488] sm:$0xff] }
 0xa6b   :  { %3546 = vmatpush.bf16.msra.mxu2 %v5389_v52  ;;  %3424 = vmatpush.bf16.msrb.mxu3 %v5364_v23 }
 0xa6c   :  { %3462 = vmatpush.bf16.msrb.mxu1 %v5380_v30 }
 0xa6e   :  { %3445 = vmatpush.bf16.msra.mxu0 %v5370_v61  ;;  %v5382_v61 = vld [vmem:[%s6816_s6] sm:$0xff] }
 0xa6f   :  { %3547 = vmatpush.bf16.msra.mxu2 %v5388_v21 }
 0xa70   :  { %3463 = vmatpush.bf16.msrb.mxu1 %v5379_v18  ;;  %v5358_v18 = vld [vmem:[%s6811_s1 + $0x480] sm:$0xff] }
 0xa72   :  { %4925 = vmatmul.msk.bf16.gmra.mxu0 %vm5897_vm10, %v4924_v31  ;;  %v5387_v31 = vld [vmem:[%s6816_s6 + $0x28] sm:$0xff] }
 0xa73   :  { %3446 = vmatpush.bf16.msra.mxu0 %v5369_v11  ;;  %3548 = vmatpush.bf16.msra.mxu2 %v5387_v31 }
 0xa74   :  { %3464 = vmatpush.bf16.msrb.mxu1 %v5378_v44 }
 0xa77   :  { %3447 = vmatpush.bf16.msra.mxu0 %v5368_v29 }
 0xa7a   :  { %4917 = vmatmul.msk.bf16.gmra.mxu2 %vm5892_vm9, %v4916_v50  ;;  %v5363_v50 = vld [vmem:[%s6811_s1 + $0x4a8] sm:$0xff] }
 0xa7b   :  { %3448 = vmatpush.bf16.msra.mxu0 %v5367_v45  ;;  %3425 = vmatpush.bf16.msrb.mxu3 %v5363_v50  ;;  %v5428_v50 = vld [vmem:[%s6812_s2 + $0x11] ss:$0 sm:$0xff] }
 0xada   :  { %v3043_v51 = vpop.f32.mrf.mxu3 }
 0xadf   :  { %v3062_v37 = vpop.f32.mrf.mxu0 }
 0xae2   :  { %v3045_v41 = vpop.f32.mrf.mxu3 }
 0xae7   :  { %v3064_v43 = vpop.f32.mrf.mxu0 }
 0xaea   :  { %v3048_v1 = vpop.f32.mrf.mxu3 }
 0xaed   :  { %v3024_v39 = vpop.f32.mrf.mxu2 }
 0xaee   :  { %v3025_v40 = vadd.f32 %v5426_v38, %v3024_v39  ;;  %v5366_v39 = vld [vmem:[%s6811_s1 + $0x4c0] sm:$0xff] }
 0xaef   :  { %v3067_v9 = vpop.f32.mrf.mxu0  ;;  %3449 = vmatpush.bf16.msra.mxu0 %v5366_v39 }
 0xaf0   :  { %v3044_v42 = vadd.f32 %v3043_v51, %v3025_v40  ;;  %v5377_v51 = vld [vmem:[%s6811_s1 + $0x518] sm:$0xff] }
 0xaf1   :  { %3465 = vmatpush.bf16.msrb.mxu1 %v5377_v51 }
 0xaf2   :  { %v6620_v53 = vadd.f32 %v3062_v37, %v3044_v42  ;;  %v3050_v36 = vpop.f32.mrf.mxu3  ;;  %v5386_v37 = vld [vmem:[%s6816_s6 + $0x20] sm:$0xff] }
 0xaf3   :  { %3549 = vmatpush.bf16.msra.mxu2 %v5386_v37 }
 0xaf4   :  { %v3093_v58 = vmul.f32 %v6620_v53, %v6620_v53 }
 0xaf5   :  { %v3026_v48 = vpop.f32.mrf.mxu2 }
 0xaf6   :  { %v3027_v24 = vadd.f32 %v5426_v38, %v3026_v48  ;;  %v5376_v48 = vld [vmem:[%s6811_s1 + $0x510] sm:$0xff] }
 0xaf7   :  { %v3069_v27 = vpop.f32.mrf.mxu0  ;;  %3466 = vmatpush.bf16.msrb.mxu1 %v5376_v48 }
 0xaf8   :  { %v3046_v54 = vadd.f32 %v3045_v41, %v3027_v24  ;;  %v5385_v24 = vld [vmem:[%s6816_s6 + $0x18] sm:$0xff] }
 0xaf9   :  { %3550 = vmatpush.bf16.msra.mxu2 %v5385_v24 }
 0xafa   :  { %v6622_v57 = vadd.f32 %v3064_v43, %v3046_v54  ;;  %v5362_v43 = vld [vmem:[%s6811_s1 + $0x4a0] sm:$0xff] }
 0xafb   :  { %3426 = vmatpush.bf16.msrb.mxu3 %v5362_v43 }
 0xafc   :  { %v3072_v59 = vpack.c.bf16 %v6622_v57, %v6620_v53  ;;  %v3094_v62 = vmul.f32 %v6622_v57, %v6622_v57 }
 0xafd   :  { %v3029_v7 = vpop.f32.mrf.mxu2 }
 0xafe   :  { %v3097_v8 = vpack.c.bf16 %v3094_v62, %v3093_v58  ;;  %3082 = vmatmul.bf16.vlgmr.msra.gmra.mxu1 %v3072_v59  ;;  %v3030_v10 = vadd.f32 %v5426_v38, %v3029_v7  ;;  %v5375_v7 = vld [vmem:[%s6811_s1 + $0x508] sm:$0xff] }
 0xaff   :  { %3467 = vmatpush.bf16.msrb.mxu1 %v5375_v7 }
 0xb00   :  { %3107 = vmatmul.bf16.vlgmr.msrb.gmra.mxu2 %v3097_v8  ;;  %v3049_v12 = vadd.f32 %v3048_v1, %v3030_v10  ;;  %v5361_v1 = vld [vmem:[%s6811_s1 + $0x498] sm:$0xff]  ;;  %v5384_v8 = vld [vmem:[%s6816_s6 + $0x10] sm:$0xff] }
 0xb01   :  { %3427 = vmatpush.bf16.msrb.mxu3 %v5361_v1  ;;  %3551 = vmatpush.bf16.msra.mxu2 %v5384_v8 }
 0xb02   :  { %v6630_v5 = vadd.f32 %v3067_v9, %v3049_v12 }
 0xb04   :  { %v3095_v4 = vmul.f32 %v6630_v5, %v6630_v5 }
 0xb05   :  { %v3031_v13 = vpop.f32.mrf.mxu2 }
 0xb06   :  { %v3032_v14 = vadd.f32 %v5426_v38, %v3031_v13 }
 0xb08   :  { %v3051_v26 = vadd.f32 %v3050_v36, %v3032_v14  ;;  %v5360_v14 = vld [vmem:[%s6811_s1 + $0x490] sm:$0xff]  ;;  %v5374_v36 = vld [vmem:[%s6811_s1 + $0x500] sm:$0xff] }
 0xb09   :  { %3428 = vmatpush.bf16.msrb.mxu3 %v5360_v14  ;;  %3468 = vmatpush.bf16.msrb.mxu1 %v5374_v36 }
 0xb0a   :  { %v6632_v20 = vadd.f32 %v3069_v27, %v3051_v26  ;;  %v5383_v27 = vld [vmem:[%s6816_s6 + $0x8] sm:$0xff] }
 0xb0b   :  { %3552 = vmatpush.bf16.msra.mxu2 %v5383_v27 }
 0xb0c   :  { %v3073_v3 = vpack.c.bf16 %v6632_v20, %v6630_v5  ;;  %v3096_v32 = vmul.f32 %v6632_v20, %v6632_v20 }
 0xb0d   :  { %3429 = vmatpush.bf16.msrb.mxu3 %v5359_v60 }
 0xb0e   :  { %3087 = vmatmul.bf16.gmra.mxu1 %v3073_v3  ;;  %v3098_v6 = vpack.c.bf16 %v3096_v32, %v3095_v4 }
 0xb0f   :  { %3553 = vmatpush.bf16.msra.mxu2 %v5382_v61 }
 0xb10   :  { %3112 = vmatmul.bf16.gmra.mxu2 %v3098_v6 }
 0xb11   :  { %3430 = vmatpush.bf16.msrb.mxu3 %v5358_v18 }
 0xb20   :  { %3554 = vmatmul.bf16.vlgmr.msra.gmra.mxu2 %v5852_v46 }
 0xb30   :  { %3559 = vmatmul.bf16.gmra.mxu2 %v5889_v63 }
 0xb7b   :  { %v6655_v28 = vpop.f32.mrf.mxu1 }
 0xb7c   :  { %v3118_v35 = vmul.f32 %v6655_v28, %v6655_v28  ;;  %v3130_v21 = vsub.f32 %v6620_v53, %v6655_v28 }
 0xb83   :  { %v6680_v25 = vpop.f32.mrf.mxu1  ;;  %v3108_v19 = vpop.f32.mrf.mxu2 }
 0xb84   :  { %v3122_v17 = vsub.f32 %v3108_v19, %v3118_v35  ;;  %v3119_v38 = vmul.f32 %v6680_v25, %v6680_v25  ;;  %v3131_v53 = vsub.f32 %v6622_v57, %v6680_v25 }
 0xb86   :  { %v3126_v22 = vmax.f32 %v3122_v17, 0.0  ;;  %v5427_v17 = vld [vmem:[%s6812_s2 + $0x10] ss:$0 sm:$0xff] }
 0xb88   :  { %v3134_v33 = vadd.f32 1e-06, %v3126_v22 }
 0xb8a   :  { %5449 = vrsqrt.f32 %v3134_v33  ;;  %vm3144_vm8 = vweird.f32 %v3134_v33 }
 0xb8b   :  { %v3110_v40 = vpop.f32.mrf.mxu2  ;;  %v6708_v42 = vpop.f32.mrf.mxu1 }
 0xb8c   :  { %v3123_v41 = vsub.f32 %v3110_v40, %v3119_v38  ;;  %v3120_v9 = vmul.f32 %v6708_v42, %v6708_v42 }
 0xb8e   :  { %v3127_v54 = vmax.f32 %v3123_v41, 0.0 }
 0xb90   :  { %v5450_v58 = vpop.eup %5449  ;;  %v3135_v59 = vadd.f32 1e-06, %v3127_v54  ;;  %v3132_v54 = vsub.f32 %v6630_v5, %v6708_v42 }
 0xb91   :  { %v3139_v62 = vmul.f32 %v5450_v58, %v3134_v33  ;;  %vm3145_vm13 = vweird.f32 %v5450_v58 }
 0xb92   :  { %5451 = vrsqrt.f32 %v3135_v59  ;;  %vm3146_vm14 = vmor %vm3144_vm8, %vm3145_vm13  ;;  %vm3154_vm2 = vweird.f32 %v3135_v59 }
 0xb93   :  { %v3140_v10 = vmul.f32 %v5450_v58, %v3139_v62  ;;  %v3113_v12 = vpop.f32.mrf.mxu2  ;;  %v6739_v32 = vpop.f32.mrf.mxu1 }
 0xb94   :  { %v3124_v13 = vsub.f32 %v3113_v12, %v3120_v9  ;;  %v3121_v30 = vmul.f32 %v6739_v32, %v6739_v32  ;;  %v3133_v5 = vsub.f32 %v6632_v20, %v6739_v32 }
 0xb95   :  { %v3141_v26 = vmul.f32 0.5, %v3140_v10 }
 0xb96   :  { %v3128_v3 = vmax.f32 %v3124_v13, 0.0 }
 0xb97   :  { %v3142_v4 = vsub.f32 1.5, %v3141_v26 }
 0xb98   :  { %v5452_v6 = vpop.eup %5451  ;;  %v3136_v34 = vadd.f32 1e-06, %v3128_v3 }
 0xb99   :  { %v3143_v56 = vmul.f32 %v5450_v58, %v3142_v4  ;;  %v3149_v15 = vmul.f32 %v5452_v6, %v3135_v59  ;;  %vm3155_vm15 = vweird.f32 %v5452_v6 }
 0xb9a   :  { %5453 = vrsqrt.f32 %v3136_v34  ;;  %vm3156_vm3 = vmor %vm3154_vm2, %vm3155_vm15  ;;  %vm3164_vm12 = vweird.f32 %v3136_v34 }
 0xb9b   :  { %v3147_v52 = vsel %vm3146_vm14, %v5450_v58, %v3143_v56  ;;  %v3150_v11 = vmul.f32 %v5452_v6, %v3149_v15  ;;  %v3115_v55 = vpop.f32.mrf.mxu2 }
 0xb9c   :  { %v3125_v35 = vsub.f32 %v3115_v55, %v3121_v30  ;;  %v3178_v19 = vmul.f32 %v3147_v52, %v3130_v21 }
 0xb9d   :  { %v3151_v29 = vmul.f32 0.5, %v3150_v11 }
 0xb9e   :  { %v3129_v23 = vmax.f32 %v3125_v35, 0.0  ;;  %v3184_v28 = vmul.f32 %v5427_v17, %v3178_v19 }
 0xb9f   :  { %v3152_v44 = vsub.f32 1.5, %v3151_v29 }
 0xba0   :  { %v5454_v31 = vpop.eup %5453  ;;  %v3137_v22 = vadd.f32 1e-06, %v3129_v23  ;;  %v3190_v46 = vadd.f32 %v5428_v50, %v3184_v28 }
 0xba1   :  { %v3153_v45 = vmul.f32 %v5452_v6, %v3152_v44  ;;  %v3159_v33 = vmul.f32 %v5454_v31, %v3136_v34  ;;  %vm3165_vm11 = vweird.f32 %v5454_v31  ;;  %v5429_v44 = vld [vmem:[%s6812_s2 + $0x12] ss:$0 sm:$0xff] }
 0xba2   :  { %5455 = vrsqrt.f32 %v3137_v22  ;;  %v3194_v25 = vmax.f32 %v3190_v46, 0.0  ;;  %vm3166_vm4 = vmor %vm3164_vm12, %vm3165_vm11  ;;  %vm3174_vm13 = vweird.f32 %v3137_v22 }
 0xba3   :  { %v3157_v51 = vsel %vm3156_vm3, %v5452_v6, %v3153_v45  ;;  %v3160_v37 = vmul.f32 %v5454_v31, %v3159_v33  ;;  %v3555_v47 = vpop.f32.mrf.mxu2 }
 0xba4   :  { %v3179_v38 = vmul.f32 %v3157_v51, %v3131_v53  ;;  %v3210_v26 = vrot.slane %v3194_v25, 1  ;;  %v3198_v32 = vrot.slane %v3194_v25, 7  ;;  %v3556_v16 = vadd.f32 %v5430_v2, %v3555_v47 }
 0xba5   :  { %v3161_v39 = vmul.f32 0.5, %v3160_v37 }
 0xba6   :  { %v3185_v40 = vmul.f32 %v5427_v17, %v3179_v38 }
 0xba7   :  { %v3162_v41 = vsub.f32 1.5, %v3161_v39 }
 0xba8   :  { %v5456_v43 = vpop.eup %5455  ;;  %v3191_v48 = vadd.f32 %v5428_v50, %v3185_v40 }
 0xba9   :  { %v3163_v24 = vmul.f32 %v5454_v31, %v3162_v41  ;;  %v3169_v57 = vmul.f32 %v5456_v43, %v3137_v22  ;;  %vm3175_vm7 = vweird.f32 %v5456_v43 }
 0xbaa   :  { %v3195_v58 = vmax.f32 %v3191_v48, 0.0  ;;  %vm3176_vm8 = vmor %vm3174_vm13, %vm3175_vm7 }
 0xbab   :  { %v3167_v59 = vsel %vm3166_vm4, %v5454_v31, %v3163_v24  ;;  %v3170_v62 = vmul.f32 %v5456_v43, %v3169_v57  ;;  %v3557_v28 = vpop.f32.mrf.mxu2 }
 0xbac   :  { %v3180_v1 = vmul.f32 %v3167_v59, %v3132_v54  ;;  %v3223_v7 = vpack.c.bf16 %v3195_v58, %v3194_v25  ;;  %v3211_v14 = vrot.slane %v3195_v58, 1  ;;  %v3199_v15 = vrot.slane %v3195_v58, 7 }
 0xbad   :  { %v3171_v8 = vmul.f32 0.5, %v3170_v62  ;;  %v3558_v41 = vadd.f32 %v5430_v2, %v3557_v28 }
 0xbae   :  { %v3186_v9 = vmul.f32 %v5427_v17, %v3180_v1  ;;  %3450 = vmatmul.bf16.vlgmr.msra.gmra.mxu0 %v3223_v7  ;;  %v3216_v6 = vsel %vm213_vm1, %v3210_v26, %v3211_v14  ;;  %v3204_v52 = vsel %vm196_vm0, %v3198_v32, %v3199_v15 }
 0xbaf   :  { %v3172_v10 = vsub.f32 1.5, %v3171_v8 }
 0xbb0   :  { %v3192_v12 = vadd.f32 %v5428_v50, %v3186_v9 }
 0xbb1   :  { %v3173_v13 = vmul.f32 %v5456_v43, %v3172_v10 }
 0xbb2   :  { %v3196_v42 = vmax.f32 %v3192_v12, 0.0 }
 0xbb3   :  { %v3177_v36 = vsel %vm3176_vm8, %v5456_v43, %v3173_v13  ;;  %v3560_v48 = vpop.f32.mrf.mxu2 }
 0xbb4   :  { %v3212_v27 = vrot.slane %v3196_v42, 1  ;;  %v3181_v3 = vmul.f32 %v3177_v36, %v3133_v5  ;;  %v3200_v35 = vrot.slane %v3196_v42, 7  ;;  %v3561_v7 = vadd.f32 %v5430_v2, %v3560_v48 }
 0xbb6   :  { %v3215_v4 = vsel %vm213_vm1, %v3211_v14, %v3212_v27  ;;  %v3187_v63 = vmul.f32 %v5427_v17, %v3181_v3  ;;  %v3203_v19 = vsel %vm196_vm0, %v3199_v15, %v3200_v35 }
 0xbb7   :  { %v5080_v34 = vpack.c.bf16 %v3215_v4, %v3216_v6 }
 0xbb8   :  { %v3193_v56 = vadd.f32 %v5428_v50, %v3187_v63 }
 0xbb9   :  { %5081 = vmatmul.msk.bf16.vlgmr.msrb.gmra.mxu1 %vm5860_vm6, %v5080_v34 }
 0xbba   :  { %v3197_v20 = vmax.f32 %v3193_v56, 0.0 }
 0xbbc   :  { %v3201_v60 = vrot.slane %v3197_v20, 7  ;;  %v3226_v61 = vpack.c.bf16 %v3197_v20, %v3196_v42  ;;  %v3213_v55 = vrot.slane %v3197_v20, 1 }
 0xbbe   :  { %v3205_v30 = vsel %vm196_vm0, %v3201_v60, %v3198_v32  ;;  %3455 = vmatmul.bf16.gmra.mxu0 %v3226_v61  ;;  %v3214_v49 = vsel %vm213_vm1, %v3212_v27, %v3213_v55  ;;  %v3217_v18 = vsel %vm213_vm1, %v3213_v55, %v3210_v26  ;;  %v3202_v29 = vsel %vm196_vm0, %v3200_v35, %v3201_v60  ;;  %v3562_v26 = vpop.f32.mrf.mxu2 }
 0xbbf   :  { %v5072_v11 = vpack.c.bf16 %v3204_v52, %v3205_v30  ;;  %v5084_v21 = vpack.c.bf16 %v3217_v18, %v3214_v49  ;;  %v5076_v17 = vpack.c.bf16 %v3202_v29, %v3203_v19  ;;  %v3563_v34 = vadd.f32 %v5430_v2, %v3562_v26 }
 0xbc1   :  { %5073 = vmatmul.msk.bf16.vlgmr.msrb.gmra.mxu3 %vm5855_vm5, %v5072_v11 }
 0xbc9   :  { %5085 = vmatmul.msk.bf16.gmra.mxu1 %vm5897_vm10, %v5084_v21 }
 0xbd1   :  { %5077 = vmatmul.msk.bf16.gmra.mxu3 %vm5892_vm9, %v5076_v17 }
 0xc2b   :  { %v3451_v23 = vpop.f32.mrf.mxu0 }
 0xc33   :  { %v3453_v50 = vpop.f32.mrf.mxu0 }
 0xc36   :  { %v3470_v31 = vpop.f32.mrf.mxu1 }
 0xc3b   :  { %v3456_v24 = vpop.f32.mrf.mxu0 }
 0xc3e   :  { %v3472_v51 = vpop.f32.mrf.mxu1 }
 0xc43   :  { %v3458_v42 = vpop.f32.mrf.mxu0 }
 0xc44   :  { %v3432_v22 = vpop.f32.mrf.mxu3 }
 0xc45   :  { %v3433_v45 = vadd.f32 %v5429_v44, %v3432_v22 }
 0xc46   :  { %v3475_v59 = vpop.f32.mrf.mxu1 }
 0xc47   :  { %v3452_v33 = vadd.f32 %v3451_v23, %v3433_v45 }
 0xc49   :  { %v3471_v53 = vadd.f32 %v3470_v31, %v3452_v33 }
 0xc4b   :  { %v3565_v0 = vadd.f32 %v3556_v16, %v3471_v53 }
 0xc4c   :  { %v3434_v37 = vpop.f32.mrf.mxu3 }
 0xc4d   :  { %v5118_v38 = vmul.f32 -1.442695, %v3565_v0  ;;  %v3435_v39 = vadd.f32 %v5429_v44, %v3434_v37 }
 0xc4e   :  { %v3477_v4 = vpop.f32.mrf.mxu1 }
 0xc4f   :  { %5457 = vpow2.f32 %v5118_v38  ;;  %v3454_v46 = vadd.f32 %v3453_v50, %v3435_v39 }
 0xc51   :  { %v3473_v40 = vadd.f32 %v3472_v51, %v3454_v46 }
 0xc53   :  { %v3566_v43 = vadd.f32 %v3558_v41, %v3473_v40 }
 0xc54   :  { %v3437_v57 = vpop.f32.mrf.mxu3 }
 0xc55   :  { %v5458_v25 = vpop.eup %5457  ;;  %v5119_v54 = vmul.f32 -1.442695, %v3566_v43  ;;  %v3438_v58 = vadd.f32 %v5429_v44, %v3437_v57 }
 0xc56   :  { %v3581_v62 = vadd.f32 1.0, %v5458_v25 }
 0xc57   :  { %5459 = vpow2.f32 %v5119_v54  ;;  %v3457_v1 = vadd.f32 %v3456_v24, %v3438_v58 }
 0xc58   :  { %5461 = vrcp.f32 %v3581_v62  ;;  %v3596_v56 = vand.u32 2147483648, %v3581_v62  ;;  %v3594_v20 = vand.u32 2147483647, %v3581_v62  ;;  %vm3590_vm1 = vweird.f32 %v3581_v62 }
 0xc59   :  { %v3476_v8 = vadd.f32 %v3475_v59, %v3457_v1 }
 0xc5a   :  { %v3597_v11 = vor.u32 1.1754944e-38, %v3596_v56  ;;  %vm3595_vm6 = vcmp.eq.f32.partialorder %v3594_v20, 8.507059e+37 }
 0xc5b   :  { %v3567_v9 = vadd.f32 %v3561_v7, %v3476_v8 }
 0xc5c   :  { %v3439_v10 = vpop.f32.mrf.mxu3 }
 0xc5d   :  { %v5460_v12 = vpop.eup %5459  ;;  %v5120_v13 = vmul.f32 -1.442695, %v3567_v9  ;;  %v3440_v14 = vadd.f32 %v5429_v44, %v3439_v10 }
 0xc5e   :  { %v5462_v5 = vpop.eup %5461  ;;  %v3582_v36 = vadd.f32 1.0, %v5460_v12 }
 0xc5f   :  { %v3586_v27 = vmul.f32 %v5462_v5, %v3581_v62  ;;  %5463 = vpow2.f32 %v5120_v13  ;;  %v3459_v3 = vadd.f32 %v3458_v42, %v3440_v14  ;;  %vm3591_vm0 = vweird.f32 %v5462_v5 }
 0xc60   :  { %5465 = vrcp.f32 %v3582_v36  ;;  %vm3592_vm5 = vmor %vm3590_vm1, %vm3591_vm0  ;;  %v3611_v29 = vand.u32 2147483648, %v3582_v36  ;;  %v3609_v17 = vand.u32 2147483647, %v3582_v36  ;;  %vm3605_vm10 = vweird.f32 %v3582_v36 }
 0xc61   :  { %v3587_v6 = vsub.f32 1.0, %v3586_v27  ;;  %v3478_v63 = vadd.f32 %v3477_v4, %v3459_v3 }
 0xc62   :  { %v3612_v31 = vor.u32 1.1754944e-38, %v3611_v29  ;;  %vm3610_vm15 = vcmp.eq.f32.partialorder %v3609_v17, 8.507059e+37 }
 0xc63   :  { %v3588_v15 = vmul.f32 %v5462_v5, %v3587_v6  ;;  %v3568_v32 = vadd.f32 %v3563_v34, %v3478_v63 }
 0xc65   :  { %v5464_v60 = vpop.eup %5463  ;;  %v3589_v61 = vadd.f32 %v5462_v5, %v3588_v15  ;;  %v5121_v30 = vmul.f32 -1.442695, %v3568_v32 }
 0xc66   :  { %v5466_v52 = vpop.eup %5465  ;;  %v3583_v55 = vadd.f32 1.0, %v5464_v60 }
 0xc67   :  { %v3593_v49 = vsel %vm3592_vm5, %v5462_v5, %v3589_v61  ;;  %v3601_v18 = vmul.f32 %v5466_v52, %v3582_v36  ;;  %5467 = vpow2.f32 %v5121_v30  ;;  %vm3606_vm9 = vweird.f32 %v5466_v52 }
 0xc68   :  { %v3598_v21 = vsel %vm3595_vm6, %v3597_v11, %v3593_v49  ;;  %5469 = vrcp.f32 %v3583_v55  ;;  %vm3607_vm14 = vmor %vm3605_vm10, %vm3606_vm9  ;;  %v3626_v53 = vand.u32 2147483648, %v3583_v55  ;;  %v3624_v50 = vand.u32 2147483647, %v3583_v55 }
 0xc69   :  { %3645 = vst [vmem:[%s6821_s11] sm:$0xff] %v3598_v21  ;;  %v3602_v35 = vsub.f32 1.0, %v3601_v18  ;;  %vm3620_vm3 = vweird.f32 %v3583_v55 }
 0xc6a   :  { %v3627_v37 = vor.u32 1.1754944e-38, %v3626_v53  ;;  %vm3625_vm12 = vcmp.eq.f32.partialorder %v3624_v50, 8.507059e+37 }
 0xc6b   :  { %v3603_v19 = vmul.f32 %v5466_v52, %v3602_v35 }
 0xc6d   :  { %v5468_v47 = vpop.eup %5467  ;;  %v3604_v23 = vadd.f32 %v5466_v52, %v3603_v19 }
 0xc6e   :  { %v5470_v44 = vpop.eup %5469  ;;  %v3584_v2 = vadd.f32 1.0, %v5468_v47 }
 0xc6f   :  { %v3608_v22 = vsel %vm3607_vm14, %v5466_v52, %v3604_v23  ;;  %v3616_v45 = vmul.f32 %v5470_v44, %v3583_v55  ;;  %vm3621_vm2 = vweird.f32 %v5470_v44 }
 0xc70   :  { %v3613_v33 = vsel %vm3610_vm15, %v3612_v31, %v3608_v22  ;;  %5471 = vrcp.f32 %v3584_v2  ;;  %vm3622_vm11 = vmor %vm3620_vm3, %vm3621_vm2  ;;  %v3641_v41 = vand.u32 2147483648, %v3584_v2  ;;  %v3639_v48 = vand.u32 2147483647, %v3584_v2 }
 0xc71   :  { %3646 = vst [vmem:[%s6821_s11 + $0x8] sm:$0xff] %v3613_v33  ;;  %v3617_v16 = vsub.f32 1.0, %v3616_v45  ;;  %vm3635_vm7 = vweird.f32 %v3584_v2 }
 0xc72   :  { %v3642_v57 = vor.u32 1.1754944e-38, %v3641_v41  ;;  %vm3640_vm8 = vcmp.eq.f32.partialorder %v3639_v48, 8.507059e+37 }
 0xc73   :  { %v3618_v28 = vmul.f32 %v5470_v44, %v3617_v16 }
 0xc75   :  { %v3619_v0 = vadd.f32 %v5470_v44, %v3618_v28 }
 0xc76   :  { %v5472_v51 = vpop.eup %5471 }
 0xc77   :  { %v3623_v38 = vsel %vm3622_vm11, %v5470_v44, %v3619_v0  ;;  %v3631_v39 = vmul.f32 %v5472_v51, %v3584_v2  ;;  %vm3636_vm4 = vweird.f32 %v5472_v51 }
 0xc78   :  { %v3628_v46 = vsel %vm3625_vm12, %v3627_v37, %v3623_v38  ;;  %vm3637_vm13 = vmor %vm3635_vm7, %vm3636_vm4 }
 0xc79   :  { %3647 = vst [vmem:[%s6821_s11 + $0x10] sm:$0xff] %v3628_v46  ;;  %v3632_v40 = vsub.f32 1.0, %v3631_v39 }
 0xc7b   :  { %v3633_v43 = vmul.f32 %v5472_v51, %v3632_v40 }
 0xc7d   :  { %v3634_v24 = vadd.f32 %v5472_v51, %v3633_v43 }
 0xc7f   :  { %v3638_v25 = vsel %vm3637_vm13, %v5472_v51, %v3634_v24 }
 0xc80   :  { %v3643_v54 = vsel %vm3640_vm8, %v3642_v57, %v3638_v25 }
 0xc81   :  { %3648 = vst [vmem:[%s6821_s11 + $0x18] sm:$0xff] %v3643_v54 }
 0xc82   :  { %3653 = vsyncpa [#allocation3], 1 }
 0xc83   :  { %3654 = vsyncpa [#allocation5], 1 }
 0xc84   :  { %3655 = vsyncpa [#allocation8], 1 }
 0xc85   :  { %3656 = vsyncpa [#allocation11], 1 }

</bundles_post_ra>
